<compile_context>
chip_gen: v5e
topology: v5e:2x2
jax: 0.10.0
libtpu: 0.0.40
codegen_flags: <defaults>
</compile_context>

<pallas_src>
import math
import jax
import jax.numpy as jnp
from jax import lax
from jax.experimental import pallas as pl
from jax.experimental.pallas import tpu as pltpu

INPUT_DIM = 1
OUTPUT_DIM = 1
HIDDEN = 64
NUM_HEADS = 4
HEAD_DIM = HIDDEN // NUM_HEADS
NUM_LAYERS = 4
FFN = HIDDEN * 4
LN_EPS = 1e-5


def _layernorm(x, w, b):
    # Single-pass mean / mean-of-squares: the two cross-lane reductions are
    # independent and can overlap on the XLU.
    inv_n = 1.0 / x.shape[-1]
    mu = jnp.sum(x, axis=-1, keepdims=True) * inv_n
    ex2 = jnp.sum(x * x, axis=-1, keepdims=True) * inv_n
    var = ex2 - mu * mu
    return (x - mu) * lax.rsqrt(var + LN_EPS) * w + b


def _fused_kernel(x_ref, ew_ref, eb_ref,
                  wqkv_ref, bqkv_ref, wo_ref, bo_ref,
                  w1_ref, b1_ref, w2_ref, b2_ref,
                  ln1w_ref, ln1b_ref, ln2w_ref, ln2b_ref,
                  ow_ref, ob_ref, o_ref, qkv_scr, ctx_scr):
    BT, S, _ = x_ref.shape
    M = BT * S

    # ---- embedding Linear(1 -> H): K == 1 degenerates to broadcast mul-add ----
    x2 = x_ref[...].reshape(M, INPUT_DIM)                      # (M, 1)
    h = x2 * ew_ref[...] + eb_ref[...]                         # (M, H)

    for l in range(NUM_LAYERS):                                # statically unrolled
        # ---- multi-head self-attention ----
        # 1/sqrt(head_dim) already folded into the Q columns of wqkv/bqkv at init.
        qkv = jnp.dot(h, wqkv_ref[l], preferred_element_type=jnp.float32) + bqkv_ref[l]
        qkv_scr[...] = qkv.reshape(BT, S, 3 * HIDDEN)          # stage -> sliced ref loads

        for hd in range(NUM_HEADS):
            lo = hd * HEAD_DIM
            hi = lo + HEAD_DIM
            q = qkv_scr[:, :, lo:hi]                                   # (BT, S, hd)
            k = qkv_scr[:, :, HIDDEN + lo:HIDDEN + hi]                 # (BT, S, hd)
            v = qkv_scr[:, :, 2 * HIDDEN + lo:2 * HIDDEN + hi]         # (BT, S, hd)

            s = jnp.einsum('bqd,bkd->bqk', q, k,
                           preferred_element_type=jnp.float32)         # (BT, S, S)
            s = s - jnp.max(s, axis=-1, keepdims=True)
            p = jnp.exp(s)
            p = p * pl.reciprocal(jnp.sum(p, axis=-1, keepdims=True), approx=True)
            ah = jnp.einsum('bqk,bkd->bqd', p, v,
                            preferred_element_type=jnp.float32)        # (BT, S, hd)
            ctx_scr[:, :, lo:hi] = ah                      # head "concat" via lane slice

        # single fused K=64 output projection (replaces 4 K=16 matmuls + 4 adds)
        attn = jnp.dot(ctx_scr[...].reshape(M, HIDDEN), wo_ref[l],
                       preferred_element_type=jnp.float32) + bo_ref[l]

        # TODO(synk): dropout layers are identity (inference/eval semantics).
        y = _layernorm(h + attn, ln1w_ref[l], ln1b_ref[l])

        # ---- feed-forward ----
        f1 = jnp.maximum(
            jnp.dot(y, w1_ref[l], preferred_element_type=jnp.float32) + b1_ref[l], 0.0)
        f2 = jnp.dot(f1, w2_ref[l], preferred_element_type=jnp.float32) + b2_ref[l]
        h = _layernorm(y + f2, ln2w_ref[l], ln2b_ref[l])

    # ---- output Linear(H -> 1), written lane-major as a (1, M) row ----
    yT = lax.dot_general(ow_ref[...], h, (((1,), (1,)), ((), ())),
                         preferred_element_type=jnp.float32)   # (1, M)
    o_ref[0] = (yT + ob_ref[...]).astype(o_ref.dtype)


def _pick_bt(batch, seq, row_cap=2048, split_min_rows=512):
    """Batch-tile selection (perf-review tuned):
      * largest divisor of `batch` whose block M = BT*seq stays under `row_cap`
        (~2048 rows amortizes the ~0.35us/step pipeline overhead),
      * among those prefer lane-dense blocks (M a multiple of 128),
      * only keep >=2 grid blocks (v7x dual TensorCore) when each block still has
        >= `split_min_rows` rows; single-TC chips get one fat block."""
    divisors = [d for d in range(1, batch + 1) if batch % d == 0]
    fits = [d for d in divisors if d * seq <= row_cap] or [1]
    dense = [d for d in fits if (d * seq) % 128 == 0]
    pool = dense if dense else fits
    bt = max(pool)
    if batch // bt == 1:
        split = [d for d in pool if batch // d >= 2 and d * seq >= split_min_rows]
        if split:
            bt = max(split)
    return bt


def transformer_forward(x, params):
    B, S, _ = x.shape
    BT = _pick_bt(B, S)
    G = B // BT
    M = BT * S

    weights = (
        params["emb_w_t"], params["emb_b"],
        params["wqkv_t"], params["bqkv"], params["wo_t"], params["bo"],
        params["w1_t"], params["b1"], params["w2_t"], params["b2"],
        params["ln1w"], params["ln1b"], params["ln2w"], params["ln2b"],
        params["out_w"], params["out_b"],
    )

    def resident(arr):
        zeros = (0,) * arr.ndim
        return pl.BlockSpec(arr.shape, lambda i, z=zeros: z)

    in_specs = [pl.BlockSpec((BT, S, INPUT_DIM), lambda i: (i, 0, 0))]
    in_specs += [resident(w) for w in weights]

    out = pl.pallas_call(
        _fused_kernel,
        out_shape=jax.ShapeDtypeStruct((G, 1, M), jnp.float32),
        grid=(G,),
        in_specs=in_specs,
        out_specs=pl.BlockSpec((1, 1, M), lambda i: (i, 0, 0)),
        scratch_shapes=[pltpu.VMEM((BT, S, 3 * HIDDEN), jnp.float32),
                        pltpu.VMEM((BT, S, HIDDEN), jnp.float32)],
        compiler_params=pltpu.CompilerParams(
            dimension_semantics=("parallel",),
            vmem_limit_bytes=32 * 1024 * 1024),
    )(x, *weights)
    return out.reshape(B, S, OUTPUT_DIM)


# --------------------------------------------------------------------------------------
# parameter init: PyTorch Linear-style uniform(-1/sqrt(fan_in), ...), then packed once
# (transposed + stacked per layer, attention scale folded into Q) so the forward does
# zero host-side reshapes.
# --------------------------------------------------------------------------------------
def init_params(key):
    keys = iter(jax.random.split(key, 4 + 8 * NUM_LAYERS))

    def lin(out_f, in_f):
        lim = 1.0 / math.sqrt(in_f)
        w = jax.random.uniform(next(keys), (out_f, in_f), jnp.float32, -lim, lim)
        b = jax.random.uniform(next(keys), (out_f,), jnp.float32, -lim, lim)
        return w, b

    emb_w, emb_b = lin(HIDDEN, INPUT_DIM)
    layers = []
    for _ in range(NUM_LAYERS):
        wqkv, bqkv = lin(3 * HIDDEN, HIDDEN)
        wo, bo = lin(HIDDEN, HIDDEN)
        w1, b1 = lin(FFN, HIDDEN)
        w2, b2 = lin(HIDDEN, FFN)
        layers.append((wqkv, bqkv, wo, bo, w1, b1, w2, b2))
    out_w, out_b = lin(OUTPUT_DIM, HIDDEN)

    def stack_t(i):
        return jnp.stack([layer[i].T for layer in layers])

    def stack_row(i):
        return jnp.stack([layer[i].reshape(1, -1) for layer in layers])

    # fold 1/sqrt(head_dim) into the Q third of the packed QKV projection
    scale = 1.0 / math.sqrt(HEAD_DIM)
    q_scale = jnp.concatenate(
        [jnp.full((HIDDEN,), scale, jnp.float32),
         jnp.ones((2 * HIDDEN,), jnp.float32)])

    wqkv_t = stack_t(0) * q_scale          # (L, H, 3H)
    bqkv = stack_row(1) * q_scale          # (L, 1, 3H)

    ones = jnp.ones((NUM_LAYERS, 1, HIDDEN), jnp.float32)
    zeros = jnp.zeros((NUM_LAYERS, 1, HIDDEN), jnp.float32)

    return dict(
        emb_w_t=emb_w.T,                       # (1, H)
        emb_b=emb_b.reshape(1, HIDDEN),        # (1, H)
        wqkv_t=wqkv_t, bqkv=bqkv,              # (L, H, 3H), (L, 1, 3H)
        wo_t=stack_t(2), bo=stack_row(3),      # (L, H, H),  (L, 1, H)
        w1_t=stack_t(4), b1=stack_row(5),      # (L, H, FFN),(L, 1, FFN)
        w2_t=stack_t(6), b2=stack_row(7),      # (L, FFN, H),(L, 1, H)
        ln1w=ones, ln1b=zeros, ln2w=ones, ln2b=zeros,
        out_w=out_w.reshape(1, HIDDEN),        # (1, H)
        out_b=out_b.reshape(1, 1),             # (1, 1)
    )


if __name__ == "__main__":
    key = jax.random.PRNGKey(0)
    k_x, k_p = jax.random.split(key)
    batch, seq = 2, 8
    x = jax.random.normal(k_x, (batch, seq, INPUT_DIM), jnp.float32)
    params = init_params(k_p)

    fwd = jax.jit(transformer_forward)
    out = jax.block_until_ready(fwd(x, params))
    assert out.shape == (batch, seq, OUTPUT_DIM)
    assert bool(jnp.all(jnp.isfinite(out)))
    print("KERNEL_OK")
</pallas_src>

<mosaic_0001>
module attributes {stable_mosaic.version = 11 : i64} {
  func.func @_fused_kernel(%arg0: i32, %arg1: memref<2x8x1xf32, #tpu.memory_space<vmem>>, %arg2: memref<1x64xf32, #tpu.memory_space<vmem>>, %arg3: memref<1x64xf32, #tpu.memory_space<vmem>>, %arg4: memref<4x64x192xf32, #tpu.memory_space<vmem>>, %arg5: memref<4x1x192xf32, #tpu.memory_space<vmem>>, %arg6: memref<4x64x64xf32, #tpu.memory_space<vmem>>, %arg7: memref<4x1x64xf32, #tpu.memory_space<vmem>>, %arg8: memref<4x64x256xf32, #tpu.memory_space<vmem>>, %arg9: memref<4x1x256xf32, #tpu.memory_space<vmem>>, %arg10: memref<4x256x64xf32, #tpu.memory_space<vmem>>, %arg11: memref<4x1x64xf32, #tpu.memory_space<vmem>>, %arg12: memref<4x1x64xf32, #tpu.memory_space<vmem>>, %arg13: memref<4x1x64xf32, #tpu.memory_space<vmem>>, %arg14: memref<4x1x64xf32, #tpu.memory_space<vmem>>, %arg15: memref<4x1x64xf32, #tpu.memory_space<vmem>>, %arg16: memref<1x64xf32, #tpu.memory_space<vmem>>, %arg17: memref<1x1xf32, #tpu.memory_space<vmem>>, %arg18: memref<1x1x16xf32, #tpu.memory_space<vmem>>, %arg19: memref<2x8x192xf32, #tpu.memory_space<vmem>>, %arg20: memref<2x8x64xf32, #tpu.memory_space<vmem>>) attributes {dimension_semantics = [#tpu.dimension_semantics<parallel>], iteration_bounds = array<i64: 1>, scalar_prefetch = 0 : i64, scratch_operands = 2 : i64, tpu.core_type = #tpu.core_type<tc>, window_params = [{transform_indices = @transform_0, window_bounds = array<i64: 2, 8, 1>}, {pipeline_mode = #tpu.pipeline_mode<synchronous>, transform_indices = @transform_1, window_bounds = array<i64: 1, 64>}, {pipeline_mode = #tpu.pipeline_mode<synchronous>, transform_indices = @transform_2, window_bounds = array<i64: 1, 64>}, {pipeline_mode = #tpu.pipeline_mode<synchronous>, transform_indices = @transform_3, window_bounds = array<i64: 4, 64, 192>}, {pipeline_mode = #tpu.pipeline_mode<synchronous>, transform_indices = @transform_4, window_bounds = array<i64: 4, 1, 192>}, {pipeline_mode = #tpu.pipeline_mode<synchronous>, transform_indices = @transform_5, window_bounds = array<i64: 4, 64, 64>}, {pipeline_mode = #tpu.pipeline_mode<synchronous>, transform_indices = @transform_6, window_bounds = array<i64: 4, 1, 64>}, {pipeline_mode = #tpu.pipeline_mode<synchronous>, transform_indices = @transform_7, window_bounds = array<i64: 4, 64, 256>}, {pipeline_mode = #tpu.pipeline_mode<synchronous>, transform_indices = @transform_8, window_bounds = array<i64: 4, 1, 256>}, {pipeline_mode = #tpu.pipeline_mode<synchronous>, transform_indices = @transform_9, window_bounds = array<i64: 4, 256, 64>}, {pipeline_mode = #tpu.pipeline_mode<synchronous>, transform_indices = @transform_10, window_bounds = array<i64: 4, 1, 64>}, {pipeline_mode = #tpu.pipeline_mode<synchronous>, transform_indices = @transform_11, window_bounds = array<i64: 4, 1, 64>}, {pipeline_mode = #tpu.pipeline_mode<synchronous>, transform_indices = @transform_12, window_bounds = array<i64: 4, 1, 64>}, {pipeline_mode = #tpu.pipeline_mode<synchronous>, transform_indices = @transform_13, window_bounds = array<i64: 4, 1, 64>}, {pipeline_mode = #tpu.pipeline_mode<synchronous>, transform_indices = @transform_14, window_bounds = array<i64: 4, 1, 64>}, {pipeline_mode = #tpu.pipeline_mode<synchronous>, transform_indices = @transform_15, window_bounds = array<i64: 1, 64>}, {pipeline_mode = #tpu.pipeline_mode<synchronous>, transform_indices = @transform_16, window_bounds = array<i64: 1, 1>}, {transform_indices = @transform_17, window_bounds = array<i64: 1, 1, 16>}]} {
    %c0 = arith.constant 0 : index
    %c0_0 = arith.constant 0 : index
    %c0_1 = arith.constant 0 : index
    %0 = vector.load %arg1[%c0, %c0_0, %c0_1] : memref<2x8x1xf32, #tpu.memory_space<vmem>>, vector<2x8x1xf32>
    %1 = vector.shape_cast %0 : vector<2x8x1xf32> to vector<16x1xf32>
    %c0_2 = arith.constant 0 : index
    %c0_3 = arith.constant 0 : index
    %2 = vector.load %arg2[%c0_2, %c0_3] : memref<1x64xf32, #tpu.memory_space<vmem>>, vector<1x64xf32>
    %3 = vector.broadcast %1 : vector<16x1xf32> to vector<16x64xf32>
    %4 = vector.broadcast %2 : vector<1x64xf32> to vector<16x64xf32>
    %5 = arith.mulf %3, %4 : vector<16x64xf32>
    %c0_4 = arith.constant 0 : index
    %c0_5 = arith.constant 0 : index
    %6 = vector.load %arg3[%c0_4, %c0_5] : memref<1x64xf32, #tpu.memory_space<vmem>>, vector<1x64xf32>
    %7 = vector.broadcast %6 : vector<1x64xf32> to vector<16x64xf32>
    %8 = arith.addf %5, %7 : vector<16x64xf32>
    %c0_6 = arith.constant 0 : index
    %c0_7 = arith.constant 0 : index
    %c0_8 = arith.constant 0 : index
    %9 = vector.load %arg4[%c0_6, %c0_7, %c0_8] : memref<4x64x192xf32, #tpu.memory_space<vmem>>, vector<1x64x192xf32>
    %10 = vector.shape_cast %9 : vector<1x64x192xf32> to vector<64x192xf32>
    %cst = arith.constant dense<0.000000e+00> : vector<16x192xf32>
    %11 = tpu.matmul %8, %10, %cst {dimension_numbers = #tpu.dot_dimension_numbers<[1], [0], [0], [1], [0, 0, 1, 1], [], []>} : vector<16x64xf32>, vector<64x192xf32>, vector<16x192xf32> -> vector<16x192xf32>
    %c0_9 = arith.constant 0 : index
    %c0_10 = arith.constant 0 : index
    %c0_11 = arith.constant 0 : index
    %12 = vector.load %arg5[%c0_9, %c0_10, %c0_11] : memref<4x1x192xf32, #tpu.memory_space<vmem>>, vector<1x1x192xf32>
    %13 = vector.shape_cast %12 : vector<1x1x192xf32> to vector<1x192xf32>
    %14 = vector.broadcast %13 : vector<1x192xf32> to vector<16x192xf32>
    %15 = arith.addf %11, %14 : vector<16x192xf32>
    %16 = vector.shape_cast %15 : vector<16x192xf32> to vector<2x8x192xf32>
    %c0_12 = arith.constant 0 : index
    %c0_13 = arith.constant 0 : index
    %c0_14 = arith.constant 0 : index
    %17 = vector.load %arg19[%c0_12, %c0_13, %c0_14] : memref<2x8x192xf32, #tpu.memory_space<vmem>>, vector<2x8x192xf32>
    tpu.vector_store %arg19[%c0_12, %c0_13, %c0_14], %16 {strides = array<i32>} : memref<2x8x192xf32, #tpu.memory_space<vmem>>, vector<2x8x192xf32>,
    %c0_15 = arith.constant 0 : index
    %c0_16 = arith.constant 0 : index
    %c0_17 = arith.constant 0 : index
    %18 = vector.load %arg19[%c0_15, %c0_16, %c0_17] : memref<2x8x192xf32, #tpu.memory_space<vmem>>, vector<2x8x16xf32>
    %c0_18 = arith.constant 0 : index
    %c0_19 = arith.constant 0 : index
    %c64 = arith.constant 64 : index
    %19 = vector.load %arg19[%c0_18, %c0_19, %c64] : memref<2x8x192xf32, #tpu.memory_space<vmem>>, vector<2x8x16xf32>
    %c0_20 = arith.constant 0 : index
    %c0_21 = arith.constant 0 : index
    %c128 = arith.constant 128 : index
    %20 = vector.load %arg19[%c0_20, %c0_21, %c128] : memref<2x8x192xf32, #tpu.memory_space<vmem>>, vector<2x8x16xf32>
    "tpu.trace_start"() <{level = 10 : i32, message = "bqd,bkd->bqk"}> : () -> ()
    %cst_22 = arith.constant dense<0.000000e+00> : vector<2x8x8xf32>
    %21 = tpu.matmul %18, %19, %cst_22 {dimension_numbers = #tpu.dot_dimension_numbers<[2], [2], [1], [1], [0, 0, 0, 1, 1, 1], [0], [0]>} : vector<2x8x16xf32>, vector<2x8x16xf32>, vector<2x8x8xf32> -> vector<2x8x8xf32>
    "tpu.trace_stop"() : () -> ()
    %cst_23 = arith.constant dense<0xFF800000> : vector<2x8xf32>
    %22 = vector.multi_reduction <maximumf>, %21, %cst_23 [2] : vector<2x8x8xf32> to vector<2x8xf32>
    %23 = vector.shape_cast %22 : vector<2x8xf32> to vector<2x8x1xf32>
    %24 = vector.broadcast %23 : vector<2x8x1xf32> to vector<2x8x8xf32>
    %25 = arith.subf %21, %24 : vector<2x8x8xf32>
    %26 = math.exp %25 : vector<2x8x8xf32>
    %cst_24 = arith.constant dense<0.000000e+00> : vector<2x8xf32>
    %27 = vector.multi_reduction <add>, %26, %cst_24 [2] : vector<2x8x8xf32> to vector<2x8xf32>
    %28 = vector.shape_cast %27 : vector<2x8xf32> to vector<2x8x1xf32>
    %29 = tpu.reciprocal %28 {approx = true} : vector<2x8x1xf32> -> vector<2x8x1xf32>
    %30 = vector.broadcast %29 : vector<2x8x1xf32> to vector<2x8x8xf32>
    %31 = arith.mulf %26, %30 : vector<2x8x8xf32>
    "tpu.trace_start"() <{level = 10 : i32, message = "bqk,bkd->bqd"}> : () -> ()
    %cst_25 = arith.constant dense<0.000000e+00> : vector<2x8x16xf32>
    %32 = tpu.matmul %31, %20, %cst_25 {dimension_numbers = #tpu.dot_dimension_numbers<[2], [1], [1], [2], [0, 0, 0, 1, 1, 2], [0], [0]>} : vector<2x8x8xf32>, vector<2x8x16xf32>, vector<2x8x16xf32> -> vector<2x8x16xf32>
    "tpu.trace_stop"() : () -> ()
    %c0_26 = arith.constant 0 : index
    %c0_27 = arith.constant 0 : index
    %c0_28 = arith.constant 0 : index
    %33 = vector.load %arg20[%c0_26, %c0_27, %c0_28] : memref<2x8x64xf32, #tpu.memory_space<vmem>>, vector<2x8x16xf32>
    tpu.vector_store %arg20[%c0_26, %c0_27, %c0_28], %32 {strides = array<i32>} : memref<2x8x64xf32, #tpu.memory_space<vmem>>, vector<2x8x16xf32>,
    %c0_29 = arith.constant 0 : index
    %c0_30 = arith.constant 0 : index
    %c16 = arith.constant 16 : index
    %34 = vector.load %arg19[%c0_29, %c0_30, %c16] : memref<2x8x192xf32, #tpu.memory_space<vmem>>, vector<2x8x16xf32>
    %c0_31 = arith.constant 0 : index
    %c0_32 = arith.constant 0 : index
    %c80 = arith.constant 80 : index
    %35 = vector.load %arg19[%c0_31, %c0_32, %c80] : memref<2x8x192xf32, #tpu.memory_space<vmem>>, vector<2x8x16xf32>
    %c0_33 = arith.constant 0 : index
    %c0_34 = arith.constant 0 : index
    %c144 = arith.constant 144 : index
    %36 = vector.load %arg19[%c0_33, %c0_34, %c144] : memref<2x8x192xf32, #tpu.memory_space<vmem>>, vector<2x8x16xf32>
    "tpu.trace_start"() <{level = 10 : i32, message = "bqd,bkd->bqk"}> : () -> ()
    %cst_35 = arith.constant dense<0.000000e+00> : vector<2x8x8xf32>
    %37 = tpu.matmul %34, %35, %cst_35 {dimension_numbers = #tpu.dot_dimension_numbers<[2], [2], [1], [1], [0, 0, 0, 1, 1, 1], [0], [0]>} : vector<2x8x16xf32>, vector<2x8x16xf32>, vector<2x8x8xf32> -> vector<2x8x8xf32>
    "tpu.trace_stop"() : () -> ()
    %cst_36 = arith.constant dense<0xFF800000> : vector<2x8xf32>
    %38 = vector.multi_reduction <maximumf>, %37, %cst_36 [2] : vector<2x8x8xf32> to vector<2x8xf32>
    %39 = vector.shape_cast %38 : vector<2x8xf32> to vector<2x8x1xf32>
    %40 = vector.broadcast %39 : vector<2x8x1xf32> to vector<2x8x8xf32>
    %41 = arith.subf %37, %40 : vector<2x8x8xf32>
    %42 = math.exp %41 : vector<2x8x8xf32>
    %cst_37 = arith.constant dense<0.000000e+00> : vector<2x8xf32>
    %43 = vector.multi_reduction <add>, %42, %cst_37 [2] : vector<2x8x8xf32> to vector<2x8xf32>
    %44 = vector.shape_cast %43 : vector<2x8xf32> to vector<2x8x1xf32>
    %45 = tpu.reciprocal %44 {approx = true} : vector<2x8x1xf32> -> vector<2x8x1xf32>
    %46 = vector.broadcast %45 : vector<2x8x1xf32> to vector<2x8x8xf32>
    %47 = arith.mulf %42, %46 : vector<2x8x8xf32>
    "tpu.trace_start"() <{level = 10 : i32, message = "bqk,bkd->bqd"}> : () -> ()
    %cst_38 = arith.constant dense<0.000000e+00> : vector<2x8x16xf32>
    %48 = tpu.matmul %47, %36, %cst_38 {dimension_numbers = #tpu.dot_dimension_numbers<[2], [1], [1], [2], [0, 0, 0, 1, 1, 2], [0], [0]>} : vector<2x8x8xf32>, vector<2x8x16xf32>, vector<2x8x16xf32> -> vector<2x8x16xf32>
    "tpu.trace_stop"() : () -> ()
    %c0_39 = arith.constant 0 : index
    %c0_40 = arith.constant 0 : index
    %c16_41 = arith.constant 16 : index
    %49 = vector.load %arg20[%c0_39, %c0_40, %c16_41] : memref<2x8x64xf32, #tpu.memory_space<vmem>>, vector<2x8x16xf32>
    tpu.vector_store %arg20[%c0_39, %c0_40, %c16_41], %48 {strides = array<i32>} : memref<2x8x64xf32, #tpu.memory_space<vmem>>, vector<2x8x16xf32>,
    %c0_42 = arith.constant 0 : index
    %c0_43 = arith.constant 0 : index
    %c32 = arith.constant 32 : index
    %50 = vector.load %arg19[%c0_42, %c0_43, %c32] : memref<2x8x192xf32, #tpu.memory_space<vmem>>, vector<2x8x16xf32>
    %c0_44 = arith.constant 0 : index
    %c0_45 = arith.constant 0 : index
    %c96 = arith.constant 96 : index
    %51 = vector.load %arg19[%c0_44, %c0_45, %c96] : memref<2x8x192xf32, #tpu.memory_space<vmem>>, vector<2x8x16xf32>
    %c0_46 = arith.constant 0 : index
    %c0_47 = arith.constant 0 : index
    %c160 = arith.constant 160 : index
    %52 = vector.load %arg19[%c0_46, %c0_47, %c160] : memref<2x8x192xf32, #tpu.memory_space<vmem>>, vector<2x8x16xf32>
    "tpu.trace_start"() <{level = 10 : i32, message = "bqd,bkd->bqk"}> : () -> ()
    %cst_48 = arith.constant dense<0.000000e+00> : vector<2x8x8xf32>
    %53 = tpu.matmul %50, %51, %cst_48 {dimension_numbers = #tpu.dot_dimension_numbers<[2], [2], [1], [1], [0, 0, 0, 1, 1, 1], [0], [0]>} : vector<2x8x16xf32>, vector<2x8x16xf32>, vector<2x8x8xf32> -> vector<2x8x8xf32>
    "tpu.trace_stop"() : () -> ()
    %cst_49 = arith.constant dense<0xFF800000> : vector<2x8xf32>
    %54 = vector.multi_reduction <maximumf>, %53, %cst_49 [2] : vector<2x8x8xf32> to vector<2x8xf32>
    %55 = vector.shape_cast %54 : vector<2x8xf32> to vector<2x8x1xf32>
    %56 = vector.broadcast %55 : vector<2x8x1xf32> to vector<2x8x8xf32>
    %57 = arith.subf %53, %56 : vector<2x8x8xf32>
    %58 = math.exp %57 : vector<2x8x8xf32>
    %cst_50 = arith.constant dense<0.000000e+00> : vector<2x8xf32>
    %59 = vector.multi_reduction <add>, %58, %cst_50 [2] : vector<2x8x8xf32> to vector<2x8xf32>
    %60 = vector.shape_cast %59 : vector<2x8xf32> to vector<2x8x1xf32>
    %61 = tpu.reciprocal %60 {approx = true} : vector<2x8x1xf32> -> vector<2x8x1xf32>
    %62 = vector.broadcast %61 : vector<2x8x1xf32> to vector<2x8x8xf32>
    %63 = arith.mulf %58, %62 : vector<2x8x8xf32>
    "tpu.trace_start"() <{level = 10 : i32, message = "bqk,bkd->bqd"}> : () -> ()
    %cst_51 = arith.constant dense<0.000000e+00> : vector<2x8x16xf32>
    %64 = tpu.matmul %63, %52, %cst_51 {dimension_numbers = #tpu.dot_dimension_numbers<[2], [1], [1], [2], [0, 0, 0, 1, 1, 2], [0], [0]>} : vector<2x8x8xf32>, vector<2x8x16xf32>, vector<2x8x16xf32> -> vector<2x8x16xf32>
    "tpu.trace_stop"() : () -> ()
    %c0_52 = arith.constant 0 : index
    %c0_53 = arith.constant 0 : index
    %c32_54 = arith.constant 32 : index
    %65 = vector.load %arg20[%c0_52, %c0_53, %c32_54] : memref<2x8x64xf32, #tpu.memory_space<vmem>>, vector<2x8x16xf32>
    tpu.vector_store %arg20[%c0_52, %c0_53, %c32_54], %64 {strides = array<i32>} : memref<2x8x64xf32, #tpu.memory_space<vmem>>, vector<2x8x16xf32>,
    %c0_55 = arith.constant 0 : index
    %c0_56 = arith.constant 0 : index
    %c48 = arith.constant 48 : index
    %66 = vector.load %arg19[%c0_55, %c0_56, %c48] : memref<2x8x192xf32, #tpu.memory_space<vmem>>, vector<2x8x16xf32>
    %c0_57 = arith.constant 0 : index
    %c0_58 = arith.constant 0 : index
    %c112 = arith.constant 112 : index
    %67 = vector.load %arg19[%c0_57, %c0_58, %c112] : memref<2x8x192xf32, #tpu.memory_space<vmem>>, vector<2x8x16xf32>
    %c0_59 = arith.constant 0 : index
    %c0_60 = arith.constant 0 : index
    %c176 = arith.constant 176 : index
    %68 = vector.load %arg19[%c0_59, %c0_60, %c176] : memref<2x8x192xf32, #tpu.memory_space<vmem>>, vector<2x8x16xf32>
    "tpu.trace_start"() <{level = 10 : i32, message = "bqd,bkd->bqk"}> : () -> ()
    %cst_61 = arith.constant dense<0.000000e+00> : vector<2x8x8xf32>
    %69 = tpu.matmul %66, %67, %cst_61 {dimension_numbers = #tpu.dot_dimension_numbers<[2], [2], [1], [1], [0, 0, 0, 1, 1, 1], [0], [0]>} : vector<2x8x16xf32>, vector<2x8x16xf32>, vector<2x8x8xf32> -> vector<2x8x8xf32>
    "tpu.trace_stop"() : () -> ()
    %cst_62 = arith.constant dense<0xFF800000> : vector<2x8xf32>
    %70 = vector.multi_reduction <maximumf>, %69, %cst_62 [2] : vector<2x8x8xf32> to vector<2x8xf32>
    %71 = vector.shape_cast %70 : vector<2x8xf32> to vector<2x8x1xf32>
    %72 = vector.broadcast %71 : vector<2x8x1xf32> to vector<2x8x8xf32>
    %73 = arith.subf %69, %72 : vector<2x8x8xf32>
    %74 = math.exp %73 : vector<2x8x8xf32>
    %cst_63 = arith.constant dense<0.000000e+00> : vector<2x8xf32>
    %75 = vector.multi_reduction <add>, %74, %cst_63 [2] : vector<2x8x8xf32> to vector<2x8xf32>
    %76 = vector.shape_cast %75 : vector<2x8xf32> to vector<2x8x1xf32>
    %77 = tpu.reciprocal %76 {approx = true} : vector<2x8x1xf32> -> vector<2x8x1xf32>
    %78 = vector.broadcast %77 : vector<2x8x1xf32> to vector<2x8x8xf32>
    %79 = arith.mulf %74, %78 : vector<2x8x8xf32>
    "tpu.trace_start"() <{level = 10 : i32, message = "bqk,bkd->bqd"}> : () -> ()
    %cst_64 = arith.constant dense<0.000000e+00> : vector<2x8x16xf32>
    %80 = tpu.matmul %79, %68, %cst_64 {dimension_numbers = #tpu.dot_dimension_numbers<[2], [1], [1], [2], [0, 0, 0, 1, 1, 2], [0], [0]>} : vector<2x8x8xf32>, vector<2x8x16xf32>, vector<2x8x16xf32> -> vector<2x8x16xf32>
    "tpu.trace_stop"() : () -> ()
    %c0_65 = arith.constant 0 : index
    %c0_66 = arith.constant 0 : index
    %c48_67 = arith.constant 48 : index
    %81 = vector.load %arg20[%c0_65, %c0_66, %c48_67] : memref<2x8x64xf32, #tpu.memory_space<vmem>>, vector<2x8x16xf32>
    tpu.vector_store %arg20[%c0_65, %c0_66, %c48_67], %80 {strides = array<i32>} : memref<2x8x64xf32, #tpu.memory_space<vmem>>, vector<2x8x16xf32>,
    %c0_68 = arith.constant 0 : index
    %c0_69 = arith.constant 0 : index
    %c0_70 = arith.constant 0 : index
    %82 = vector.load %arg20[%c0_68, %c0_69, %c0_70] : memref<2x8x64xf32, #tpu.memory_space<vmem>>, vector<2x8x64xf32>
    %83 = vector.shape_cast %82 : vector<2x8x64xf32> to vector<16x64xf32>
    %c0_71 = arith.constant 0 : index
    %c0_72 = arith.constant 0 : index
    %c0_73 = arith.constant 0 : index
    %84 = vector.load %arg6[%c0_71, %c0_72, %c0_73] : memref<4x64x64xf32, #tpu.memory_space<vmem>>, vector<1x64x64xf32>
    %85 = vector.shape_cast %84 : vector<1x64x64xf32> to vector<64x64xf32>
    %cst_74 = arith.constant dense<0.000000e+00> : vector<16x64xf32>
    %86 = tpu.matmul %83, %85, %cst_74 {dimension_numbers = #tpu.dot_dimension_numbers<[1], [0], [0], [1], [0, 0, 1, 1], [], []>} : vector<16x64xf32>, vector<64x64xf32>, vector<16x64xf32> -> vector<16x64xf32>
    %c0_75 = arith.constant 0 : index
    %c0_76 = arith.constant 0 : index
    %c0_77 = arith.constant 0 : index
    %87 = vector.load %arg7[%c0_75, %c0_76, %c0_77] : memref<4x1x64xf32, #tpu.memory_space<vmem>>, vector<1x1x64xf32>
    %88 = vector.shape_cast %87 : vector<1x1x64xf32> to vector<1x64xf32>
    %89 = vector.broadcast %88 : vector<1x64xf32> to vector<16x64xf32>
    %90 = arith.addf %86, %89 : vector<16x64xf32>
    %91 = arith.addf %8, %90 : vector<16x64xf32>
    %c0_78 = arith.constant 0 : index
    %c0_79 = arith.constant 0 : index
    %c0_80 = arith.constant 0 : index
    %92 = vector.load %arg12[%c0_78, %c0_79, %c0_80] : memref<4x1x64xf32, #tpu.memory_space<vmem>>, vector<1x1x64xf32>
    %93 = vector.shape_cast %92 : vector<1x1x64xf32> to vector<1x64xf32>
    %c0_81 = arith.constant 0 : index
    %c0_82 = arith.constant 0 : index
    %c0_83 = arith.constant 0 : index
    %94 = vector.load %arg13[%c0_81, %c0_82, %c0_83] : memref<4x1x64xf32, #tpu.memory_space<vmem>>, vector<1x1x64xf32>
    %95 = vector.shape_cast %94 : vector<1x1x64xf32> to vector<1x64xf32>
    %cst_84 = arith.constant dense<0.000000e+00> : vector<16xf32>
    %96 = vector.multi_reduction <add>, %91, %cst_84 [1] : vector<16x64xf32> to vector<16xf32>
    %97 = vector.shape_cast %96 : vector<16xf32> to vector<16x1xf32>
    %cst_85 = arith.constant 1.562500e-02 : f32
    %98 = vector.broadcast %cst_85 : f32 to vector<16x1xf32>
    %99 = arith.mulf %97, %98 : vector<16x1xf32>
    %100 = arith.mulf %91, %91 : vector<16x64xf32>
    %cst_86 = arith.constant dense<0.000000e+00> : vector<16xf32>
    %101 = vector.multi_reduction <add>, %100, %cst_86 [1] : vector<16x64xf32> to vector<16xf32>
    %102 = vector.shape_cast %101 : vector<16xf32> to vector<16x1xf32>
    %cst_87 = arith.constant 1.562500e-02 : f32
    %103 = vector.broadcast %cst_87 : f32 to vector<16x1xf32>
    %104 = arith.mulf %102, %103 : vector<16x1xf32>
    %105 = arith.mulf %99, %99 : vector<16x1xf32>
    %106 = arith.subf %104, %105 : vector<16x1xf32>
    %107 = vector.broadcast %99 : vector<16x1xf32> to vector<16x64xf32>
    %108 = arith.subf %91, %107 : vector<16x64xf32>
    %cst_88 = arith.constant 9.99999974E-6 : f32
    %109 = vector.broadcast %cst_88 : f32 to vector<16x1xf32>
    %110 = arith.addf %106, %109 : vector<16x1xf32>
    %111 = math.rsqrt %110 : vector<16x1xf32>
    %112 = vector.broadcast %111 : vector<16x1xf32> to vector<16x64xf32>
    %113 = arith.mulf %108, %112 : vector<16x64xf32>
    %114 = vector.broadcast %93 : vector<1x64xf32> to vector<16x64xf32>
    %115 = arith.mulf %113, %114 : vector<16x64xf32>
    %116 = vector.broadcast %95 : vector<1x64xf32> to vector<16x64xf32>
    %117 = arith.addf %115, %116 : vector<16x64xf32>
    %c0_89 = arith.constant 0 : index
    %c0_90 = arith.constant 0 : index
    %c0_91 = arith.constant 0 : index
    %118 = vector.load %arg8[%c0_89, %c0_90, %c0_91] : memref<4x64x256xf32, #tpu.memory_space<vmem>>, vector<1x64x256xf32>
    %119 = vector.shape_cast %118 : vector<1x64x256xf32> to vector<64x256xf32>
    %cst_92 = arith.constant dense<0.000000e+00> : vector<16x256xf32>
    %120 = tpu.matmul %117, %119, %cst_92 {dimension_numbers = #tpu.dot_dimension_numbers<[1], [0], [0], [1], [0, 0, 1, 1], [], []>} : vector<16x64xf32>, vector<64x256xf32>, vector<16x256xf32> -> vector<16x256xf32>
    %c0_93 = arith.constant 0 : index
    %c0_94 = arith.constant 0 : index
    %c0_95 = arith.constant 0 : index
    %121 = vector.load %arg9[%c0_93, %c0_94, %c0_95] : memref<4x1x256xf32, #tpu.memory_space<vmem>>, vector<1x1x256xf32>
    %122 = vector.shape_cast %121 : vector<1x1x256xf32> to vector<1x256xf32>
    %123 = vector.broadcast %122 : vector<1x256xf32> to vector<16x256xf32>
    %124 = arith.addf %120, %123 : vector<16x256xf32>
    %cst_96 = arith.constant 0.000000e+00 : f32
    %125 = vector.broadcast %cst_96 : f32 to vector<16x256xf32>
    %126 = arith.maximumf %124, %125 : vector<16x256xf32>
    %c0_97 = arith.constant 0 : index
    %c0_98 = arith.constant 0 : index
    %c0_99 = arith.constant 0 : index
    %127 = vector.load %arg10[%c0_97, %c0_98, %c0_99] : memref<4x256x64xf32, #tpu.memory_space<vmem>>, vector<1x256x64xf32>
    %128 = vector.shape_cast %127 : vector<1x256x64xf32> to vector<256x64xf32>
    %cst_100 = arith.constant dense<0.000000e+00> : vector<16x64xf32>
    %129 = tpu.matmul %126, %128, %cst_100 {dimension_numbers = #tpu.dot_dimension_numbers<[1], [0], [0], [1], [0, 0, 1, 1], [], []>} : vector<16x256xf32>, vector<256x64xf32>, vector<16x64xf32> -> vector<16x64xf32>
    %c0_101 = arith.constant 0 : index
    %c0_102 = arith.constant 0 : index
    %c0_103 = arith.constant 0 : index
    %130 = vector.load %arg11[%c0_101, %c0_102, %c0_103] : memref<4x1x64xf32, #tpu.memory_space<vmem>>, vector<1x1x64xf32>
    %131 = vector.shape_cast %130 : vector<1x1x64xf32> to vector<1x64xf32>
    %132 = vector.broadcast %131 : vector<1x64xf32> to vector<16x64xf32>
    %133 = arith.addf %129, %132 : vector<16x64xf32>
    %134 = arith.addf %117, %133 : vector<16x64xf32>
    %c0_104 = arith.constant 0 : index
    %c0_105 = arith.constant 0 : index
    %c0_106 = arith.constant 0 : index
    %135 = vector.load %arg14[%c0_104, %c0_105, %c0_106] : memref<4x1x64xf32, #tpu.memory_space<vmem>>, vector<1x1x64xf32>
    %136 = vector.shape_cast %135 : vector<1x1x64xf32> to vector<1x64xf32>
    %c0_107 = arith.constant 0 : index
    %c0_108 = arith.constant 0 : index
    %c0_109 = arith.constant 0 : index
    %137 = vector.load %arg15[%c0_107, %c0_108, %c0_109] : memref<4x1x64xf32, #tpu.memory_space<vmem>>, vector<1x1x64xf32>
    %138 = vector.shape_cast %137 : vector<1x1x64xf32> to vector<1x64xf32>
    %cst_110 = arith.constant dense<0.000000e+00> : vector<16xf32>
    %139 = vector.multi_reduction <add>, %134, %cst_110 [1] : vector<16x64xf32> to vector<16xf32>
    %140 = vector.shape_cast %139 : vector<16xf32> to vector<16x1xf32>
    %cst_111 = arith.constant 1.562500e-02 : f32
    %141 = vector.broadcast %cst_111 : f32 to vector<16x1xf32>
    %142 = arith.mulf %140, %141 : vector<16x1xf32>
    %143 = arith.mulf %134, %134 : vector<16x64xf32>
    %cst_112 = arith.constant dense<0.000000e+00> : vector<16xf32>
    %144 = vector.multi_reduction <add>, %143, %cst_112 [1] : vector<16x64xf32> to vector<16xf32>
    %145 = vector.shape_cast %144 : vector<16xf32> to vector<16x1xf32>
    %cst_113 = arith.constant 1.562500e-02 : f32
    %146 = vector.broadcast %cst_113 : f32 to vector<16x1xf32>
    %147 = arith.mulf %145, %146 : vector<16x1xf32>
    %148 = arith.mulf %142, %142 : vector<16x1xf32>
    %149 = arith.subf %147, %148 : vector<16x1xf32>
    %150 = vector.broadcast %142 : vector<16x1xf32> to vector<16x64xf32>
    %151 = arith.subf %134, %150 : vector<16x64xf32>
    %cst_114 = arith.constant 9.99999974E-6 : f32
    %152 = vector.broadcast %cst_114 : f32 to vector<16x1xf32>
    %153 = arith.addf %149, %152 : vector<16x1xf32>
    %154 = math.rsqrt %153 : vector<16x1xf32>
    %155 = vector.broadcast %154 : vector<16x1xf32> to vector<16x64xf32>
    %156 = arith.mulf %151, %155 : vector<16x64xf32>
    %157 = vector.broadcast %136 : vector<1x64xf32> to vector<16x64xf32>
    %158 = arith.mulf %156, %157 : vector<16x64xf32>
    %159 = vector.broadcast %138 : vector<1x64xf32> to vector<16x64xf32>
    %160 = arith.addf %158, %159 : vector<16x64xf32>
    %c1 = arith.constant 1 : index
    %c0_115 = arith.constant 0 : index
    %c0_116 = arith.constant 0 : index
    %161 = vector.load %arg4[%c1, %c0_115, %c0_116] : memref<4x64x192xf32, #tpu.memory_space<vmem>>, vector<1x64x192xf32>
    %162 = vector.shape_cast %161 : vector<1x64x192xf32> to vector<64x192xf32>
    %cst_117 = arith.constant dense<0.000000e+00> : vector<16x192xf32>
    %163 = tpu.matmul %160, %162, %cst_117 {dimension_numbers = #tpu.dot_dimension_numbers<[1], [0], [0], [1], [0, 0, 1, 1], [], []>} : vector<16x64xf32>, vector<64x192xf32>, vector<16x192xf32> -> vector<16x192xf32>
    %c1_118 = arith.constant 1 : index
    %c0_119 = arith.constant 0 : index
    %c0_120 = arith.constant 0 : index
    %164 = vector.load %arg5[%c1_118, %c0_119, %c0_120] : memref<4x1x192xf32, #tpu.memory_space<vmem>>, vector<1x1x192xf32>
    %165 = vector.shape_cast %164 : vector<1x1x192xf32> to vector<1x192xf32>
    %166 = vector.broadcast %165 : vector<1x192xf32> to vector<16x192xf32>
    %167 = arith.addf %163, %166 : vector<16x192xf32>
    %168 = vector.shape_cast %167 : vector<16x192xf32> to vector<2x8x192xf32>
    %c0_121 = arith.constant 0 : index
    %c0_122 = arith.constant 0 : index
    %c0_123 = arith.constant 0 : index
    %169 = vector.load %arg19[%c0_121, %c0_122, %c0_123] : memref<2x8x192xf32, #tpu.memory_space<vmem>>, vector<2x8x192xf32>
    tpu.vector_store %arg19[%c0_121, %c0_122, %c0_123], %168 {strides = array<i32>} : memref<2x8x192xf32, #tpu.memory_space<vmem>>, vector<2x8x192xf32>,
    %c0_124 = arith.constant 0 : index
    %c0_125 = arith.constant 0 : index
    %c0_126 = arith.constant 0 : index
    %170 = vector.load %arg19[%c0_124, %c0_125, %c0_126] : memref<2x8x192xf32, #tpu.memory_space<vmem>>, vector<2x8x16xf32>
    %c0_127 = arith.constant 0 : index
    %c0_128 = arith.constant 0 : index
    %c64_129 = arith.constant 64 : index
    %171 = vector.load %arg19[%c0_127, %c0_128, %c64_129] : memref<2x8x192xf32, #tpu.memory_space<vmem>>, vector<2x8x16xf32>
    %c0_130 = arith.constant 0 : index
    %c0_131 = arith.constant 0 : index
    %c128_132 = arith.constant 128 : index
    %172 = vector.load %arg19[%c0_130, %c0_131, %c128_132] : memref<2x8x192xf32, #tpu.memory_space<vmem>>, vector<2x8x16xf32>
    "tpu.trace_start"() <{level = 10 : i32, message = "bqd,bkd->bqk"}> : () -> ()
    %cst_133 = arith.constant dense<0.000000e+00> : vector<2x8x8xf32>
    %173 = tpu.matmul %170, %171, %cst_133 {dimension_numbers = #tpu.dot_dimension_numbers<[2], [2], [1], [1], [0, 0, 0, 1, 1, 1], [0], [0]>} : vector<2x8x16xf32>, vector<2x8x16xf32>, vector<2x8x8xf32> -> vector<2x8x8xf32>
    "tpu.trace_stop"() : () -> ()
    %cst_134 = arith.constant dense<0xFF800000> : vector<2x8xf32>
    %174 = vector.multi_reduction <maximumf>, %173, %cst_134 [2] : vector<2x8x8xf32> to vector<2x8xf32>
    %175 = vector.shape_cast %174 : vector<2x8xf32> to vector<2x8x1xf32>
    %176 = vector.broadcast %175 : vector<2x8x1xf32> to vector<2x8x8xf32>
    %177 = arith.subf %173, %176 : vector<2x8x8xf32>
    %178 = math.exp %177 : vector<2x8x8xf32>
    %cst_135 = arith.constant dense<0.000000e+00> : vector<2x8xf32>
    %179 = vector.multi_reduction <add>, %178, %cst_135 [2] : vector<2x8x8xf32> to vector<2x8xf32>
    %180 = vector.shape_cast %179 : vector<2x8xf32> to vector<2x8x1xf32>
    %181 = tpu.reciprocal %180 {approx = true} : vector<2x8x1xf32> -> vector<2x8x1xf32>
    %182 = vector.broadcast %181 : vector<2x8x1xf32> to vector<2x8x8xf32>
    %183 = arith.mulf %178, %182 : vector<2x8x8xf32>
    "tpu.trace_start"() <{level = 10 : i32, message = "bqk,bkd->bqd"}> : () -> ()
    %cst_136 = arith.constant dense<0.000000e+00> : vector<2x8x16xf32>
    %184 = tpu.matmul %183, %172, %cst_136 {dimension_numbers = #tpu.dot_dimension_numbers<[2], [1], [1], [2], [0, 0, 0, 1, 1, 2], [0], [0]>} : vector<2x8x8xf32>, vector<2x8x16xf32>, vector<2x8x16xf32> -> vector<2x8x16xf32>
    "tpu.trace_stop"() : () -> ()
    %c0_137 = arith.constant 0 : index
    %c0_138 = arith.constant 0 : index
    %c0_139 = arith.constant 0 : index
    %185 = vector.load %arg20[%c0_137, %c0_138, %c0_139] : memref<2x8x64xf32, #tpu.memory_space<vmem>>, vector<2x8x16xf32>
    tpu.vector_store %arg20[%c0_137, %c0_138, %c0_139], %184 {strides = array<i32>} : memref<2x8x64xf32, #tpu.memory_space<vmem>>, vector<2x8x16xf32>,
    %c0_140 = arith.constant 0 : index
    %c0_141 = arith.constant 0 : index
    %c16_142 = arith.constant 16 : index
    %186 = vector.load %arg19[%c0_140, %c0_141, %c16_142] : memref<2x8x192xf32, #tpu.memory_space<vmem>>, vector<2x8x16xf32>
    %c0_143 = arith.constant 0 : index
    %c0_144 = arith.constant 0 : index
    %c80_145 = arith.constant 80 : index
    %187 = vector.load %arg19[%c0_143, %c0_144, %c80_145] : memref<2x8x192xf32, #tpu.memory_space<vmem>>, vector<2x8x16xf32>
    %c0_146 = arith.constant 0 : index
    %c0_147 = arith.constant 0 : index
    %c144_148 = arith.constant 144 : index
    %188 = vector.load %arg19[%c0_146, %c0_147, %c144_148] : memref<2x8x192xf32, #tpu.memory_space<vmem>>, vector<2x8x16xf32>
    "tpu.trace_start"() <{level = 10 : i32, message = "bqd,bkd->bqk"}> : () -> ()
    %cst_149 = arith.constant dense<0.000000e+00> : vector<2x8x8xf32>
    %189 = tpu.matmul %186, %187, %cst_149 {dimension_numbers = #tpu.dot_dimension_numbers<[2], [2], [1], [1], [0, 0, 0, 1, 1, 1], [0], [0]>} : vector<2x8x16xf32>, vector<2x8x16xf32>, vector<2x8x8xf32> -> vector<2x8x8xf32>
    "tpu.trace_stop"() : () -> ()
    %cst_150 = arith.constant dense<0xFF800000> : vector<2x8xf32>
    %190 = vector.multi_reduction <maximumf>, %189, %cst_150 [2] : vector<2x8x8xf32> to vector<2x8xf32>
    %191 = vector.shape_cast %190 : vector<2x8xf32> to vector<2x8x1xf32>
    %192 = vector.broadcast %191 : vector<2x8x1xf32> to vector<2x8x8xf32>
    %193 = arith.subf %189, %192 : vector<2x8x8xf32>
    %194 = math.exp %193 : vector<2x8x8xf32>
    %cst_151 = arith.constant dense<0.000000e+00> : vector<2x8xf32>
    %195 = vector.multi_reduction <add>, %194, %cst_151 [2] : vector<2x8x8xf32> to vector<2x8xf32>
    %196 = vector.shape_cast %195 : vector<2x8xf32> to vector<2x8x1xf32>
    %197 = tpu.reciprocal %196 {approx = true} : vector<2x8x1xf32> -> vector<2x8x1xf32>
    %198 = vector.broadcast %197 : vector<2x8x1xf32> to vector<2x8x8xf32>
    %199 = arith.mulf %194, %198 : vector<2x8x8xf32>
    "tpu.trace_start"() <{level = 10 : i32, message = "bqk,bkd->bqd"}> : () -> ()
    %cst_152 = arith.constant dense<0.000000e+00> : vector<2x8x16xf32>
    %200 = tpu.matmul %199, %188, %cst_152 {dimension_numbers = #tpu.dot_dimension_numbers<[2], [1], [1], [2], [0, 0, 0, 1, 1, 2], [0], [0]>} : vector<2x8x8xf32>, vector<2x8x16xf32>, vector<2x8x16xf32> -> vector<2x8x16xf32>
    "tpu.trace_stop"() : () -> ()
    %c0_153 = arith.constant 0 : index
    %c0_154 = arith.constant 0 : index
    %c16_155 = arith.constant 16 : index
    %201 = vector.load %arg20[%c0_153, %c0_154, %c16_155] : memref<2x8x64xf32, #tpu.memory_space<vmem>>, vector<2x8x16xf32>
    tpu.vector_store %arg20[%c0_153, %c0_154, %c16_155], %200 {strides = array<i32>} : memref<2x8x64xf32, #tpu.memory_space<vmem>>, vector<2x8x16xf32>,
    %c0_156 = arith.constant 0 : index
    %c0_157 = arith.constant 0 : index
    %c32_158 = arith.constant 32 : index
    %202 = vector.load %arg19[%c0_156, %c0_157, %c32_158] : memref<2x8x192xf32, #tpu.memory_space<vmem>>, vector<2x8x16xf32>
    %c0_159 = arith.constant 0 : index
    %c0_160 = arith.constant 0 : index
    %c96_161 = arith.constant 96 : index
    %203 = vector.load %arg19[%c0_159, %c0_160, %c96_161] : memref<2x8x192xf32, #tpu.memory_space<vmem>>, vector<2x8x16xf32>
    %c0_162 = arith.constant 0 : index
    %c0_163 = arith.constant 0 : index
    %c160_164 = arith.constant 160 : index
    %204 = vector.load %arg19[%c0_162, %c0_163, %c160_164] : memref<2x8x192xf32, #tpu.memory_space<vmem>>, vector<2x8x16xf32>
    "tpu.trace_start"() <{level = 10 : i32, message = "bqd,bkd->bqk"}> : () -> ()
    %cst_165 = arith.constant dense<0.000000e+00> : vector<2x8x8xf32>
    %205 = tpu.matmul %202, %203, %cst_165 {dimension_numbers = #tpu.dot_dimension_numbers<[2], [2], [1], [1], [0, 0, 0, 1, 1, 1], [0], [0]>} : vector<2x8x16xf32>, vector<2x8x16xf32>, vector<2x8x8xf32> -> vector<2x8x8xf32>
    "tpu.trace_stop"() : () -> ()
    %cst_166 = arith.constant dense<0xFF800000> : vector<2x8xf32>
    %206 = vector.multi_reduction <maximumf>, %205, %cst_166 [2] : vector<2x8x8xf32> to vector<2x8xf32>
    %207 = vector.shape_cast %206 : vector<2x8xf32> to vector<2x8x1xf32>
    %208 = vector.broadcast %207 : vector<2x8x1xf32> to vector<2x8x8xf32>
    %209 = arith.subf %205, %208 : vector<2x8x8xf32>
    %210 = math.exp %209 : vector<2x8x8xf32>
    %cst_167 = arith.constant dense<0.000000e+00> : vector<2x8xf32>
    %211 = vector.multi_reduction <add>, %210, %cst_167 [2] : vector<2x8x8xf32> to vector<2x8xf32>
    %212 = vector.shape_cast %211 : vector<2x8xf32> to vector<2x8x1xf32>
    %213 = tpu.reciprocal %212 {approx = true} : vector<2x8x1xf32> -> vector<2x8x1xf32>
    %214 = vector.broadcast %213 : vector<2x8x1xf32> to vector<2x8x8xf32>
    %215 = arith.mulf %210, %214 : vector<2x8x8xf32>
    "tpu.trace_start"() <{level = 10 : i32, message = "bqk,bkd->bqd"}> : () -> ()
    %cst_168 = arith.constant dense<0.000000e+00> : vector<2x8x16xf32>
    %216 = tpu.matmul %215, %204, %cst_168 {dimension_numbers = #tpu.dot_dimension_numbers<[2], [1], [1], [2], [0, 0, 0, 1, 1, 2], [0], [0]>} : vector<2x8x8xf32>, vector<2x8x16xf32>, vector<2x8x16xf32> -> vector<2x8x16xf32>
    "tpu.trace_stop"() : () -> ()
    %c0_169 = arith.constant 0 : index
    %c0_170 = arith.constant 0 : index
    %c32_171 = arith.constant 32 : index
    %217 = vector.load %arg20[%c0_169, %c0_170, %c32_171] : memref<2x8x64xf32, #tpu.memory_space<vmem>>, vector<2x8x16xf32>
    tpu.vector_store %arg20[%c0_169, %c0_170, %c32_171], %216 {strides = array<i32>} : memref<2x8x64xf32, #tpu.memory_space<vmem>>, vector<2x8x16xf32>,
    %c0_172 = arith.constant 0 : index
    %c0_173 = arith.constant 0 : index
    %c48_174 = arith.constant 48 : index
    %218 = vector.load %arg19[%c0_172, %c0_173, %c48_174] : memref<2x8x192xf32, #tpu.memory_space<vmem>>, vector<2x8x16xf32>
    %c0_175 = arith.constant 0 : index
    %c0_176 = arith.constant 0 : index
    %c112_177 = arith.constant 112 : index
    %219 = vector.load %arg19[%c0_175, %c0_176, %c112_177] : memref<2x8x192xf32, #tpu.memory_space<vmem>>, vector<2x8x16xf32>
    %c0_178 = arith.constant 0 : index
    %c0_179 = arith.constant 0 : index
    %c176_180 = arith.constant 176 : index
    %220 = vector.load %arg19[%c0_178, %c0_179, %c176_180] : memref<2x8x192xf32, #tpu.memory_space<vmem>>, vector<2x8x16xf32>
    "tpu.trace_start"() <{level = 10 : i32, message = "bqd,bkd->bqk"}> : () -> ()
    %cst_181 = arith.constant dense<0.000000e+00> : vector<2x8x8xf32>
    %221 = tpu.matmul %218, %219, %cst_181 {dimension_numbers = #tpu.dot_dimension_numbers<[2], [2], [1], [1], [0, 0, 0, 1, 1, 1], [0], [0]>} : vector<2x8x16xf32>, vector<2x8x16xf32>, vector<2x8x8xf32> -> vector<2x8x8xf32>
    "tpu.trace_stop"() : () -> ()
    %cst_182 = arith.constant dense<0xFF800000> : vector<2x8xf32>
    %222 = vector.multi_reduction <maximumf>, %221, %cst_182 [2] : vector<2x8x8xf32> to vector<2x8xf32>
    %223 = vector.shape_cast %222 : vector<2x8xf32> to vector<2x8x1xf32>
    %224 = vector.broadcast %223 : vector<2x8x1xf32> to vector<2x8x8xf32>
    %225 = arith.subf %221, %224 : vector<2x8x8xf32>
    %226 = math.exp %225 : vector<2x8x8xf32>
    %cst_183 = arith.constant dense<0.000000e+00> : vector<2x8xf32>
    %227 = vector.multi_reduction <add>, %226, %cst_183 [2] : vector<2x8x8xf32> to vector<2x8xf32>
    %228 = vector.shape_cast %227 : vector<2x8xf32> to vector<2x8x1xf32>
    %229 = tpu.reciprocal %228 {approx = true} : vector<2x8x1xf32> -> vector<2x8x1xf32>
    %230 = vector.broadcast %229 : vector<2x8x1xf32> to vector<2x8x8xf32>
    %231 = arith.mulf %226, %230 : vector<2x8x8xf32>
    "tpu.trace_start"() <{level = 10 : i32, message = "bqk,bkd->bqd"}> : () -> ()
    %cst_184 = arith.constant dense<0.000000e+00> : vector<2x8x16xf32>
    %232 = tpu.matmul %231, %220, %cst_184 {dimension_numbers = #tpu.dot_dimension_numbers<[2], [1], [1], [2], [0, 0, 0, 1, 1, 2], [0], [0]>} : vector<2x8x8xf32>, vector<2x8x16xf32>, vector<2x8x16xf32> -> vector<2x8x16xf32>
    "tpu.trace_stop"() : () -> ()
    %c0_185 = arith.constant 0 : index
    %c0_186 = arith.constant 0 : index
    %c48_187 = arith.constant 48 : index
    %233 = vector.load %arg20[%c0_185, %c0_186, %c48_187] : memref<2x8x64xf32, #tpu.memory_space<vmem>>, vector<2x8x16xf32>
    tpu.vector_store %arg20[%c0_185, %c0_186, %c48_187], %232 {strides = array<i32>} : memref<2x8x64xf32, #tpu.memory_space<vmem>>, vector<2x8x16xf32>,
    %c0_188 = arith.constant 0 : index
    %c0_189 = arith.constant 0 : index
    %c0_190 = arith.constant 0 : index
    %234 = vector.load %arg20[%c0_188, %c0_189, %c0_190] : memref<2x8x64xf32, #tpu.memory_space<vmem>>, vector<2x8x64xf32>
    %235 = vector.shape_cast %234 : vector<2x8x64xf32> to vector<16x64xf32>
    %c1_191 = arith.constant 1 : index
    %c0_192 = arith.constant 0 : index
    %c0_193 = arith.constant 0 : index
    %236 = vector.load %arg6[%c1_191, %c0_192, %c0_193] : memref<4x64x64xf32, #tpu.memory_space<vmem>>, vector<1x64x64xf32>
    %237 = vector.shape_cast %236 : vector<1x64x64xf32> to vector<64x64xf32>
    %cst_194 = arith.constant dense<0.000000e+00> : vector<16x64xf32>
    %238 = tpu.matmul %235, %237, %cst_194 {dimension_numbers = #tpu.dot_dimension_numbers<[1], [0], [0], [1], [0, 0, 1, 1], [], []>} : vector<16x64xf32>, vector<64x64xf32>, vector<16x64xf32> -> vector<16x64xf32>
    %c1_195 = arith.constant 1 : index
    %c0_196 = arith.constant 0 : index
    %c0_197 = arith.constant 0 : index
    %239 = vector.load %arg7[%c1_195, %c0_196, %c0_197] : memref<4x1x64xf32, #tpu.memory_space<vmem>>, vector<1x1x64xf32>
    %240 = vector.shape_cast %239 : vector<1x1x64xf32> to vector<1x64xf32>
    %241 = vector.broadcast %240 : vector<1x64xf32> to vector<16x64xf32>
    %242 = arith.addf %238, %241 : vector<16x64xf32>
    %243 = arith.addf %160, %242 : vector<16x64xf32>
    %c1_198 = arith.constant 1 : index
    %c0_199 = arith.constant 0 : index
    %c0_200 = arith.constant 0 : index
    %244 = vector.load %arg12[%c1_198, %c0_199, %c0_200] : memref<4x1x64xf32, #tpu.memory_space<vmem>>, vector<1x1x64xf32>
    %245 = vector.shape_cast %244 : vector<1x1x64xf32> to vector<1x64xf32>
    %c1_201 = arith.constant 1 : index
    %c0_202 = arith.constant 0 : index
    %c0_203 = arith.constant 0 : index
    %246 = vector.load %arg13[%c1_201, %c0_202, %c0_203] : memref<4x1x64xf32, #tpu.memory_space<vmem>>, vector<1x1x64xf32>
    %247 = vector.shape_cast %246 : vector<1x1x64xf32> to vector<1x64xf32>
    %cst_204 = arith.constant dense<0.000000e+00> : vector<16xf32>
    %248 = vector.multi_reduction <add>, %243, %cst_204 [1] : vector<16x64xf32> to vector<16xf32>
    %249 = vector.shape_cast %248 : vector<16xf32> to vector<16x1xf32>
    %cst_205 = arith.constant 1.562500e-02 : f32
    %250 = vector.broadcast %cst_205 : f32 to vector<16x1xf32>
    %251 = arith.mulf %249, %250 : vector<16x1xf32>
    %252 = arith.mulf %243, %243 : vector<16x64xf32>
    %cst_206 = arith.constant dense<0.000000e+00> : vector<16xf32>
    %253 = vector.multi_reduction <add>, %252, %cst_206 [1] : vector<16x64xf32> to vector<16xf32>
    %254 = vector.shape_cast %253 : vector<16xf32> to vector<16x1xf32>
    %cst_207 = arith.constant 1.562500e-02 : f32
    %255 = vector.broadcast %cst_207 : f32 to vector<16x1xf32>
    %256 = arith.mulf %254, %255 : vector<16x1xf32>
    %257 = arith.mulf %251, %251 : vector<16x1xf32>
    %258 = arith.subf %256, %257 : vector<16x1xf32>
    %259 = vector.broadcast %251 : vector<16x1xf32> to vector<16x64xf32>
    %260 = arith.subf %243, %259 : vector<16x64xf32>
    %cst_208 = arith.constant 9.99999974E-6 : f32
    %261 = vector.broadcast %cst_208 : f32 to vector<16x1xf32>
    %262 = arith.addf %258, %261 : vector<16x1xf32>
    %263 = math.rsqrt %262 : vector<16x1xf32>
    %264 = vector.broadcast %263 : vector<16x1xf32> to vector<16x64xf32>
    %265 = arith.mulf %260, %264 : vector<16x64xf32>
    %266 = vector.broadcast %245 : vector<1x64xf32> to vector<16x64xf32>
    %267 = arith.mulf %265, %266 : vector<16x64xf32>
    %268 = vector.broadcast %247 : vector<1x64xf32> to vector<16x64xf32>
    %269 = arith.addf %267, %268 : vector<16x64xf32>
    %c1_209 = arith.constant 1 : index
    %c0_210 = arith.constant 0 : index
    %c0_211 = arith.constant 0 : index
    %270 = vector.load %arg8[%c1_209, %c0_210, %c0_211] : memref<4x64x256xf32, #tpu.memory_space<vmem>>, vector<1x64x256xf32>
    %271 = vector.shape_cast %270 : vector<1x64x256xf32> to vector<64x256xf32>
    %cst_212 = arith.constant dense<0.000000e+00> : vector<16x256xf32>
    %272 = tpu.matmul %269, %271, %cst_212 {dimension_numbers = #tpu.dot_dimension_numbers<[1], [0], [0], [1], [0, 0, 1, 1], [], []>} : vector<16x64xf32>, vector<64x256xf32>, vector<16x256xf32> -> vector<16x256xf32>
    %c1_213 = arith.constant 1 : index
    %c0_214 = arith.constant 0 : index
    %c0_215 = arith.constant 0 : index
    %273 = vector.load %arg9[%c1_213, %c0_214, %c0_215] : memref<4x1x256xf32, #tpu.memory_space<vmem>>, vector<1x1x256xf32>
    %274 = vector.shape_cast %273 : vector<1x1x256xf32> to vector<1x256xf32>
    %275 = vector.broadcast %274 : vector<1x256xf32> to vector<16x256xf32>
    %276 = arith.addf %272, %275 : vector<16x256xf32>
    %cst_216 = arith.constant 0.000000e+00 : f32
    %277 = vector.broadcast %cst_216 : f32 to vector<16x256xf32>
    %278 = arith.maximumf %276, %277 : vector<16x256xf32>
    %c1_217 = arith.constant 1 : index
    %c0_218 = arith.constant 0 : index
    %c0_219 = arith.constant 0 : index
    %279 = vector.load %arg10[%c1_217, %c0_218, %c0_219] : memref<4x256x64xf32, #tpu.memory_space<vmem>>, vector<1x256x64xf32>
    %280 = vector.shape_cast %279 : vector<1x256x64xf32> to vector<256x64xf32>
    %cst_220 = arith.constant dense<0.000000e+00> : vector<16x64xf32>
    %281 = tpu.matmul %278, %280, %cst_220 {dimension_numbers = #tpu.dot_dimension_numbers<[1], [0], [0], [1], [0, 0, 1, 1], [], []>} : vector<16x256xf32>, vector<256x64xf32>, vector<16x64xf32> -> vector<16x64xf32>
    %c1_221 = arith.constant 1 : index
    %c0_222 = arith.constant 0 : index
    %c0_223 = arith.constant 0 : index
    %282 = vector.load %arg11[%c1_221, %c0_222, %c0_223] : memref<4x1x64xf32, #tpu.memory_space<vmem>>, vector<1x1x64xf32>
    %283 = vector.shape_cast %282 : vector<1x1x64xf32> to vector<1x64xf32>
    %284 = vector.broadcast %283 : vector<1x64xf32> to vector<16x64xf32>
    %285 = arith.addf %281, %284 : vector<16x64xf32>
    %286 = arith.addf %269, %285 : vector<16x64xf32>
    %c1_224 = arith.constant 1 : index
    %c0_225 = arith.constant 0 : index
    %c0_226 = arith.constant 0 : index
    %287 = vector.load %arg14[%c1_224, %c0_225, %c0_226] : memref<4x1x64xf32, #tpu.memory_space<vmem>>, vector<1x1x64xf32>
    %288 = vector.shape_cast %287 : vector<1x1x64xf32> to vector<1x64xf32>
    %c1_227 = arith.constant 1 : index
    %c0_228 = arith.constant 0 : index
    %c0_229 = arith.constant 0 : index
    %289 = vector.load %arg15[%c1_227, %c0_228, %c0_229] : memref<4x1x64xf32, #tpu.memory_space<vmem>>, vector<1x1x64xf32>
    %290 = vector.shape_cast %289 : vector<1x1x64xf32> to vector<1x64xf32>
    %cst_230 = arith.constant dense<0.000000e+00> : vector<16xf32>
    %291 = vector.multi_reduction <add>, %286, %cst_230 [1] : vector<16x64xf32> to vector<16xf32>
    %292 = vector.shape_cast %291 : vector<16xf32> to vector<16x1xf32>
    %cst_231 = arith.constant 1.562500e-02 : f32
    %293 = vector.broadcast %cst_231 : f32 to vector<16x1xf32>
    %294 = arith.mulf %292, %293 : vector<16x1xf32>
    %295 = arith.mulf %286, %286 : vector<16x64xf32>
    %cst_232 = arith.constant dense<0.000000e+00> : vector<16xf32>
    %296 = vector.multi_reduction <add>, %295, %cst_232 [1] : vector<16x64xf32> to vector<16xf32>
    %297 = vector.shape_cast %296 : vector<16xf32> to vector<16x1xf32>
    %cst_233 = arith.constant 1.562500e-02 : f32
    %298 = vector.broadcast %cst_233 : f32 to vector<16x1xf32>
    %299 = arith.mulf %297, %298 : vector<16x1xf32>
    %300 = arith.mulf %294, %294 : vector<16x1xf32>
    %301 = arith.subf %299, %300 : vector<16x1xf32>
    %302 = vector.broadcast %294 : vector<16x1xf32> to vector<16x64xf32>
    %303 = arith.subf %286, %302 : vector<16x64xf32>
    %cst_234 = arith.constant 9.99999974E-6 : f32
    %304 = vector.broadcast %cst_234 : f32 to vector<16x1xf32>
    %305 = arith.addf %301, %304 : vector<16x1xf32>
    %306 = math.rsqrt %305 : vector<16x1xf32>
    %307 = vector.broadcast %306 : vector<16x1xf32> to vector<16x64xf32>
    %308 = arith.mulf %303, %307 : vector<16x64xf32>
    %309 = vector.broadcast %288 : vector<1x64xf32> to vector<16x64xf32>
    %310 = arith.mulf %308, %309 : vector<16x64xf32>
    %311 = vector.broadcast %290 : vector<1x64xf32> to vector<16x64xf32>
    %312 = arith.addf %310, %311 : vector<16x64xf32>
    %c2 = arith.constant 2 : index
    %c0_235 = arith.constant 0 : index
    %c0_236 = arith.constant 0 : index
    %313 = vector.load %arg4[%c2, %c0_235, %c0_236] : memref<4x64x192xf32, #tpu.memory_space<vmem>>, vector<1x64x192xf32>
    %314 = vector.shape_cast %313 : vector<1x64x192xf32> to vector<64x192xf32>
    %cst_237 = arith.constant dense<0.000000e+00> : vector<16x192xf32>
    %315 = tpu.matmul %312, %314, %cst_237 {dimension_numbers = #tpu.dot_dimension_numbers<[1], [0], [0], [1], [0, 0, 1, 1], [], []>} : vector<16x64xf32>, vector<64x192xf32>, vector<16x192xf32> -> vector<16x192xf32>
    %c2_238 = arith.constant 2 : index
    %c0_239 = arith.constant 0 : index
    %c0_240 = arith.constant 0 : index
    %316 = vector.load %arg5[%c2_238, %c0_239, %c0_240] : memref<4x1x192xf32, #tpu.memory_space<vmem>>, vector<1x1x192xf32>
    %317 = vector.shape_cast %316 : vector<1x1x192xf32> to vector<1x192xf32>
    %318 = vector.broadcast %317 : vector<1x192xf32> to vector<16x192xf32>
    %319 = arith.addf %315, %318 : vector<16x192xf32>
    %320 = vector.shape_cast %319 : vector<16x192xf32> to vector<2x8x192xf32>
    %c0_241 = arith.constant 0 : index
    %c0_242 = arith.constant 0 : index
    %c0_243 = arith.constant 0 : index
    %321 = vector.load %arg19[%c0_241, %c0_242, %c0_243] : memref<2x8x192xf32, #tpu.memory_space<vmem>>, vector<2x8x192xf32>
    tpu.vector_store %arg19[%c0_241, %c0_242, %c0_243], %320 {strides = array<i32>} : memref<2x8x192xf32, #tpu.memory_space<vmem>>, vector<2x8x192xf32>,
    %c0_244 = arith.constant 0 : index
    %c0_245 = arith.constant 0 : index
    %c0_246 = arith.constant 0 : index
    %322 = vector.load %arg19[%c0_244, %c0_245, %c0_246] : memref<2x8x192xf32, #tpu.memory_space<vmem>>, vector<2x8x16xf32>
    %c0_247 = arith.constant 0 : index
    %c0_248 = arith.constant 0 : index
    %c64_249 = arith.constant 64 : index
    %323 = vector.load %arg19[%c0_247, %c0_248, %c64_249] : memref<2x8x192xf32, #tpu.memory_space<vmem>>, vector<2x8x16xf32>
    %c0_250 = arith.constant 0 : index
    %c0_251 = arith.constant 0 : index
    %c128_252 = arith.constant 128 : index
    %324 = vector.load %arg19[%c0_250, %c0_251, %c128_252] : memref<2x8x192xf32, #tpu.memory_space<vmem>>, vector<2x8x16xf32>
    "tpu.trace_start"() <{level = 10 : i32, message = "bqd,bkd->bqk"}> : () -> ()
    %cst_253 = arith.constant dense<0.000000e+00> : vector<2x8x8xf32>
    %325 = tpu.matmul %322, %323, %cst_253 {dimension_numbers = #tpu.dot_dimension_numbers<[2], [2], [1], [1], [0, 0, 0, 1, 1, 1], [0], [0]>} : vector<2x8x16xf32>, vector<2x8x16xf32>, vector<2x8x8xf32> -> vector<2x8x8xf32>
    "tpu.trace_stop"() : () -> ()
    %cst_254 = arith.constant dense<0xFF800000> : vector<2x8xf32>
    %326 = vector.multi_reduction <maximumf>, %325, %cst_254 [2] : vector<2x8x8xf32> to vector<2x8xf32>
    %327 = vector.shape_cast %326 : vector<2x8xf32> to vector<2x8x1xf32>
    %328 = vector.broadcast %327 : vector<2x8x1xf32> to vector<2x8x8xf32>
    %329 = arith.subf %325, %328 : vector<2x8x8xf32>
    %330 = math.exp %329 : vector<2x8x8xf32>
    %cst_255 = arith.constant dense<0.000000e+00> : vector<2x8xf32>
    %331 = vector.multi_reduction <add>, %330, %cst_255 [2] : vector<2x8x8xf32> to vector<2x8xf32>
    %332 = vector.shape_cast %331 : vector<2x8xf32> to vector<2x8x1xf32>
    %333 = tpu.reciprocal %332 {approx = true} : vector<2x8x1xf32> -> vector<2x8x1xf32>
    %334 = vector.broadcast %333 : vector<2x8x1xf32> to vector<2x8x8xf32>
    %335 = arith.mulf %330, %334 : vector<2x8x8xf32>
    "tpu.trace_start"() <{level = 10 : i32, message = "bqk,bkd->bqd"}> : () -> ()
    %cst_256 = arith.constant dense<0.000000e+00> : vector<2x8x16xf32>
    %336 = tpu.matmul %335, %324, %cst_256 {dimension_numbers = #tpu.dot_dimension_numbers<[2], [1], [1], [2], [0, 0, 0, 1, 1, 2], [0], [0]>} : vector<2x8x8xf32>, vector<2x8x16xf32>, vector<2x8x16xf32> -> vector<2x8x16xf32>
    "tpu.trace_stop"() : () -> ()
    %c0_257 = arith.constant 0 : index
    %c0_258 = arith.constant 0 : index
    %c0_259 = arith.constant 0 : index
    %337 = vector.load %arg20[%c0_257, %c0_258, %c0_259] : memref<2x8x64xf32, #tpu.memory_space<vmem>>, vector<2x8x16xf32>
    tpu.vector_store %arg20[%c0_257, %c0_258, %c0_259], %336 {strides = array<i32>} : memref<2x8x64xf32, #tpu.memory_space<vmem>>, vector<2x8x16xf32>,
    %c0_260 = arith.constant 0 : index
    %c0_261 = arith.constant 0 : index
    %c16_262 = arith.constant 16 : index
    %338 = vector.load %arg19[%c0_260, %c0_261, %c16_262] : memref<2x8x192xf32, #tpu.memory_space<vmem>>, vector<2x8x16xf32>
    %c0_263 = arith.constant 0 : index
    %c0_264 = arith.constant 0 : index
    %c80_265 = arith.constant 80 : index
    %339 = vector.load %arg19[%c0_263, %c0_264, %c80_265] : memref<2x8x192xf32, #tpu.memory_space<vmem>>, vector<2x8x16xf32>
    %c0_266 = arith.constant 0 : index
    %c0_267 = arith.constant 0 : index
    %c144_268 = arith.constant 144 : index
    %340 = vector.load %arg19[%c0_266, %c0_267, %c144_268] : memref<2x8x192xf32, #tpu.memory_space<vmem>>, vector<2x8x16xf32>
    "tpu.trace_start"() <{level = 10 : i32, message = "bqd,bkd->bqk"}> : () -> ()
    %cst_269 = arith.constant dense<0.000000e+00> : vector<2x8x8xf32>
    %341 = tpu.matmul %338, %339, %cst_269 {dimension_numbers = #tpu.dot_dimension_numbers<[2], [2], [1], [1], [0, 0, 0, 1, 1, 1], [0], [0]>} : vector<2x8x16xf32>, vector<2x8x16xf32>, vector<2x8x8xf32> -> vector<2x8x8xf32>
    "tpu.trace_stop"() : () -> ()
    %cst_270 = arith.constant dense<0xFF800000> : vector<2x8xf32>
    %342 = vector.multi_reduction <maximumf>, %341, %cst_270 [2] : vector<2x8x8xf32> to vector<2x8xf32>
    %343 = vector.shape_cast %342 : vector<2x8xf32> to vector<2x8x1xf32>
    %344 = vector.broadcast %343 : vector<2x8x1xf32> to vector<2x8x8xf32>
    %345 = arith.subf %341, %344 : vector<2x8x8xf32>
    %346 = math.exp %345 : vector<2x8x8xf32>
    %cst_271 = arith.constant dense<0.000000e+00> : vector<2x8xf32>
    %347 = vector.multi_reduction <add>, %346, %cst_271 [2] : vector<2x8x8xf32> to vector<2x8xf32>
    %348 = vector.shape_cast %347 : vector<2x8xf32> to vector<2x8x1xf32>
    %349 = tpu.reciprocal %348 {approx = true} : vector<2x8x1xf32> -> vector<2x8x1xf32>
    %350 = vector.broadcast %349 : vector<2x8x1xf32> to vector<2x8x8xf32>
    %351 = arith.mulf %346, %350 : vector<2x8x8xf32>
    "tpu.trace_start"() <{level = 10 : i32, message = "bqk,bkd->bqd"}> : () -> ()
    %cst_272 = arith.constant dense<0.000000e+00> : vector<2x8x16xf32>
    %352 = tpu.matmul %351, %340, %cst_272 {dimension_numbers = #tpu.dot_dimension_numbers<[2], [1], [1], [2], [0, 0, 0, 1, 1, 2], [0], [0]>} : vector<2x8x8xf32>, vector<2x8x16xf32>, vector<2x8x16xf32> -> vector<2x8x16xf32>
    "tpu.trace_stop"() : () -> ()
    %c0_273 = arith.constant 0 : index
    %c0_274 = arith.constant 0 : index
    %c16_275 = arith.constant 16 : index
    %353 = vector.load %arg20[%c0_273, %c0_274, %c16_275] : memref<2x8x64xf32, #tpu.memory_space<vmem>>, vector<2x8x16xf32>
    tpu.vector_store %arg20[%c0_273, %c0_274, %c16_275], %352 {strides = array<i32>} : memref<2x8x64xf32, #tpu.memory_space<vmem>>, vector<2x8x16xf32>,
    %c0_276 = arith.constant 0 : index
    %c0_277 = arith.constant 0 : index
    %c32_278 = arith.constant 32 : index
    %354 = vector.load %arg19[%c0_276, %c0_277, %c32_278] : memref<2x8x192xf32, #tpu.memory_space<vmem>>, vector<2x8x16xf32>
    %c0_279 = arith.constant 0 : index
    %c0_280 = arith.constant 0 : index
    %c96_281 = arith.constant 96 : index
    %355 = vector.load %arg19[%c0_279, %c0_280, %c96_281] : memref<2x8x192xf32, #tpu.memory_space<vmem>>, vector<2x8x16xf32>
    %c0_282 = arith.constant 0 : index
    %c0_283 = arith.constant 0 : index
    %c160_284 = arith.constant 160 : index
    %356 = vector.load %arg19[%c0_282, %c0_283, %c160_284] : memref<2x8x192xf32, #tpu.memory_space<vmem>>, vector<2x8x16xf32>
    "tpu.trace_start"() <{level = 10 : i32, message = "bqd,bkd->bqk"}> : () -> ()
    %cst_285 = arith.constant dense<0.000000e+00> : vector<2x8x8xf32>
    %357 = tpu.matmul %354, %355, %cst_285 {dimension_numbers = #tpu.dot_dimension_numbers<[2], [2], [1], [1], [0, 0, 0, 1, 1, 1], [0], [0]>} : vector<2x8x16xf32>, vector<2x8x16xf32>, vector<2x8x8xf32> -> vector<2x8x8xf32>
    "tpu.trace_stop"() : () -> ()
    %cst_286 = arith.constant dense<0xFF800000> : vector<2x8xf32>
    %358 = vector.multi_reduction <maximumf>, %357, %cst_286 [2] : vector<2x8x8xf32> to vector<2x8xf32>
    %359 = vector.shape_cast %358 : vector<2x8xf32> to vector<2x8x1xf32>
    %360 = vector.broadcast %359 : vector<2x8x1xf32> to vector<2x8x8xf32>
    %361 = arith.subf %357, %360 : vector<2x8x8xf32>
    %362 = math.exp %361 : vector<2x8x8xf32>
    %cst_287 = arith.constant dense<0.000000e+00> : vector<2x8xf32>
    %363 = vector.multi_reduction <add>, %362, %cst_287 [2] : vector<2x8x8xf32> to vector<2x8xf32>
    %364 = vector.shape_cast %363 : vector<2x8xf32> to vector<2x8x1xf32>
    %365 = tpu.reciprocal %364 {approx = true} : vector<2x8x1xf32> -> vector<2x8x1xf32>
    %366 = vector.broadcast %365 : vector<2x8x1xf32> to vector<2x8x8xf32>
    %367 = arith.mulf %362, %366 : vector<2x8x8xf32>
    "tpu.trace_start"() <{level = 10 : i32, message = "bqk,bkd->bqd"}> : () -> ()
    %cst_288 = arith.constant dense<0.000000e+00> : vector<2x8x16xf32>
    %368 = tpu.matmul %367, %356, %cst_288 {dimension_numbers = #tpu.dot_dimension_numbers<[2], [1], [1], [2], [0, 0, 0, 1, 1, 2], [0], [0]>} : vector<2x8x8xf32>, vector<2x8x16xf32>, vector<2x8x16xf32> -> vector<2x8x16xf32>
    "tpu.trace_stop"() : () -> ()
    %c0_289 = arith.constant 0 : index
    %c0_290 = arith.constant 0 : index
    %c32_291 = arith.constant 32 : index
    %369 = vector.load %arg20[%c0_289, %c0_290, %c32_291] : memref<2x8x64xf32, #tpu.memory_space<vmem>>, vector<2x8x16xf32>
    tpu.vector_store %arg20[%c0_289, %c0_290, %c32_291], %368 {strides = array<i32>} : memref<2x8x64xf32, #tpu.memory_space<vmem>>, vector<2x8x16xf32>,
    %c0_292 = arith.constant 0 : index
    %c0_293 = arith.constant 0 : index
    %c48_294 = arith.constant 48 : index
    %370 = vector.load %arg19[%c0_292, %c0_293, %c48_294] : memref<2x8x192xf32, #tpu.memory_space<vmem>>, vector<2x8x16xf32>
    %c0_295 = arith.constant 0 : index
    %c0_296 = arith.constant 0 : index
    %c112_297 = arith.constant 112 : index
    %371 = vector.load %arg19[%c0_295, %c0_296, %c112_297] : memref<2x8x192xf32, #tpu.memory_space<vmem>>, vector<2x8x16xf32>
    %c0_298 = arith.constant 0 : index
    %c0_299 = arith.constant 0 : index
    %c176_300 = arith.constant 176 : index
    %372 = vector.load %arg19[%c0_298, %c0_299, %c176_300] : memref<2x8x192xf32, #tpu.memory_space<vmem>>, vector<2x8x16xf32>
    "tpu.trace_start"() <{level = 10 : i32, message = "bqd,bkd->bqk"}> : () -> ()
    %cst_301 = arith.constant dense<0.000000e+00> : vector<2x8x8xf32>
    %373 = tpu.matmul %370, %371, %cst_301 {dimension_numbers = #tpu.dot_dimension_numbers<[2], [2], [1], [1], [0, 0, 0, 1, 1, 1], [0], [0]>} : vector<2x8x16xf32>, vector<2x8x16xf32>, vector<2x8x8xf32> -> vector<2x8x8xf32>
    "tpu.trace_stop"() : () -> ()
    %cst_302 = arith.constant dense<0xFF800000> : vector<2x8xf32>
    %374 = vector.multi_reduction <maximumf>, %373, %cst_302 [2] : vector<2x8x8xf32> to vector<2x8xf32>
    %375 = vector.shape_cast %374 : vector<2x8xf32> to vector<2x8x1xf32>
    %376 = vector.broadcast %375 : vector<2x8x1xf32> to vector<2x8x8xf32>
    %377 = arith.subf %373, %376 : vector<2x8x8xf32>
    %378 = math.exp %377 : vector<2x8x8xf32>
    %cst_303 = arith.constant dense<0.000000e+00> : vector<2x8xf32>
    %379 = vector.multi_reduction <add>, %378, %cst_303 [2] : vector<2x8x8xf32> to vector<2x8xf32>
    %380 = vector.shape_cast %379 : vector<2x8xf32> to vector<2x8x1xf32>
    %381 = tpu.reciprocal %380 {approx = true} : vector<2x8x1xf32> -> vector<2x8x1xf32>
    %382 = vector.broadcast %381 : vector<2x8x1xf32> to vector<2x8x8xf32>
    %383 = arith.mulf %378, %382 : vector<2x8x8xf32>
    "tpu.trace_start"() <{level = 10 : i32, message = "bqk,bkd->bqd"}> : () -> ()
    %cst_304 = arith.constant dense<0.000000e+00> : vector<2x8x16xf32>
    %384 = tpu.matmul %383, %372, %cst_304 {dimension_numbers = #tpu.dot_dimension_numbers<[2], [1], [1], [2], [0, 0, 0, 1, 1, 2], [0], [0]>} : vector<2x8x8xf32>, vector<2x8x16xf32>, vector<2x8x16xf32> -> vector<2x8x16xf32>
    "tpu.trace_stop"() : () -> ()
    %c0_305 = arith.constant 0 : index
    %c0_306 = arith.constant 0 : index
    %c48_307 = arith.constant 48 : index
    %385 = vector.load %arg20[%c0_305, %c0_306, %c48_307] : memref<2x8x64xf32, #tpu.memory_space<vmem>>, vector<2x8x16xf32>
    tpu.vector_store %arg20[%c0_305, %c0_306, %c48_307], %384 {strides = array<i32>} : memref<2x8x64xf32, #tpu.memory_space<vmem>>, vector<2x8x16xf32>,
    %c0_308 = arith.constant 0 : index
    %c0_309 = arith.constant 0 : index
    %c0_310 = arith.constant 0 : index
    %386 = vector.load %arg20[%c0_308, %c0_309, %c0_310] : memref<2x8x64xf32, #tpu.memory_space<vmem>>, vector<2x8x64xf32>
    %387 = vector.shape_cast %386 : vector<2x8x64xf32> to vector<16x64xf32>
    %c2_311 = arith.constant 2 : index
    %c0_312 = arith.constant 0 : index
    %c0_313 = arith.constant 0 : index
    %388 = vector.load %arg6[%c2_311, %c0_312, %c0_313] : memref<4x64x64xf32, #tpu.memory_space<vmem>>, vector<1x64x64xf32>
    %389 = vector.shape_cast %388 : vector<1x64x64xf32> to vector<64x64xf32>
    %cst_314 = arith.constant dense<0.000000e+00> : vector<16x64xf32>
    %390 = tpu.matmul %387, %389, %cst_314 {dimension_numbers = #tpu.dot_dimension_numbers<[1], [0], [0], [1], [0, 0, 1, 1], [], []>} : vector<16x64xf32>, vector<64x64xf32>, vector<16x64xf32> -> vector<16x64xf32>
    %c2_315 = arith.constant 2 : index
    %c0_316 = arith.constant 0 : index
    %c0_317 = arith.constant 0 : index
    %391 = vector.load %arg7[%c2_315, %c0_316, %c0_317] : memref<4x1x64xf32, #tpu.memory_space<vmem>>, vector<1x1x64xf32>
    %392 = vector.shape_cast %391 : vector<1x1x64xf32> to vector<1x64xf32>
    %393 = vector.broadcast %392 : vector<1x64xf32> to vector<16x64xf32>
    %394 = arith.addf %390, %393 : vector<16x64xf32>
    %395 = arith.addf %312, %394 : vector<16x64xf32>
    %c2_318 = arith.constant 2 : index
    %c0_319 = arith.constant 0 : index
    %c0_320 = arith.constant 0 : index
    %396 = vector.load %arg12[%c2_318, %c0_319, %c0_320] : memref<4x1x64xf32, #tpu.memory_space<vmem>>, vector<1x1x64xf32>
    %397 = vector.shape_cast %396 : vector<1x1x64xf32> to vector<1x64xf32>
    %c2_321 = arith.constant 2 : index
    %c0_322 = arith.constant 0 : index
    %c0_323 = arith.constant 0 : index
    %398 = vector.load %arg13[%c2_321, %c0_322, %c0_323] : memref<4x1x64xf32, #tpu.memory_space<vmem>>, vector<1x1x64xf32>
    %399 = vector.shape_cast %398 : vector<1x1x64xf32> to vector<1x64xf32>
    %cst_324 = arith.constant dense<0.000000e+00> : vector<16xf32>
    %400 = vector.multi_reduction <add>, %395, %cst_324 [1] : vector<16x64xf32> to vector<16xf32>
    %401 = vector.shape_cast %400 : vector<16xf32> to vector<16x1xf32>
    %cst_325 = arith.constant 1.562500e-02 : f32
    %402 = vector.broadcast %cst_325 : f32 to vector<16x1xf32>
    %403 = arith.mulf %401, %402 : vector<16x1xf32>
    %404 = arith.mulf %395, %395 : vector<16x64xf32>
    %cst_326 = arith.constant dense<0.000000e+00> : vector<16xf32>
    %405 = vector.multi_reduction <add>, %404, %cst_326 [1] : vector<16x64xf32> to vector<16xf32>
    %406 = vector.shape_cast %405 : vector<16xf32> to vector<16x1xf32>
    %cst_327 = arith.constant 1.562500e-02 : f32
    %407 = vector.broadcast %cst_327 : f32 to vector<16x1xf32>
    %408 = arith.mulf %406, %407 : vector<16x1xf32>
    %409 = arith.mulf %403, %403 : vector<16x1xf32>
    %410 = arith.subf %408, %409 : vector<16x1xf32>
    %411 = vector.broadcast %403 : vector<16x1xf32> to vector<16x64xf32>
    %412 = arith.subf %395, %411 : vector<16x64xf32>
    %cst_328 = arith.constant 9.99999974E-6 : f32
    %413 = vector.broadcast %cst_328 : f32 to vector<16x1xf32>
    %414 = arith.addf %410, %413 : vector<16x1xf32>
    %415 = math.rsqrt %414 : vector<16x1xf32>
    %416 = vector.broadcast %415 : vector<16x1xf32> to vector<16x64xf32>
    %417 = arith.mulf %412, %416 : vector<16x64xf32>
    %418 = vector.broadcast %397 : vector<1x64xf32> to vector<16x64xf32>
    %419 = arith.mulf %417, %418 : vector<16x64xf32>
    %420 = vector.broadcast %399 : vector<1x64xf32> to vector<16x64xf32>
    %421 = arith.addf %419, %420 : vector<16x64xf32>
    %c2_329 = arith.constant 2 : index
    %c0_330 = arith.constant 0 : index
    %c0_331 = arith.constant 0 : index
    %422 = vector.load %arg8[%c2_329, %c0_330, %c0_331] : memref<4x64x256xf32, #tpu.memory_space<vmem>>, vector<1x64x256xf32>
    %423 = vector.shape_cast %422 : vector<1x64x256xf32> to vector<64x256xf32>
    %cst_332 = arith.constant dense<0.000000e+00> : vector<16x256xf32>
    %424 = tpu.matmul %421, %423, %cst_332 {dimension_numbers = #tpu.dot_dimension_numbers<[1], [0], [0], [1], [0, 0, 1, 1], [], []>} : vector<16x64xf32>, vector<64x256xf32>, vector<16x256xf32> -> vector<16x256xf32>
    %c2_333 = arith.constant 2 : index
    %c0_334 = arith.constant 0 : index
    %c0_335 = arith.constant 0 : index
    %425 = vector.load %arg9[%c2_333, %c0_334, %c0_335] : memref<4x1x256xf32, #tpu.memory_space<vmem>>, vector<1x1x256xf32>
    %426 = vector.shape_cast %425 : vector<1x1x256xf32> to vector<1x256xf32>
    %427 = vector.broadcast %426 : vector<1x256xf32> to vector<16x256xf32>
    %428 = arith.addf %424, %427 : vector<16x256xf32>
    %cst_336 = arith.constant 0.000000e+00 : f32
    %429 = vector.broadcast %cst_336 : f32 to vector<16x256xf32>
    %430 = arith.maximumf %428, %429 : vector<16x256xf32>
    %c2_337 = arith.constant 2 : index
    %c0_338 = arith.constant 0 : index
    %c0_339 = arith.constant 0 : index
    %431 = vector.load %arg10[%c2_337, %c0_338, %c0_339] : memref<4x256x64xf32, #tpu.memory_space<vmem>>, vector<1x256x64xf32>
    %432 = vector.shape_cast %431 : vector<1x256x64xf32> to vector<256x64xf32>
    %cst_340 = arith.constant dense<0.000000e+00> : vector<16x64xf32>
    %433 = tpu.matmul %430, %432, %cst_340 {dimension_numbers = #tpu.dot_dimension_numbers<[1], [0], [0], [1], [0, 0, 1, 1], [], []>} : vector<16x256xf32>, vector<256x64xf32>, vector<16x64xf32> -> vector<16x64xf32>
    %c2_341 = arith.constant 2 : index
    %c0_342 = arith.constant 0 : index
    %c0_343 = arith.constant 0 : index
    %434 = vector.load %arg11[%c2_341, %c0_342, %c0_343] : memref<4x1x64xf32, #tpu.memory_space<vmem>>, vector<1x1x64xf32>
    %435 = vector.shape_cast %434 : vector<1x1x64xf32> to vector<1x64xf32>
    %436 = vector.broadcast %435 : vector<1x64xf32> to vector<16x64xf32>
    %437 = arith.addf %433, %436 : vector<16x64xf32>
    %438 = arith.addf %421, %437 : vector<16x64xf32>
    %c2_344 = arith.constant 2 : index
    %c0_345 = arith.constant 0 : index
    %c0_346 = arith.constant 0 : index
    %439 = vector.load %arg14[%c2_344, %c0_345, %c0_346] : memref<4x1x64xf32, #tpu.memory_space<vmem>>, vector<1x1x64xf32>
    %440 = vector.shape_cast %439 : vector<1x1x64xf32> to vector<1x64xf32>
    %c2_347 = arith.constant 2 : index
    %c0_348 = arith.constant 0 : index
    %c0_349 = arith.constant 0 : index
    %441 = vector.load %arg15[%c2_347, %c0_348, %c0_349] : memref<4x1x64xf32, #tpu.memory_space<vmem>>, vector<1x1x64xf32>
    %442 = vector.shape_cast %441 : vector<1x1x64xf32> to vector<1x64xf32>
    %cst_350 = arith.constant dense<0.000000e+00> : vector<16xf32>
    %443 = vector.multi_reduction <add>, %438, %cst_350 [1] : vector<16x64xf32> to vector<16xf32>
    %444 = vector.shape_cast %443 : vector<16xf32> to vector<16x1xf32>
    %cst_351 = arith.constant 1.562500e-02 : f32
    %445 = vector.broadcast %cst_351 : f32 to vector<16x1xf32>
    %446 = arith.mulf %444, %445 : vector<16x1xf32>
    %447 = arith.mulf %438, %438 : vector<16x64xf32>
    %cst_352 = arith.constant dense<0.000000e+00> : vector<16xf32>
    %448 = vector.multi_reduction <add>, %447, %cst_352 [1] : vector<16x64xf32> to vector<16xf32>
    %449 = vector.shape_cast %448 : vector<16xf32> to vector<16x1xf32>
    %cst_353 = arith.constant 1.562500e-02 : f32
    %450 = vector.broadcast %cst_353 : f32 to vector<16x1xf32>
    %451 = arith.mulf %449, %450 : vector<16x1xf32>
    %452 = arith.mulf %446, %446 : vector<16x1xf32>
    %453 = arith.subf %451, %452 : vector<16x1xf32>
    %454 = vector.broadcast %446 : vector<16x1xf32> to vector<16x64xf32>
    %455 = arith.subf %438, %454 : vector<16x64xf32>
    %cst_354 = arith.constant 9.99999974E-6 : f32
    %456 = vector.broadcast %cst_354 : f32 to vector<16x1xf32>
    %457 = arith.addf %453, %456 : vector<16x1xf32>
    %458 = math.rsqrt %457 : vector<16x1xf32>
    %459 = vector.broadcast %458 : vector<16x1xf32> to vector<16x64xf32>
    %460 = arith.mulf %455, %459 : vector<16x64xf32>
    %461 = vector.broadcast %440 : vector<1x64xf32> to vector<16x64xf32>
    %462 = arith.mulf %460, %461 : vector<16x64xf32>
    %463 = vector.broadcast %442 : vector<1x64xf32> to vector<16x64xf32>
    %464 = arith.addf %462, %463 : vector<16x64xf32>
    %c3 = arith.constant 3 : index
    %c0_355 = arith.constant 0 : index
    %c0_356 = arith.constant 0 : index
    %465 = vector.load %arg4[%c3, %c0_355, %c0_356] : memref<4x64x192xf32, #tpu.memory_space<vmem>>, vector<1x64x192xf32>
    %466 = vector.shape_cast %465 : vector<1x64x192xf32> to vector<64x192xf32>
    %cst_357 = arith.constant dense<0.000000e+00> : vector<16x192xf32>
    %467 = tpu.matmul %464, %466, %cst_357 {dimension_numbers = #tpu.dot_dimension_numbers<[1], [0], [0], [1], [0, 0, 1, 1], [], []>} : vector<16x64xf32>, vector<64x192xf32>, vector<16x192xf32> -> vector<16x192xf32>
    %c3_358 = arith.constant 3 : index
    %c0_359 = arith.constant 0 : index
    %c0_360 = arith.constant 0 : index
    %468 = vector.load %arg5[%c3_358, %c0_359, %c0_360] : memref<4x1x192xf32, #tpu.memory_space<vmem>>, vector<1x1x192xf32>
    %469 = vector.shape_cast %468 : vector<1x1x192xf32> to vector<1x192xf32>
    %470 = vector.broadcast %469 : vector<1x192xf32> to vector<16x192xf32>
    %471 = arith.addf %467, %470 : vector<16x192xf32>
    %472 = vector.shape_cast %471 : vector<16x192xf32> to vector<2x8x192xf32>
    %c0_361 = arith.constant 0 : index
    %c0_362 = arith.constant 0 : index
    %c0_363 = arith.constant 0 : index
    %473 = vector.load %arg19[%c0_361, %c0_362, %c0_363] : memref<2x8x192xf32, #tpu.memory_space<vmem>>, vector<2x8x192xf32>
    tpu.vector_store %arg19[%c0_361, %c0_362, %c0_363], %472 {strides = array<i32>} : memref<2x8x192xf32, #tpu.memory_space<vmem>>, vector<2x8x192xf32>,
    %c0_364 = arith.constant 0 : index
    %c0_365 = arith.constant 0 : index
    %c0_366 = arith.constant 0 : index
    %474 = vector.load %arg19[%c0_364, %c0_365, %c0_366] : memref<2x8x192xf32, #tpu.memory_space<vmem>>, vector<2x8x16xf32>
    %c0_367 = arith.constant 0 : index
    %c0_368 = arith.constant 0 : index
    %c64_369 = arith.constant 64 : index
    %475 = vector.load %arg19[%c0_367, %c0_368, %c64_369] : memref<2x8x192xf32, #tpu.memory_space<vmem>>, vector<2x8x16xf32>
    %c0_370 = arith.constant 0 : index
    %c0_371 = arith.constant 0 : index
    %c128_372 = arith.constant 128 : index
    %476 = vector.load %arg19[%c0_370, %c0_371, %c128_372] : memref<2x8x192xf32, #tpu.memory_space<vmem>>, vector<2x8x16xf32>
    "tpu.trace_start"() <{level = 10 : i32, message = "bqd,bkd->bqk"}> : () -> ()
    %cst_373 = arith.constant dense<0.000000e+00> : vector<2x8x8xf32>
    %477 = tpu.matmul %474, %475, %cst_373 {dimension_numbers = #tpu.dot_dimension_numbers<[2], [2], [1], [1], [0, 0, 0, 1, 1, 1], [0], [0]>} : vector<2x8x16xf32>, vector<2x8x16xf32>, vector<2x8x8xf32> -> vector<2x8x8xf32>
    "tpu.trace_stop"() : () -> ()
    %cst_374 = arith.constant dense<0xFF800000> : vector<2x8xf32>
    %478 = vector.multi_reduction <maximumf>, %477, %cst_374 [2] : vector<2x8x8xf32> to vector<2x8xf32>
    %479 = vector.shape_cast %478 : vector<2x8xf32> to vector<2x8x1xf32>
    %480 = vector.broadcast %479 : vector<2x8x1xf32> to vector<2x8x8xf32>
    %481 = arith.subf %477, %480 : vector<2x8x8xf32>
    %482 = math.exp %481 : vector<2x8x8xf32>
    %cst_375 = arith.constant dense<0.000000e+00> : vector<2x8xf32>
    %483 = vector.multi_reduction <add>, %482, %cst_375 [2] : vector<2x8x8xf32> to vector<2x8xf32>
    %484 = vector.shape_cast %483 : vector<2x8xf32> to vector<2x8x1xf32>
    %485 = tpu.reciprocal %484 {approx = true} : vector<2x8x1xf32> -> vector<2x8x1xf32>
    %486 = vector.broadcast %485 : vector<2x8x1xf32> to vector<2x8x8xf32>
    %487 = arith.mulf %482, %486 : vector<2x8x8xf32>
    "tpu.trace_start"() <{level = 10 : i32, message = "bqk,bkd->bqd"}> : () -> ()
    %cst_376 = arith.constant dense<0.000000e+00> : vector<2x8x16xf32>
    %488 = tpu.matmul %487, %476, %cst_376 {dimension_numbers = #tpu.dot_dimension_numbers<[2], [1], [1], [2], [0, 0, 0, 1, 1, 2], [0], [0]>} : vector<2x8x8xf32>, vector<2x8x16xf32>, vector<2x8x16xf32> -> vector<2x8x16xf32>
    "tpu.trace_stop"() : () -> ()
    %c0_377 = arith.constant 0 : index
    %c0_378 = arith.constant 0 : index
    %c0_379 = arith.constant 0 : index
    %489 = vector.load %arg20[%c0_377, %c0_378, %c0_379] : memref<2x8x64xf32, #tpu.memory_space<vmem>>, vector<2x8x16xf32>
    tpu.vector_store %arg20[%c0_377, %c0_378, %c0_379], %488 {strides = array<i32>} : memref<2x8x64xf32, #tpu.memory_space<vmem>>, vector<2x8x16xf32>,
    %c0_380 = arith.constant 0 : index
    %c0_381 = arith.constant 0 : index
    %c16_382 = arith.constant 16 : index
    %490 = vector.load %arg19[%c0_380, %c0_381, %c16_382] : memref<2x8x192xf32, #tpu.memory_space<vmem>>, vector<2x8x16xf32>
    %c0_383 = arith.constant 0 : index
    %c0_384 = arith.constant 0 : index
    %c80_385 = arith.constant 80 : index
    %491 = vector.load %arg19[%c0_383, %c0_384, %c80_385] : memref<2x8x192xf32, #tpu.memory_space<vmem>>, vector<2x8x16xf32>
    %c0_386 = arith.constant 0 : index
    %c0_387 = arith.constant 0 : index
    %c144_388 = arith.constant 144 : index
    %492 = vector.load %arg19[%c0_386, %c0_387, %c144_388] : memref<2x8x192xf32, #tpu.memory_space<vmem>>, vector<2x8x16xf32>
    "tpu.trace_start"() <{level = 10 : i32, message = "bqd,bkd->bqk"}> : () -> ()
    %cst_389 = arith.constant dense<0.000000e+00> : vector<2x8x8xf32>
    %493 = tpu.matmul %490, %491, %cst_389 {dimension_numbers = #tpu.dot_dimension_numbers<[2], [2], [1], [1], [0, 0, 0, 1, 1, 1], [0], [0]>} : vector<2x8x16xf32>, vector<2x8x16xf32>, vector<2x8x8xf32> -> vector<2x8x8xf32>
    "tpu.trace_stop"() : () -> ()
    %cst_390 = arith.constant dense<0xFF800000> : vector<2x8xf32>
    %494 = vector.multi_reduction <maximumf>, %493, %cst_390 [2] : vector<2x8x8xf32> to vector<2x8xf32>
    %495 = vector.shape_cast %494 : vector<2x8xf32> to vector<2x8x1xf32>
    %496 = vector.broadcast %495 : vector<2x8x1xf32> to vector<2x8x8xf32>
    %497 = arith.subf %493, %496 : vector<2x8x8xf32>
    %498 = math.exp %497 : vector<2x8x8xf32>
    %cst_391 = arith.constant dense<0.000000e+00> : vector<2x8xf32>
    %499 = vector.multi_reduction <add>, %498, %cst_391 [2] : vector<2x8x8xf32> to vector<2x8xf32>
    %500 = vector.shape_cast %499 : vector<2x8xf32> to vector<2x8x1xf32>
    %501 = tpu.reciprocal %500 {approx = true} : vector<2x8x1xf32> -> vector<2x8x1xf32>
    %502 = vector.broadcast %501 : vector<2x8x1xf32> to vector<2x8x8xf32>
    %503 = arith.mulf %498, %502 : vector<2x8x8xf32>
    "tpu.trace_start"() <{level = 10 : i32, message = "bqk,bkd->bqd"}> : () -> ()
    %cst_392 = arith.constant dense<0.000000e+00> : vector<2x8x16xf32>
    %504 = tpu.matmul %503, %492, %cst_392 {dimension_numbers = #tpu.dot_dimension_numbers<[2], [1], [1], [2], [0, 0, 0, 1, 1, 2], [0], [0]>} : vector<2x8x8xf32>, vector<2x8x16xf32>, vector<2x8x16xf32> -> vector<2x8x16xf32>
    "tpu.trace_stop"() : () -> ()
    %c0_393 = arith.constant 0 : index
    %c0_394 = arith.constant 0 : index
    %c16_395 = arith.constant 16 : index
    %505 = vector.load %arg20[%c0_393, %c0_394, %c16_395] : memref<2x8x64xf32, #tpu.memory_space<vmem>>, vector<2x8x16xf32>
    tpu.vector_store %arg20[%c0_393, %c0_394, %c16_395], %504 {strides = array<i32>} : memref<2x8x64xf32, #tpu.memory_space<vmem>>, vector<2x8x16xf32>,
    %c0_396 = arith.constant 0 : index
    %c0_397 = arith.constant 0 : index
    %c32_398 = arith.constant 32 : index
    %506 = vector.load %arg19[%c0_396, %c0_397, %c32_398] : memref<2x8x192xf32, #tpu.memory_space<vmem>>, vector<2x8x16xf32>
    %c0_399 = arith.constant 0 : index
    %c0_400 = arith.constant 0 : index
    %c96_401 = arith.constant 96 : index
    %507 = vector.load %arg19[%c0_399, %c0_400, %c96_401] : memref<2x8x192xf32, #tpu.memory_space<vmem>>, vector<2x8x16xf32>
    %c0_402 = arith.constant 0 : index
    %c0_403 = arith.constant 0 : index
    %c160_404 = arith.constant 160 : index
    %508 = vector.load %arg19[%c0_402, %c0_403, %c160_404] : memref<2x8x192xf32, #tpu.memory_space<vmem>>, vector<2x8x16xf32>
    "tpu.trace_start"() <{level = 10 : i32, message = "bqd,bkd->bqk"}> : () -> ()
    %cst_405 = arith.constant dense<0.000000e+00> : vector<2x8x8xf32>
    %509 = tpu.matmul %506, %507, %cst_405 {dimension_numbers = #tpu.dot_dimension_numbers<[2], [2], [1], [1], [0, 0, 0, 1, 1, 1], [0], [0]>} : vector<2x8x16xf32>, vector<2x8x16xf32>, vector<2x8x8xf32> -> vector<2x8x8xf32>
    "tpu.trace_stop"() : () -> ()
    %cst_406 = arith.constant dense<0xFF800000> : vector<2x8xf32>
    %510 = vector.multi_reduction <maximumf>, %509, %cst_406 [2] : vector<2x8x8xf32> to vector<2x8xf32>
    %511 = vector.shape_cast %510 : vector<2x8xf32> to vector<2x8x1xf32>
    %512 = vector.broadcast %511 : vector<2x8x1xf32> to vector<2x8x8xf32>
    %513 = arith.subf %509, %512 : vector<2x8x8xf32>
    %514 = math.exp %513 : vector<2x8x8xf32>
    %cst_407 = arith.constant dense<0.000000e+00> : vector<2x8xf32>
    %515 = vector.multi_reduction <add>, %514, %cst_407 [2] : vector<2x8x8xf32> to vector<2x8xf32>
    %516 = vector.shape_cast %515 : vector<2x8xf32> to vector<2x8x1xf32>
    %517 = tpu.reciprocal %516 {approx = true} : vector<2x8x1xf32> -> vector<2x8x1xf32>
    %518 = vector.broadcast %517 : vector<2x8x1xf32> to vector<2x8x8xf32>
    %519 = arith.mulf %514, %518 : vector<2x8x8xf32>
    "tpu.trace_start"() <{level = 10 : i32, message = "bqk,bkd->bqd"}> : () -> ()
    %cst_408 = arith.constant dense<0.000000e+00> : vector<2x8x16xf32>
    %520 = tpu.matmul %519, %508, %cst_408 {dimension_numbers = #tpu.dot_dimension_numbers<[2], [1], [1], [2], [0, 0, 0, 1, 1, 2], [0], [0]>} : vector<2x8x8xf32>, vector<2x8x16xf32>, vector<2x8x16xf32> -> vector<2x8x16xf32>
    "tpu.trace_stop"() : () -> ()
    %c0_409 = arith.constant 0 : index
    %c0_410 = arith.constant 0 : index
    %c32_411 = arith.constant 32 : index
    %521 = vector.load %arg20[%c0_409, %c0_410, %c32_411] : memref<2x8x64xf32, #tpu.memory_space<vmem>>, vector<2x8x16xf32>
    tpu.vector_store %arg20[%c0_409, %c0_410, %c32_411], %520 {strides = array<i32>} : memref<2x8x64xf32, #tpu.memory_space<vmem>>, vector<2x8x16xf32>,
    %c0_412 = arith.constant 0 : index
    %c0_413 = arith.constant 0 : index
    %c48_414 = arith.constant 48 : index
    %522 = vector.load %arg19[%c0_412, %c0_413, %c48_414] : memref<2x8x192xf32, #tpu.memory_space<vmem>>, vector<2x8x16xf32>
    %c0_415 = arith.constant 0 : index
    %c0_416 = arith.constant 0 : index
    %c112_417 = arith.constant 112 : index
    %523 = vector.load %arg19[%c0_415, %c0_416, %c112_417] : memref<2x8x192xf32, #tpu.memory_space<vmem>>, vector<2x8x16xf32>
    %c0_418 = arith.constant 0 : index
    %c0_419 = arith.constant 0 : index
    %c176_420 = arith.constant 176 : index
    %524 = vector.load %arg19[%c0_418, %c0_419, %c176_420] : memref<2x8x192xf32, #tpu.memory_space<vmem>>, vector<2x8x16xf32>
    "tpu.trace_start"() <{level = 10 : i32, message = "bqd,bkd->bqk"}> : () -> ()
    %cst_421 = arith.constant dense<0.000000e+00> : vector<2x8x8xf32>
    %525 = tpu.matmul %522, %523, %cst_421 {dimension_numbers = #tpu.dot_dimension_numbers<[2], [2], [1], [1], [0, 0, 0, 1, 1, 1], [0], [0]>} : vector<2x8x16xf32>, vector<2x8x16xf32>, vector<2x8x8xf32> -> vector<2x8x8xf32>
    "tpu.trace_stop"() : () -> ()
    %cst_422 = arith.constant dense<0xFF800000> : vector<2x8xf32>
    %526 = vector.multi_reduction <maximumf>, %525, %cst_422 [2] : vector<2x8x8xf32> to vector<2x8xf32>
    %527 = vector.shape_cast %526 : vector<2x8xf32> to vector<2x8x1xf32>
    %528 = vector.broadcast %527 : vector<2x8x1xf32> to vector<2x8x8xf32>
    %529 = arith.subf %525, %528 : vector<2x8x8xf32>
    %530 = math.exp %529 : vector<2x8x8xf32>
    %cst_423 = arith.constant dense<0.000000e+00> : vector<2x8xf32>
    %531 = vector.multi_reduction <add>, %530, %cst_423 [2] : vector<2x8x8xf32> to vector<2x8xf32>
    %532 = vector.shape_cast %531 : vector<2x8xf32> to vector<2x8x1xf32>
    %533 = tpu.reciprocal %532 {approx = true} : vector<2x8x1xf32> -> vector<2x8x1xf32>
    %534 = vector.broadcast %533 : vector<2x8x1xf32> to vector<2x8x8xf32>
    %535 = arith.mulf %530, %534 : vector<2x8x8xf32>
    "tpu.trace_start"() <{level = 10 : i32, message = "bqk,bkd->bqd"}> : () -> ()
    %cst_424 = arith.constant dense<0.000000e+00> : vector<2x8x16xf32>
    %536 = tpu.matmul %535, %524, %cst_424 {dimension_numbers = #tpu.dot_dimension_numbers<[2], [1], [1], [2], [0, 0, 0, 1, 1, 2], [0], [0]>} : vector<2x8x8xf32>, vector<2x8x16xf32>, vector<2x8x16xf32> -> vector<2x8x16xf32>
    "tpu.trace_stop"() : () -> ()
    %c0_425 = arith.constant 0 : index
    %c0_426 = arith.constant 0 : index
    %c48_427 = arith.constant 48 : index
    %537 = vector.load %arg20[%c0_425, %c0_426, %c48_427] : memref<2x8x64xf32, #tpu.memory_space<vmem>>, vector<2x8x16xf32>
    tpu.vector_store %arg20[%c0_425, %c0_426, %c48_427], %536 {strides = array<i32>} : memref<2x8x64xf32, #tpu.memory_space<vmem>>, vector<2x8x16xf32>,
    %c0_428 = arith.constant 0 : index
    %c0_429 = arith.constant 0 : index
    %c0_430 = arith.constant 0 : index
    %538 = vector.load %arg20[%c0_428, %c0_429, %c0_430] : memref<2x8x64xf32, #tpu.memory_space<vmem>>, vector<2x8x64xf32>
    %539 = vector.shape_cast %538 : vector<2x8x64xf32> to vector<16x64xf32>
    %c3_431 = arith.constant 3 : index
    %c0_432 = arith.constant 0 : index
    %c0_433 = arith.constant 0 : index
    %540 = vector.load %arg6[%c3_431, %c0_432, %c0_433] : memref<4x64x64xf32, #tpu.memory_space<vmem>>, vector<1x64x64xf32>
    %541 = vector.shape_cast %540 : vector<1x64x64xf32> to vector<64x64xf32>
    %cst_434 = arith.constant dense<0.000000e+00> : vector<16x64xf32>
    %542 = tpu.matmul %539, %541, %cst_434 {dimension_numbers = #tpu.dot_dimension_numbers<[1], [0], [0], [1], [0, 0, 1, 1], [], []>} : vector<16x64xf32>, vector<64x64xf32>, vector<16x64xf32> -> vector<16x64xf32>
    %c3_435 = arith.constant 3 : index
    %c0_436 = arith.constant 0 : index
    %c0_437 = arith.constant 0 : index
    %543 = vector.load %arg7[%c3_435, %c0_436, %c0_437] : memref<4x1x64xf32, #tpu.memory_space<vmem>>, vector<1x1x64xf32>
    %544 = vector.shape_cast %543 : vector<1x1x64xf32> to vector<1x64xf32>
    %545 = vector.broadcast %544 : vector<1x64xf32> to vector<16x64xf32>
    %546 = arith.addf %542, %545 : vector<16x64xf32>
    %547 = arith.addf %464, %546 : vector<16x64xf32>
    %c3_438 = arith.constant 3 : index
    %c0_439 = arith.constant 0 : index
    %c0_440 = arith.constant 0 : index
    %548 = vector.load %arg12[%c3_438, %c0_439, %c0_440] : memref<4x1x64xf32, #tpu.memory_space<vmem>>, vector<1x1x64xf32>
    %549 = vector.shape_cast %548 : vector<1x1x64xf32> to vector<1x64xf32>
    %c3_441 = arith.constant 3 : index
    %c0_442 = arith.constant 0 : index
    %c0_443 = arith.constant 0 : index
    %550 = vector.load %arg13[%c3_441, %c0_442, %c0_443] : memref<4x1x64xf32, #tpu.memory_space<vmem>>, vector<1x1x64xf32>
    %551 = vector.shape_cast %550 : vector<1x1x64xf32> to vector<1x64xf32>
    %cst_444 = arith.constant dense<0.000000e+00> : vector<16xf32>
    %552 = vector.multi_reduction <add>, %547, %cst_444 [1] : vector<16x64xf32> to vector<16xf32>
    %553 = vector.shape_cast %552 : vector<16xf32> to vector<16x1xf32>
    %cst_445 = arith.constant 1.562500e-02 : f32
    %554 = vector.broadcast %cst_445 : f32 to vector<16x1xf32>
    %555 = arith.mulf %553, %554 : vector<16x1xf32>
    %556 = arith.mulf %547, %547 : vector<16x64xf32>
    %cst_446 = arith.constant dense<0.000000e+00> : vector<16xf32>
    %557 = vector.multi_reduction <add>, %556, %cst_446 [1] : vector<16x64xf32> to vector<16xf32>
    %558 = vector.shape_cast %557 : vector<16xf32> to vector<16x1xf32>
    %cst_447 = arith.constant 1.562500e-02 : f32
    %559 = vector.broadcast %cst_447 : f32 to vector<16x1xf32>
    %560 = arith.mulf %558, %559 : vector<16x1xf32>
    %561 = arith.mulf %555, %555 : vector<16x1xf32>
    %562 = arith.subf %560, %561 : vector<16x1xf32>
    %563 = vector.broadcast %555 : vector<16x1xf32> to vector<16x64xf32>
    %564 = arith.subf %547, %563 : vector<16x64xf32>
    %cst_448 = arith.constant 9.99999974E-6 : f32
    %565 = vector.broadcast %cst_448 : f32 to vector<16x1xf32>
    %566 = arith.addf %562, %565 : vector<16x1xf32>
    %567 = math.rsqrt %566 : vector<16x1xf32>
    %568 = vector.broadcast %567 : vector<16x1xf32> to vector<16x64xf32>
    %569 = arith.mulf %564, %568 : vector<16x64xf32>
    %570 = vector.broadcast %549 : vector<1x64xf32> to vector<16x64xf32>
    %571 = arith.mulf %569, %570 : vector<16x64xf32>
    %572 = vector.broadcast %551 : vector<1x64xf32> to vector<16x64xf32>
    %573 = arith.addf %571, %572 : vector<16x64xf32>
    %c3_449 = arith.constant 3 : index
    %c0_450 = arith.constant 0 : index
    %c0_451 = arith.constant 0 : index
    %574 = vector.load %arg8[%c3_449, %c0_450, %c0_451] : memref<4x64x256xf32, #tpu.memory_space<vmem>>, vector<1x64x256xf32>
    %575 = vector.shape_cast %574 : vector<1x64x256xf32> to vector<64x256xf32>
    %cst_452 = arith.constant dense<0.000000e+00> : vector<16x256xf32>
    %576 = tpu.matmul %573, %575, %cst_452 {dimension_numbers = #tpu.dot_dimension_numbers<[1], [0], [0], [1], [0, 0, 1, 1], [], []>} : vector<16x64xf32>, vector<64x256xf32>, vector<16x256xf32> -> vector<16x256xf32>
    %c3_453 = arith.constant 3 : index
    %c0_454 = arith.constant 0 : index
    %c0_455 = arith.constant 0 : index
    %577 = vector.load %arg9[%c3_453, %c0_454, %c0_455] : memref<4x1x256xf32, #tpu.memory_space<vmem>>, vector<1x1x256xf32>
    %578 = vector.shape_cast %577 : vector<1x1x256xf32> to vector<1x256xf32>
    %579 = vector.broadcast %578 : vector<1x256xf32> to vector<16x256xf32>
    %580 = arith.addf %576, %579 : vector<16x256xf32>
    %cst_456 = arith.constant 0.000000e+00 : f32
    %581 = vector.broadcast %cst_456 : f32 to vector<16x256xf32>
    %582 = arith.maximumf %580, %581 : vector<16x256xf32>
    %c3_457 = arith.constant 3 : index
    %c0_458 = arith.constant 0 : index
    %c0_459 = arith.constant 0 : index
    %583 = vector.load %arg10[%c3_457, %c0_458, %c0_459] : memref<4x256x64xf32, #tpu.memory_space<vmem>>, vector<1x256x64xf32>
    %584 = vector.shape_cast %583 : vector<1x256x64xf32> to vector<256x64xf32>
    %cst_460 = arith.constant dense<0.000000e+00> : vector<16x64xf32>
    %585 = tpu.matmul %582, %584, %cst_460 {dimension_numbers = #tpu.dot_dimension_numbers<[1], [0], [0], [1], [0, 0, 1, 1], [], []>} : vector<16x256xf32>, vector<256x64xf32>, vector<16x64xf32> -> vector<16x64xf32>
    %c3_461 = arith.constant 3 : index
    %c0_462 = arith.constant 0 : index
    %c0_463 = arith.constant 0 : index
    %586 = vector.load %arg11[%c3_461, %c0_462, %c0_463] : memref<4x1x64xf32, #tpu.memory_space<vmem>>, vector<1x1x64xf32>
    %587 = vector.shape_cast %586 : vector<1x1x64xf32> to vector<1x64xf32>
    %588 = vector.broadcast %587 : vector<1x64xf32> to vector<16x64xf32>
    %589 = arith.addf %585, %588 : vector<16x64xf32>
    %590 = arith.addf %573, %589 : vector<16x64xf32>
    %c3_464 = arith.constant 3 : index
    %c0_465 = arith.constant 0 : index
    %c0_466 = arith.constant 0 : index
    %591 = vector.load %arg14[%c3_464, %c0_465, %c0_466] : memref<4x1x64xf32, #tpu.memory_space<vmem>>, vector<1x1x64xf32>
    %592 = vector.shape_cast %591 : vector<1x1x64xf32> to vector<1x64xf32>
    %c3_467 = arith.constant 3 : index
    %c0_468 = arith.constant 0 : index
    %c0_469 = arith.constant 0 : index
    %593 = vector.load %arg15[%c3_467, %c0_468, %c0_469] : memref<4x1x64xf32, #tpu.memory_space<vmem>>, vector<1x1x64xf32>
    %594 = vector.shape_cast %593 : vector<1x1x64xf32> to vector<1x64xf32>
    %cst_470 = arith.constant dense<0.000000e+00> : vector<16xf32>
    %595 = vector.multi_reduction <add>, %590, %cst_470 [1] : vector<16x64xf32> to vector<16xf32>
    %596 = vector.shape_cast %595 : vector<16xf32> to vector<16x1xf32>
    %cst_471 = arith.constant 1.562500e-02 : f32
    %597 = vector.broadcast %cst_471 : f32 to vector<16x1xf32>
    %598 = arith.mulf %596, %597 : vector<16x1xf32>
    %599 = arith.mulf %590, %590 : vector<16x64xf32>
    %cst_472 = arith.constant dense<0.000000e+00> : vector<16xf32>
    %600 = vector.multi_reduction <add>, %599, %cst_472 [1] : vector<16x64xf32> to vector<16xf32>
    %601 = vector.shape_cast %600 : vector<16xf32> to vector<16x1xf32>
    %cst_473 = arith.constant 1.562500e-02 : f32
    %602 = vector.broadcast %cst_473 : f32 to vector<16x1xf32>
    %603 = arith.mulf %601, %602 : vector<16x1xf32>
    %604 = arith.mulf %598, %598 : vector<16x1xf32>
    %605 = arith.subf %603, %604 : vector<16x1xf32>
    %606 = vector.broadcast %598 : vector<16x1xf32> to vector<16x64xf32>
    %607 = arith.subf %590, %606 : vector<16x64xf32>
    %cst_474 = arith.constant 9.99999974E-6 : f32
    %608 = vector.broadcast %cst_474 : f32 to vector<16x1xf32>
    %609 = arith.addf %605, %608 : vector<16x1xf32>
    %610 = math.rsqrt %609 : vector<16x1xf32>
    %611 = vector.broadcast %610 : vector<16x1xf32> to vector<16x64xf32>
    %612 = arith.mulf %607, %611 : vector<16x64xf32>
    %613 = vector.broadcast %592 : vector<1x64xf32> to vector<16x64xf32>
    %614 = arith.mulf %612, %613 : vector<16x64xf32>
    %615 = vector.broadcast %594 : vector<1x64xf32> to vector<16x64xf32>
    %616 = arith.addf %614, %615 : vector<16x64xf32>
    %c0_475 = arith.constant 0 : index
    %c0_476 = arith.constant 0 : index
    %617 = vector.load %arg16[%c0_475, %c0_476] : memref<1x64xf32, #tpu.memory_space<vmem>>, vector<1x64xf32>
    %cst_477 = arith.constant dense<0.000000e+00> : vector<1x16xf32>
    %618 = tpu.matmul %617, %616, %cst_477 {dimension_numbers = #tpu.dot_dimension_numbers<[1], [1], [0], [0], [0, 0, 1, 0], [], []>} : vector<1x64xf32>, vector<16x64xf32>, vector<1x16xf32> -> vector<1x16xf32>
    %c0_478 = arith.constant 0 : index
    %c0_479 = arith.constant 0 : index
    %619 = vector.load %arg17[%c0_478, %c0_479] : memref<1x1xf32, #tpu.memory_space<vmem>>, vector<1x1xf32>
    %620 = vector.broadcast %619 : vector<1x1xf32> to vector<1x16xf32>
    %621 = arith.addf %618, %620 : vector<1x16xf32>
    %c0_480 = arith.constant 0 : index
    %c0_481 = arith.constant 0 : index
    %c0_482 = arith.constant 0 : index
    %622 = vector.load %arg18[%c0_480, %c0_481, %c0_482] : memref<1x1x16xf32, #tpu.memory_space<vmem>>, vector<1x1x16xf32>
    %623 = vector.shape_cast %622 : vector<1x1x16xf32> to vector<1x16xf32>
    %624 = vector.shape_cast %621 : vector<1x16xf32> to vector<1x1x16xf32>
    tpu.vector_store %arg18[%c0_480, %c0_481, %c0_482], %624 {strides = array<i32>} : memref<1x1x16xf32, #tpu.memory_space<vmem>>, vector<1x1x16xf32>,
    return
  }
  func.func @transform_0(%arg0: i32) -> (i32, i32, i32) {
    %c0_i32 = arith.constant 0 : i32
    %c0_i32_0 = arith.constant 0 : i32
    %c0_i32_1 = arith.constant 0 : i32
    return %arg0, %c0_i32, %c0_i32_0 : i32, i32, i32
  }
  func.func @transform_1(%arg0: i32) -> (i32, i32) {
    %c0_i32 = arith.constant 0 : i32
    %c0_i32_0 = arith.constant 0 : i32
    %c0_i32_1 = arith.constant 0 : i32
    return %c0_i32, %c0_i32_0 : i32, i32
  }
  func.func @transform_2(%arg0: i32) -> (i32, i32) {
    %c0_i32 = arith.constant 0 : i32
    %c0_i32_0 = arith.constant 0 : i32
    %c0_i32_1 = arith.constant 0 : i32
    return %c0_i32, %c0_i32_0 : i32, i32
  }
  func.func @transform_3(%arg0: i32) -> (i32, i32, i32) {
    %c0_i32 = arith.constant 0 : i32
    %c0_i32_0 = arith.constant 0 : i32
    %c0_i32_1 = arith.constant 0 : i32
    %c0_i32_2 = arith.constant 0 : i32
    return %c0_i32, %c0_i32_0, %c0_i32_1 : i32, i32, i32
  }
  func.func @transform_4(%arg0: i32) -> (i32, i32, i32) {
    %c0_i32 = arith.constant 0 : i32
    %c0_i32_0 = arith.constant 0 : i32
    %c0_i32_1 = arith.constant 0 : i32
    %c0_i32_2 = arith.constant 0 : i32
    return %c0_i32, %c0_i32_0, %c0_i32_1 : i32, i32, i32
  }
  func.func @transform_5(%arg0: i32) -> (i32, i32, i32) {
    %c0_i32 = arith.constant 0 : i32
    %c0_i32_0 = arith.constant 0 : i32
    %c0_i32_1 = arith.constant 0 : i32
    %c0_i32_2 = arith.constant 0 : i32
    return %c0_i32, %c0_i32_0, %c0_i32_1 : i32, i32, i32
  }
  func.func @transform_6(%arg0: i32) -> (i32, i32, i32) {
    %c0_i32 = arith.constant 0 : i32
    %c0_i32_0 = arith.constant 0 : i32
    %c0_i32_1 = arith.constant 0 : i32
    %c0_i32_2 = arith.constant 0 : i32
    return %c0_i32, %c0_i32_0, %c0_i32_1 : i32, i32, i32
  }
  func.func @transform_7(%arg0: i32) -> (i32, i32, i32) {
    %c0_i32 = arith.constant 0 : i32
    %c0_i32_0 = arith.constant 0 : i32
    %c0_i32_1 = arith.constant 0 : i32
    %c0_i32_2 = arith.constant 0 : i32
    return %c0_i32, %c0_i32_0, %c0_i32_1 : i32, i32, i32
  }
  func.func @transform_8(%arg0: i32) -> (i32, i32, i32) {
    %c0_i32 = arith.constant 0 : i32
    %c0_i32_0 = arith.constant 0 : i32
    %c0_i32_1 = arith.constant 0 : i32
    %c0_i32_2 = arith.constant 0 : i32
    return %c0_i32, %c0_i32_0, %c0_i32_1 : i32, i32, i32
  }
  func.func @transform_9(%arg0: i32) -> (i32, i32, i32) {
    %c0_i32 = arith.constant 0 : i32
    %c0_i32_0 = arith.constant 0 : i32
    %c0_i32_1 = arith.constant 0 : i32
    %c0_i32_2 = arith.constant 0 : i32
    return %c0_i32, %c0_i32_0, %c0_i32_1 : i32, i32, i32
  }
  func.func @transform_10(%arg0: i32) -> (i32, i32, i32) {
    %c0_i32 = arith.constant 0 : i32
    %c0_i32_0 = arith.constant 0 : i32
    %c0_i32_1 = arith.constant 0 : i32
    %c0_i32_2 = arith.constant 0 : i32
    return %c0_i32, %c0_i32_0, %c0_i32_1 : i32, i32, i32
  }
  func.func @transform_11(%arg0: i32) -> (i32, i32, i32) {
    %c0_i32 = arith.constant 0 : i32
    %c0_i32_0 = arith.constant 0 : i32
    %c0_i32_1 = arith.constant 0 : i32
    %c0_i32_2 = arith.constant 0 : i32
    return %c0_i32, %c0_i32_0, %c0_i32_1 : i32, i32, i32
  }
  func.func @transform_12(%arg0: i32) -> (i32, i32, i32) {
    %c0_i32 = arith.constant 0 : i32
    %c0_i32_0 = arith.constant 0 : i32
    %c0_i32_1 = arith.constant 0 : i32
    %c0_i32_2 = arith.constant 0 : i32
    return %c0_i32, %c0_i32_0, %c0_i32_1 : i32, i32, i32
  }
  func.func @transform_13(%arg0: i32) -> (i32, i32, i32) {
    %c0_i32 = arith.constant 0 : i32
    %c0_i32_0 = arith.constant 0 : i32
    %c0_i32_1 = arith.constant 0 : i32
    %c0_i32_2 = arith.constant 0 : i32
    return %c0_i32, %c0_i32_0, %c0_i32_1 : i32, i32, i32
  }
  func.func @transform_14(%arg0: i32) -> (i32, i32, i32) {
    %c0_i32 = arith.constant 0 : i32
    %c0_i32_0 = arith.constant 0 : i32
    %c0_i32_1 = arith.constant 0 : i32
    %c0_i32_2 = arith.constant 0 : i32
    return %c0_i32, %c0_i32_0, %c0_i32_1 : i32, i32, i32
  }
  func.func @transform_15(%arg0: i32) -> (i32, i32) {
    %c0_i32 = arith.constant 0 : i32
    %c0_i32_0 = arith.constant 0 : i32
    %c0_i32_1 = arith.constant 0 : i32
    return %c0_i32, %c0_i32_0 : i32, i32
  }
  func.func @transform_16(%arg0: i32) -> (i32, i32) {
    %c0_i32 = arith.constant 0 : i32
    %c0_i32_0 = arith.constant 0 : i32
    %c0_i32_1 = arith.constant 0 : i32
    return %c0_i32, %c0_i32_0 : i32, i32
  }
  func.func @transform_17(%arg0: i32) -> (i32, i32, i32) {
    %c0_i32 = arith.constant 0 : i32
    %c0_i32_0 = arith.constant 0 : i32
    %c0_i32_1 = arith.constant 0 : i32
    return %arg0, %c0_i32, %c0_i32_0 : i32, i32, i32
  }
}

</mosaic_0001>

<bundles_post_ra>
// kernel: transformer_forward.1
= control target key start
LH: loop header
LB: loop body
LE: loop exit
PB: predicated region body
PF: predicated region fallthrough
CT: control target
= control target key end

     0   :  { %v4659_v0 = vmov 0   ;;  %vm104_vm0 = vcmask 523264   ;;  %s4660_s24 = smov 48   ;;  %s4661_s25 = smov 64   ;;  %vm168_vm1 = vcmask 130048   ;;  %vm220_vm2 = vcmask 64512   ;;  %s6380_s0 = inlined_call_operand.vmem [shape: f32[2,8,1], index: 0, kind: input, shape index: {}]   ;;  %s6381_s3 = inlined_call_operand.vmem [shape: f32[4,64,192], index: 3, kind: input, shape index: {}]   ;;  %s6382_s1 = inlined_call_operand.vmem [shape: f32[1,64], index: 1, kind: input, shape index: {}]   ;;  %s6383_s2 = inlined_call_operand.vmem [shape: f32[1,64], index: 2, kind: input, shape index: {}]   ;;  %s6384_s4 = inlined_call_operand.vmem [shape: f32[4,1,192], index: 4, kind: input, shape index: {}]   ;;  %s6385_s6 = inlined_call_operand.vmem [shape: f32[4,1,64], index: 6, kind: input, shape index: {}]   ;;  %s6386_s5 = inlined_call_operand.vmem [shape: f32[4,64,64], index: 5, kind: input, shape index: {}]   ;;  %s6387_s11 = inlined_call_operand.vmem [shape: f32[4,1,64], index: 11, kind: input, shape index: {}]   ;;  %s6388_s12 = inlined_call_operand.vmem [shape: f32[4,1,64], index: 12, kind: input, shape index: {}]   ;;  %s6389_s7 = inlined_call_operand.vmem [shape: f32[4,64,256], index: 7, kind: input, shape index: {}]   ;;  %s6390_s9 = inlined_call_operand.vmem [shape: f32[4,256,64], index: 9, kind: input, shape index: {}]   ;;  %s6391_s10 = inlined_call_operand.vmem [shape: f32[4,1,64], index: 10, kind: input, shape index: {}]   ;;  %s6392_s8 = inlined_call_operand.vmem [shape: f32[4,1,256], index: 8, kind: input, shape index: {}]   ;;  %s6393_s13 = inlined_call_operand.vmem [shape: f32[4,1,64], index: 13, kind: input, shape index: {}]   ;;  %s6394_s14 = inlined_call_operand.vmem [shape: f32[4,1,64], index: 14, kind: input, shape index: {}]   ;;  %s6395_s16 = inlined_call_operand.<no memory space> [shape: f32[1,1], index: 16, kind: input, shape index: {}]   ;;  %s6396_s15 = inlined_call_operand.vmem [shape: f32[1,64], index: 15, kind: input, shape index: {}]   ;;  %s6397_s17 = inlined_call_operand.vmem [shape: f32[1,1,16], index: 17, kind: output, shape index: {}]  }
   0x1   :  { %6406 = sst [smem:[#allocation5_spill]] %s6380_s0  ;;  %4462 = vset.pattern.permute.xlu0 %v4659_v0  ;;  %v4473_v19 = vld [vmem:[%s6382_s1] ss:$0 sm:$0xff]  ;;  %s6402_s27 = smov 96   ;;  %vm437_vm3 = vcmask 261248   ;;  %vm586_vm4 = vcmask 392448  }
   0x2   :  { %6407 = sst [smem:[#allocation6_spill]] %s6381_s3  ;;  %v4474_v20 = vld [vmem:[%s6383_s2] ss:$0 sm:$0xff]  ;;  %s4664_s28 = smov 32   ;;  %vm735_vm5 = vcmask 523648  }
   0x3   :  { %s6408_s26 = sld [smem:[#allocation5_spill]]  ;;  %v98_v27 = vld [vmem:[%s6384_s4] sm:$0x3]  ;;  %s6404_s0 = smov 16  }
   0x4   :  { %s6409_s29 = sld [smem:[#allocation6_spill]]  ;;  %v101_v28 = vperm.slane %v98_v27, 1  ;;  %v100_v32 = vperm.slane %v98_v27, 0  ;;  %s6400_s30 = smov 80  }
   0x5   :  { %s6410_s18 = smov 80   ;;  %s6411_s19 = smov 96  }
   0x9   :  { %v58_v1 = vld [vmem:[%s6408_s26] sm:$0xff]  ;;  %v59_v10 = vld [vmem:[%s6408_s26 + $0x8] sm:$0xff]  ;;  %s4662_s26 = smov 112  }
   0xa   :  { %v96_v2 = vld [vmem:[%s6409_s29 + $0x70] sm:$0xff]  ;;  %63 = vperm.xlu0 %4462, %v58_v1   ;;  %v97_v3 = vld [vmem:[%s6409_s29 + $0x78] sm:$0xff]  ;;  %v94_v4 = vld [vmem:[%s6409_s29 + $0x60] sm:$0xff] }
   0xb   :  { %119 = vmatpush.msra.mxu0 %v96_v2  ;;  %v95_v5 = vld [vmem:[%s6409_s29 + $0x68] sm:$0xff]  ;;  %142 = vmatpush.msra.mxu1 %v97_v3  ;;  %v92_v6 = vld [vmem:[%s6409_s29 + $0x50] sm:$0xff]  ;;  %v93_v7 = vld [vmem:[%s6409_s29 + $0x58] sm:$0xff] }
   0xc   :  { %v90_v8 = vld [vmem:[%s6409_s29 + $0x40] sm:$0xff]  ;;  %v91_v9 = vld [vmem:[%s6409_s29 + $0x48] sm:$0xff]  ;;  %v88_v11 = vld [vmem:[%s6409_s29 + $0x30] sm:$0xff] }
   0xd   :  { %120 = vmatpush.msra.mxu0 %v94_v4  ;;  %143 = vmatpush.msra.mxu1 %v95_v5  ;;  %v89_v12 = vld [vmem:[%s6409_s29 + $0x38] sm:$0xff]  ;;  %v86_v13 = vld [vmem:[%s6409_s29 + $0x20] sm:$0xff]  ;;  %v87_v14 = vld [vmem:[%s6409_s29 + $0x28] sm:$0xff] }
   0xe   :  { %v84_v15 = vld [vmem:[%s6409_s29 + $0x10] sm:$0xff]  ;;  %v85_v16 = vld [vmem:[%s6409_s29 + $0x18] sm:$0xff]  ;;  %v82_v17 = vld [vmem:[%s6409_s29] sm:$0xff] }
   0xf   :  { %121 = vmatpush.msra.mxu0 %v92_v6  ;;  %144 = vmatpush.msra.mxu1 %v93_v7  ;;  %v83_v18 = vld [vmem:[%s6409_s29 + $0x8] sm:$0xff] }
  0x11   :  { %122 = vmatpush.msra.mxu0 %v90_v8  ;;  %145 = vmatpush.msra.mxu1 %v91_v9 }
  0x12   :  { %68 = vperm.xlu0 %4462, %v59_v10  }
  0x13   :  { %123 = vmatpush.msra.mxu0 %v88_v11  ;;  %146 = vmatpush.msra.mxu1 %v89_v12 }
  0x15   :  { %124 = vmatpush.msra.mxu0 %v86_v13  ;;  %147 = vmatpush.msra.mxu1 %v87_v14 }
  0x17   :  { %125 = vmatpush.msra.mxu0 %v84_v15  ;;  %148 = vmatpush.msra.mxu1 %v85_v16 }
  0x19   :  { %126 = vmatpush.msra.mxu0 %v82_v17  ;;  %149 = vmatpush.msra.mxu1 %v83_v18 }
  0x7c   :  { %v64_v21 = vpop.permute.xlu0 %63 }
  0x7d   :  { %v74_v22 = vmul.f32 %v4473_v19, %v64_v21 }
  0x7f   :  { %v4817_v23 = vadd.f32 %v4474_v20, %v74_v22 }
  0x81   :  { %4075 = vmatmul.msk.f32.vlgmr.msra.gmra.mxu0 %vm104_vm0, %v4817_v23  ;;  %4077 = vmatmul.msk.f32.vlgmr.msra.gmra.mxu1 %vm104_vm0, %v4817_v23 }
  0x84   :  { %v69_v24 = vpop.permute.xlu0 %68 }
  0x85   :  { %v75_v25 = vmul.f32 %v4473_v19, %v69_v24 }
  0x87   :  { %v4823_v26 = vadd.f32 %v4474_v20, %v75_v25 }
  0x89   :  { %4076 = vmatmul.msk.f32.gmra.mxu0 %vm104_vm0, %v4823_v26  ;;  %4078 = vmatmul.msk.f32.gmra.mxu1 %vm104_vm0, %v4823_v26 }
  0xfe   :  { %v128_v29 = vpop.f32.mrf.mxu0  ;;  %v151_v30 = vpop.f32.mrf.mxu1 }
  0xff   :  { %v152_v31 = vadd.f32 %v151_v30, %v101_v28  ;;  %v129_v47 = vadd.f32 %v128_v29, %v100_v32 }
 0x101   :  { %158 = vst.msk [vmem:[#allocation2 + $0x8] sm:$0xff] %vm104_vm0, %v152_v31 }
 0x106   :  { %v131_v33 = vpop.f32.mrf.mxu0  ;;  %v154_v34 = vpop.f32.mrf.mxu1 }
 0x107   :  { %v4833_v35 = vadd.f32 %v131_v33, %v100_v32  ;;  %v155_v36 = vadd.f32 %v154_v34, %v101_v28 }
 0x108   :  { %v4853_v52 = vld [vmem:[#allocation2 + $0x8] sm:$0xff] }
 0x109   :  { %160 = vst.msk [vmem:[#allocation2 + $0x18] sm:$0xff] %vm104_vm0, %v155_v36  ;;  %327 = vrot.lane.b32.xlu0 %v4833_v35, %s4660_s24  ;;  %194 = vrot.lane.b32.xlu1 %v4833_v35, %s4661_s25 }
 0x110   :  { %v4843_v38 = vld [vmem:[#allocation2 + $0x18] sm:$0xff] }
 0x111   :  { %325 = vrot.lane.b32.xlu0 %v4833_v35, %s4662_s26 }
 0x17b   :  { %v195_v37 = vpop.permute.xlu1 %194  ;;  %v328_v39 = vpop.permute.xlu0 %327 }
 0x17c   :  { %4081 = vmatpush.xpose.msk.msra.mxu3 %vm168_vm1, %v195_v37 }
 0x17f   :  { %4082 = vmatmul.msk.f32.vlgmr.msra.gmra.mxu3 %vm168_vm1, %v4833_v35 }
 0x180   :  { %284 = vmatpush.msrb.mxu3 %v4843_v38 }
 0x182   :  { %4087 = vmatpush.xpose.msk.msra.mxu3 %vm168_vm1, %v328_v39 }
 0x183   :  { %v326_v53 = vpop.permute.xlu0 %325 }
 0x202   :  { %v217_v40 = vpop.f32.mrf.mxu3 }
 0x203   :  { %v224_v41 = vsel %vm220_vm2, %v217_v40, -inf }
 0x204   :  { %225 = vmax.xlane.f32.xlu1 %v224_v41 }
 0x277   :  { %v226_v42 = vpop.xlane.xlu1 %225 }
 0x278   :  { %v228_v43 = vsub.f32 %v217_v40, %v226_v42 }
 0x27a   :  { %v231_v44 = vmul.f32 1.442695, %v228_v43 }
 0x27c   :  { %4499 = vpow2.f32 %v231_v44 }
 0x282   :  { %v4500_v45 = vpop.eup %4499 }
 0x283   :  { %v236_v46 = vsel %vm220_vm2, %v4500_v45, 0.0 }
 0x284   :  { %237 = vadd.xlane.f32.xlu2 %v236_v46 }
 0x29c   :  { %166 = vrot.lane.b32.xlu2 %v129_v47, %s4661_s25 }
 0x2f7   :  { %v238_v48 = vpop.xlane.xlu2 %237 }
 0x2f8   :  { %4501 = vrcp.f32 %v238_v48 }
 0x2fe   :  { %v4502_v49 = vpop.eup %4501 }
 0x2ff   :  { %v167_v50 = vpop.permute.xlu2 %166  ;;  %v242_v51 = vmul.f32 %v4502_v49, %v4500_v45 }
 0x300   :  { %4079 = vmatpush.xpose.msk.msra.mxu2 %vm168_vm1, %v167_v50 }
 0x301   :  { %4084 = vmatmul.msk.f32.vlgmr.msrb.gmra.mxu3 %vm220_vm2, %v242_v51 }
 0x303   :  { %4080 = vmatmul.msk.f32.vlgmr.msra.gmra.mxu2 %vm168_vm1, %v129_v47 }
 0x304   :  { %261 = vmatpush.msrb.mxu2 %v4853_v52 }
 0x309   :  { %4088 = vmatmul.msk.f32.vlgmr.msra.gmra.mxu3 %vm168_vm1, %v326_v53 }
 0x384   :  { %v286_v54 = vpop.f32.mrf.mxu3 }
 0x385   :  { %290 = vst.msk [vmem:[#allocation3 + $0x8] sm:$0xff] %vm168_vm1, %v286_v54 }
 0x386   :  { %v190_v55 = vpop.f32.mrf.mxu2 }
 0x387   :  { %v221_v56 = vsel %vm220_vm2, %v190_v55, -inf }
 0x388   :  { %222 = vmax.xlane.f32.xlu0 %v221_v56 }
 0x38c   :  { %v350_v57 = vpop.f32.mrf.mxu3 }
 0x38d   :  { %v356_v58 = vsel %vm220_vm2, %v350_v57, -inf }
 0x38e   :  { %357 = vmax.xlane.f32.xlu2 %v356_v58 }
 0x39c   :  { %296 = vrot.lane.b32.xlu0 %v129_v47, %s4662_s26 }
 0x3a4   :  { %445 = vrot.lane.b32.xlu0 %v129_v47, %s6402_s27 }
 0x3a6   :  { %403 = vrot.lane.b32.xlu2 %v4843_v38, %s4662_s26 }
 0x3ac   :  { %476 = vrot.lane.b32.xlu0 %v4833_v35, %s4664_s28 }
 0x3ae   :  { %596 = vrot.lane.b32.xlu2 %v129_v47, %s6404_s0 }
 0x3b4   :  { %623 = vrot.lane.b32.xlu0 %v4833_v35, %s6400_s30 }
 0x3b6   :  { %474 = vrot.lane.b32.xlu2 %v4833_v35, %s6402_s27 }
 0x3fb   :  { %v223_v59 = vpop.xlane.xlu0 %222 }
 0x3fc   :  { %v227_v60 = vsub.f32 %v190_v55, %v223_v59 }
 0x3fe   :  { %v229_v61 = vmul.f32 1.442695, %v227_v60 }
 0x400   :  { %4503 = vpow2.f32 %v229_v61 }
 0x401   :  { %v358_v62 = vpop.xlane.xlu2 %357 }
 0x402   :  { %v360_v7 = vsub.f32 %v350_v57, %v358_v62 }
 0x404   :  { %v363_v8 = vmul.f32 1.442695, %v360_v7 }
 0x406   :  { %v4504_v63 = vpop.eup %4503  ;;  %4505 = vpow2.f32 %v363_v8 }
 0x407   :  { %v233_v0 = vsel %vm220_vm2, %v4504_v63, 0.0 }
 0x408   :  { %234 = vadd.xlane.f32.xlu1 %v233_v0 }
 0x409   :  { %v404_v1 = vpop.permute.xlu2 %403 }
 0x40a   :  { %424 = vmatpush.msrb.mxu3 %v404_v1 }
 0x40c   :  { %v4506_v9 = vpop.eup %4505 }
 0x40d   :  { %v368_v10 = vsel %vm220_vm2, %v4506_v9, 0.0 }
 0x40e   :  { %v297_v2 = vpop.permute.xlu0 %296 }
 0x411   :  { %v597_v3 = vpop.permute.xlu2 %596 }
 0x412   :  { %4097 = vmatpush.xpose.msk.msrb.mxu0 %vm168_vm1, %v597_v3 }
 0x416   :  { %v446_v4 = vpop.permute.xlu0 %445 }
 0x419   :  { %v475_v6 = vpop.permute.xlu2 %474 }
 0x41e   :  { %v477_v5 = vpop.permute.xlu0 %476 }
 0x41f   :  { %4093 = vmatpush.xpose.msk.msrb.mxu1 %vm168_vm1, %v477_v5 }
 0x421   :  { %298 = vrot.lane.b32.xlu1 %v129_v47, %s4660_s24 }
 0x422   :  { %4094 = vmatmul.msk.f32.vlgmr.msrb.gmra.mxu1 %vm168_vm1, %v475_v6 }
 0x426   :  { %v624_v21 = vpop.permute.xlu0 %623 }
 0x429   :  { %447 = vrot.lane.b32.xlu1 %v129_v47, %s4664_s28 }
 0x453   :  { %369 = vadd.xlane.f32.xlu1 %v368_v10 }
 0x46c   :  { %594 = vrot.lane.b32.xlu1 %v129_v47, %s6400_s30 }
 0x474   :  { %625 = vrot.lane.b32.xlu1 %v4833_v35, %s6404_s0 }
 0x47b   :  { %v235_v11 = vpop.xlane.xlu1 %234 }
 0x47c   :  { %4507 = vrcp.f32 %v235_v11 }
 0x482   :  { %v4508_v12 = vpop.eup %4507 }
 0x483   :  { %v241_v13 = vmul.f32 %v4508_v12, %v4504_v63 }
 0x485   :  { %4083 = vmatmul.msk.f32.vlgmr.msrb.gmra.mxu2 %vm220_vm2, %v241_v13 }
 0x493   :  { %v299_v14 = vpop.permute.xlu1 %298 }
 0x494   :  { %4085 = vmatpush.xpose.msk.msra.mxu2 %vm168_vm1, %v299_v14 }
 0x497   :  { %4086 = vmatmul.msk.f32.vlgmr.msra.gmra.mxu2 %vm168_vm1, %v297_v2 }
 0x49b   :  { %v448_v15 = vpop.permute.xlu1 %447 }
 0x49c   :  { %4091 = vmatpush.xpose.msk.msra.mxu3 %vm168_vm1, %v448_v15 }
 0x49f   :  { %v499_v35 = vpop.f32.mrf.mxu1 }
 0x4a0   :  { %v505_v37 = vsel %vm220_vm2, %v499_v35, -inf }
 0x4c6   :  { %v370_v16 = vpop.xlane.xlu1 %369 }
 0x4c7   :  { %4509 = vrcp.f32 %v370_v16 }
 0x4cd   :  { %v4510_v17 = vpop.eup %4509 }
 0x4ce   :  { %v374_v18 = vmul.f32 %v4510_v17, %v4506_v9 }
 0x4d0   :  { %4090 = vmatmul.msk.f32.vlgmr.msrb.gmra.mxu3 %vm220_vm2, %v374_v18 }
 0x4d8   :  { %4092 = vmatmul.msk.f32.vlgmr.msra.gmra.mxu3 %vm168_vm1, %v446_v4 }
 0x4de   :  { %v595_v19 = vpop.permute.xlu1 %594 }
 0x4df   :  { %4098 = vmatmul.msk.f32.vlgmr.msrb.gmra.mxu0 %vm168_vm1, %v595_v19 }
 0x4e6   :  { %v626_v20 = vpop.permute.xlu1 %625 }
 0x4e7   :  { %4099 = vmatpush.xpose.msk.msra.mxu1 %vm168_vm1, %v626_v20 }
 0x4ea   :  { %4100 = vmatmul.msk.f32.vlgmr.msra.gmra.mxu1 %vm168_vm1, %v624_v21  ;;  %v747_v21 = vld [vmem:[%s6386_s5 + $0x38] sm:$0xff] }
 0x4eb   :  { %766 = vmatpush.msra.mxu0 %v747_v21  ;;  %v933_v21 = vld [vmem:[%s6390_s9 + $0x60] sm:$0xff] }
 0x508   :  { %v263_v22 = vpop.f32.mrf.mxu2 }
 0x509   :  { %289 = vst.msk [vmem:[#allocation3] sm:$0xff] %vm168_vm1, %v263_v22  ;;  %v746_v22 = vld [vmem:[%s6386_s5 + $0x30] sm:$0xff] }
 0x50a   :  { %767 = vmatpush.msra.mxu0 %v746_v22  ;;  %v932_v22 = vld [vmem:[%s6390_s9 + $0x58] sm:$0xff] }
 0x51a   :  { %v321_v24 = vpop.f32.mrf.mxu2 }
 0x51b   :  { %v353_v25 = vsel %vm220_vm2, %v321_v24, -inf }
 0x51c   :  { %354 = vmax.xlane.f32.xlu2 %v353_v25  ;;  %v744_v25 = vld [vmem:[%s6386_s5 + $0x20] sm:$0xff] }
 0x553   :  { %v4894_v27 = vpop.f32.mrf.mxu3 }
 0x55b   :  { %v470_v28 = vpop.f32.mrf.mxu3 }
 0x55c   :  { %v619_v29 = vpop.f32.mrf.mxu0  ;;  %v502_v30 = vsel %vm220_vm2, %v470_v28, -inf }
 0x55d   :  { %503 = vmax.xlane.f32.xlu1 %v502_v30  ;;  %v651_v31 = vsel %vm220_vm2, %v619_v29, -inf  ;;  %v740_v30 = vld [vmem:[%s6386_s5] sm:$0xff] }
 0x55e   :  { %652 = vmax.xlane.f32.xlu0 %v651_v31 }
 0x567   :  { %v648_v59 = vpop.f32.mrf.mxu1 }
 0x568   :  { %v654_v61 = vsel %vm220_vm2, %v648_v59, -inf }
 0x572   :  { %376 = vrot.lane.b32.xlu0 %v4853_v52, %s4662_s26 }
 0x58f   :  { %v355_v32 = vpop.xlane.xlu2 %354 }
 0x590   :  { %v359_v33 = vsub.f32 %v321_v24, %v355_v32  ;;  %v745_v24 = vld [vmem:[%s6386_s5 + $0x28] sm:$0xff] }
 0x591   :  { %768 = vmatpush.msra.mxu0 %v745_v24  ;;  %v931_v24 = vld [vmem:[%s6390_s9 + $0x50] sm:$0xff] }
 0x592   :  { %v361_v34 = vmul.f32 1.442695, %v359_v33 }
 0x593   :  { %769 = vmatpush.msra.mxu0 %v744_v25  ;;  %v930_v25 = vld [vmem:[%s6390_s9 + $0x48] sm:$0xff] }
 0x594   :  { %4511 = vpow2.f32 %v361_v34 }
 0x59a   :  { %v4512_v36 = vpop.eup %4511 }
 0x59b   :  { %v365_v39 = vsel %vm220_vm2, %v4512_v36, 0.0 }
 0x59c   :  { %506 = vmax.xlane.f32.xlu0 %v505_v37  ;;  %366 = vadd.xlane.f32.xlu2 %v365_v39  ;;  %v4959_v37 = vld [vmem:[%s6385_s6] ss:$0 sm:$0xff] }
 0x5d0   :  { %v504_v40 = vpop.xlane.xlu1 %503 }
 0x5d1   :  { %v508_v41 = vsub.f32 %v470_v28, %v504_v40  ;;  %v653_v42 = vpop.xlane.xlu0 %652  ;;  %v742_v28 = vld [vmem:[%s6386_s5 + $0x10] sm:$0xff] }
 0x5d2   :  { %v657_v43 = vsub.f32 %v619_v29, %v653_v42  ;;  %v741_v29 = vld [vmem:[%s6386_s5 + $0x8] sm:$0xff] }
 0x5d3   :  { %v510_v44 = vmul.f32 1.442695, %v508_v41 }
 0x5d4   :  { %v659_v45 = vmul.f32 1.442695, %v657_v43 }
 0x5d5   :  { %4513 = vpow2.f32 %v510_v44 }
 0x5d6   :  { %4515 = vpow2.f32 %v659_v45 }
 0x5db   :  { %v4514_v46 = vpop.eup %4513 }
 0x5dc   :  { %v4516_v47 = vpop.eup %4515  ;;  %v514_v48 = vsel %vm220_vm2, %v4514_v46, 0.0 }
 0x5dd   :  { %515 = vadd.xlane.f32.xlu1 %v514_v48  ;;  %v663_v49 = vsel %vm220_vm2, %v4516_v47, 0.0  ;;  %v858_v48 = vld [vmem:[%s6389_s7 + $0x78] sm:$0xff] }
 0x5de   :  { %664 = vadd.xlane.f32.xlu2 %v663_v49  ;;  %v855_v49 = vld [vmem:[%s6389_s7 + $0x60] sm:$0xff] }
 0x5e4   :  { %v377_v50 = vpop.permute.xlu0 %376 }
 0x5e5   :  { %397 = vmatpush.msrb.mxu2 %v377_v50  ;;  %v856_v50 = vld [vmem:[%s6389_s7 + $0x68] sm:$0xff] }
 0x5f6   :  { %525 = vrot.lane.b32.xlu1 %v4853_v52, %s6402_s27  ;;  %674 = vrot.lane.b32.xlu2 %v4853_v52, %s6400_s30 }
 0x60f   :  { %v507_v51 = vpop.xlane.xlu0 %506  ;;  %v367_v53 = vpop.xlane.xlu2 %366 }
 0x610   :  { %v509_v54 = vsub.f32 %v499_v35, %v507_v51  ;;  %4517 = vrcp.f32 %v367_v53  ;;  %v853_v51 = vld [vmem:[%s6389_s7 + $0x50] sm:$0xff]  ;;  %v854_v53 = vld [vmem:[%s6389_s7 + $0x58] sm:$0xff] }
 0x612   :  { %v512_v55 = vmul.f32 1.442695, %v509_v54  ;;  %v851_v54 = vld [vmem:[%s6389_s7 + $0x40] sm:$0xff] }
 0x614   :  { %4519 = vpow2.f32 %v512_v55  ;;  %v852_v55 = vld [vmem:[%s6389_s7 + $0x48] sm:$0xff] }
 0x616   :  { %v4518_v56 = vpop.eup %4517 }
 0x617   :  { %v373_v57 = vmul.f32 %v4518_v56, %v4512_v36  ;;  %v849_v56 = vld [vmem:[%s6389_s7 + $0x30] sm:$0xff] }
 0x619   :  { %4089 = vmatmul.msk.f32.vlgmr.msrb.gmra.mxu2 %vm220_vm2, %v373_v57  ;;  %v850_v57 = vld [vmem:[%s6389_s7 + $0x38] sm:$0xff] }
 0x61a   :  { %v4520_v58 = vpop.eup %4519 }
 0x61b   :  { %v517_v60 = vsel %vm220_vm2, %v4520_v58, 0.0 }
 0x61f   :  { %518 = vadd.xlane.f32.xlu2 %v517_v60  ;;  %v845_v60 = vld [vmem:[%s6389_s7 + $0x10] sm:$0xff] }
 0x620   :  { %655 = vmax.xlane.f32.xlu1 %v654_v61  ;;  %v846_v61 = vld [vmem:[%s6389_s7 + $0x18] sm:$0xff] }
 0x639   :  { %701 = vrot.lane.b32.xlu1 %v4843_v38, %s6400_s30 }
 0x650   :  { %v516_v52 = vpop.xlane.xlu1 %515 }
 0x651   :  { %4521 = vrcp.f32 %v516_v52  ;;  %v665_v62 = vpop.xlane.xlu2 %664  ;;  %v843_v52 = vld [vmem:[%s6389_s7] sm:$0xff] }
 0x652   :  { %4523 = vrcp.f32 %v665_v62  ;;  %v844_v62 = vld [vmem:[%s6389_s7 + $0x8] sm:$0xff] }
 0x657   :  { %v4522_v63 = vpop.eup %4521 }
 0x658   :  { %v522_v0 = vmul.f32 %v4522_v63, %v4514_v46  ;;  %v4524_v3 = vpop.eup %4523 }
 0x659   :  { %v675_v2 = vpop.permute.xlu2 %674  ;;  %v671_v4 = vmul.f32 %v4524_v3, %v4516_v47 }
 0x668   :  { %v526_v1 = vpop.permute.xlu1 %525 }
 0x669   :  { %546 = vmatpush.msra.mxu2 %v526_v1 }
 0x66a   :  { %4095 = vmatmul.msk.f32.vlgmr.msra.gmra.mxu2 %vm220_vm2, %v522_v0 }
 0x66b   :  { %695 = vmatpush.msrb.mxu2 %v675_v2 }
 0x672   :  { %4101 = vmatmul.msk.f32.vlgmr.msrb.gmra.mxu2 %vm220_vm2, %v671_v4 }
 0x692   :  { %v519_v12 = vpop.xlane.xlu2 %518 }
 0x693   :  { %v656_v5 = vpop.xlane.xlu1 %655 }
 0x694   :  { %v658_v6 = vsub.f32 %v648_v59, %v656_v5  ;;  %v848_v59 = vld [vmem:[%s6389_s7 + $0x28] sm:$0xff] }
 0x696   :  { %v661_v7 = vmul.f32 1.442695, %v658_v6 }
 0x698   :  { %4525 = vpow2.f32 %v661_v7 }
 0x699   :  { %4527 = vrcp.f32 %v519_v12 }
 0x69c   :  { %v399_v8 = vpop.f32.mrf.mxu2 }
 0x69d   :  { %431 = vrot.lane.b32.xlu2 %v399_v8, %s6404_s0 }
 0x69e   :  { %v4526_v9 = vpop.eup %4525 }
 0x69f   :  { %v666_v10 = vsel %vm220_vm2, %v4526_v9, 0.0  ;;  %v4528_v16 = vpop.eup %4527 }
 0x6a0   :  { %667 = vadd.xlane.f32.xlu0 %v666_v10  ;;  %v523_v17 = vmul.f32 %v4528_v16, %v4520_v58  ;;  %v847_v58 = vld [vmem:[%s6389_s7 + $0x20] sm:$0xff] }
 0x6a1   :  { %v5030_v16 = vld [vmem:[%s6388_s12] ss:$0 sm:$0xff] }
 0x6ab   :  { %v702_v18 = vpop.permute.xlu1 %701 }
 0x6b4   :  { %552 = vrot.lane.b32.xlu0 %v4843_v38, %s6402_s27 }
 0x6ed   :  { %v548_v11 = vpop.f32.mrf.mxu2 }
 0x6ee   :  { %580 = vrot.lane.b32.xlu0 %v548_v11, %s4664_s28 }
 0x6f5   :  { %v697_v13 = vpop.f32.mrf.mxu2 }
 0x6f6   :  { %433 = vrot.lane.b32.xlu0 %v4894_v27, %s6404_s0  ;;  %729 = vrot.lane.b32.xlu1 %v697_v13, %s4660_s24  ;;  %v743_v27 = vld [vmem:[%s6386_s5 + $0x18] sm:$0xff]  ;;  %v5025_v13 = vld [vmem:[%s6387_s11] ss:$0 sm:$0xff] }
 0x6f7   :  { %v432_v14 = vpop.permute.xlu2 %431  ;;  %770 = vmatpush.msra.mxu0 %v743_v27  ;;  %v929_v27 = vld [vmem:[%s6390_s9 + $0x40] sm:$0xff] }
 0x6f8   :  { %438 = vst.msk [vmem:[#allocation3] sm:$0xff] %vm437_vm3, %v432_v14 }
 0x6f9   :  { %771 = vmatpush.msra.mxu0 %v742_v28  ;;  %v928_v28 = vld [vmem:[%s6390_s9 + $0x38] sm:$0xff] }
 0x6fb   :  { %772 = vmatpush.msra.mxu0 %v741_v29  ;;  %v927_v29 = vld [vmem:[%s6390_s9 + $0x30] sm:$0xff] }
 0x6fd   :  { %773 = vmatpush.msra.mxu0 %v740_v30  ;;  %v926_v30 = vld [vmem:[%s6390_s9 + $0x28] sm:$0xff] }
 0x6ff   :  { %902 = vmatpush.msrb.mxu0 %v858_v48  ;;  %v950_v48 = vld [vmem:[%s6390_s9 + $0xe8] sm:$0xff] }
 0x701   :  { %903 = vmatpush.msrb.mxu0 %v856_v50  ;;  %v948_v50 = vld [vmem:[%s6390_s9 + $0xd8] sm:$0xff] }
 0x703   :  { %904 = vmatpush.msrb.mxu0 %v854_v53  ;;  %v946_v53 = vld [vmem:[%s6390_s9 + $0xc8] sm:$0xff] }
 0x705   :  { %905 = vmatpush.msrb.mxu0 %v852_v55  ;;  %v944_v55 = vld [vmem:[%s6390_s9 + $0xb8] sm:$0xff] }
 0x707   :  { %906 = vmatpush.msrb.mxu0 %v850_v57  ;;  %v942_v57 = vld [vmem:[%s6390_s9 + $0xa8] sm:$0xff] }
 0x709   :  { %907 = vmatpush.msrb.mxu0 %v848_v59 }
 0x70b   :  { %908 = vmatpush.msrb.mxu0 %v846_v61  ;;  %v940_v61 = vld [vmem:[%s6390_s9 + $0x98] sm:$0xff] }
 0x70d   :  { %909 = vmatpush.msrb.mxu0 %v844_v62  ;;  %v939_v62 = vld [vmem:[%s6390_s9 + $0x90] sm:$0xff] }
 0x713   :  { %v668_v15 = vpop.xlane.xlu0 %667 }
 0x714   :  { %4529 = vrcp.f32 %v668_v15 }
 0x71a   :  { %v4530_v19 = vpop.eup %4529 }
 0x71b   :  { %v672_v20 = vmul.f32 %v4530_v19, %v4526_v9  ;;  %v935_v19 = vld [vmem:[%s6390_s9 + $0x70] sm:$0xff] }
 0x726   :  { %v553_v38 = vpop.permute.xlu0 %552 }
 0x727   :  { %573 = vmatpush.msrb.mxu3 %v553_v38 }
 0x728   :  { %4096 = vmatmul.msk.f32.vlgmr.msrb.gmra.mxu3 %vm220_vm2, %v523_v17 }
 0x729   :  { %722 = vmatpush.msra.mxu3 %v702_v18  ;;  %v936_v18 = vld [vmem:[%s6390_s9 + $0x78] sm:$0xff] }
 0x72b   :  { %957 = vmatpush.msrb.mxu3 %v936_v18 }
 0x72d   :  { %958 = vmatpush.msrb.mxu3 %v935_v19 }
 0x730   :  { %4102 = vmatmul.msk.f32.vlgmr.msra.gmra.mxu3 %vm220_vm2, %v672_v20  ;;  %v934_v20 = vld [vmem:[%s6390_s9 + $0x68] sm:$0xff] }
 0x731   :  { %959 = vmatpush.msrb.mxu3 %v934_v20 }
 0x733   :  { %960 = vmatpush.msrb.mxu3 %v933_v21 }
 0x735   :  { %961 = vmatpush.msrb.mxu3 %v932_v22 }
 0x737   :  { %962 = vmatpush.msrb.mxu3 %v931_v24 }
 0x739   :  { %963 = vmatpush.msrb.mxu3 %v930_v25 }
 0x73b   :  { %964 = vmatpush.msrb.mxu3 %v929_v27 }
 0x73d   :  { %965 = vmatpush.msrb.mxu3 %v928_v28 }
 0x73f   :  { %966 = vmatpush.msrb.mxu3 %v927_v29 }
 0x741   :  { %967 = vmatpush.msrb.mxu3 %v926_v30 }
 0x760   :  { %v581_v31 = vpop.permute.xlu0 %580 }
 0x761   :  { %587 = vst.msk [vmem:[#allocation3] sm:$0xff] %vm586_vm4, %v581_v31  ;;  %v925_v31 = vld [vmem:[%s6390_s9 + $0x20] sm:$0xff] }
 0x762   :  { %968 = vmatpush.msrb.mxu3 %v925_v31 }
 0x768   :  { %v434_v32 = vpop.permute.xlu0 %433  ;;  %v730_v33 = vpop.permute.xlu1 %729 }
 0x769   :  { %439 = vst.msk [vmem:[#allocation3 + $0x8] sm:$0xff] %vm437_vm3, %v434_v32  ;;  %v924_v32 = vld [vmem:[%s6390_s9 + $0x18] sm:$0xff] }
 0x76a   :  { %736 = vst.msk [vmem:[#allocation3] sm:$0xff] %vm735_vm5, %v730_v33  ;;  %969 = vmatpush.msrb.mxu3 %v924_v32 }
 0x771   :  { %v738_v34 = vld [vmem:[#allocation3] sm:$0xff] }
 0x772   :  { %4103 = vmatmul.msk.f32.vlgmr.msra.gmra.mxu0 %vm104_vm0, %v738_v34 }
 0x7ab   :  { %v575_v35 = vpop.f32.mrf.mxu3 }
 0x7ac   :  { %582 = vrot.lane.b32.xlu2 %v575_v35, %s4664_s28 }
 0x7b3   :  { %v724_v36 = vpop.f32.mrf.mxu3 }
 0x7b4   :  { %731 = vrot.lane.b32.xlu1 %v724_v36, %s4660_s24 }
 0x7ef   :  { %v775_v39 = vpop.f32.mrf.mxu0 }
 0x7f0   :  { %v776_v40 = vadd.f32 %v4959_v37, %v775_v39 }
 0x7f2   :  { %v4963_v41 = vadd.f32 %v776_v40, %v4817_v23  ;;  %v857_v23 = vld [vmem:[%s6389_s7 + $0x70] sm:$0xff] }
 0x7f3   :  { %879 = vmatpush.msrb.mxu1 %v857_v23  ;;  %v951_v23 = vld [vmem:[%s6390_s9 + $0xf0] sm:$0xff] }
 0x7f4   :  { %v785_v42 = vsel %vm104_vm0, %v4963_v41, 0.0  ;;  %v793_v43 = vmul.f32 %v4963_v41, %v4963_v41 }
 0x7f5   :  { %786 = vadd.xlane.f32.xlu0 %v785_v42  ;;  %880 = vmatpush.msrb.mxu1 %v855_v49  ;;  %v5100_v42 = vld [vmem:[%s6392_s8] sm:$0x3] }
 0x7f6   :  { %v795_v44 = vsel %vm104_vm0, %v793_v43, 0.0  ;;  %v861_v43 = vperm.slane %v5100_v42, 0  ;;  %v949_v49 = vld [vmem:[%s6390_s9 + $0xe0] sm:$0xff] }
 0x7f7   :  { %796 = vadd.xlane.f32.xlu2 %v795_v44  ;;  %881 = vmatpush.msrb.mxu1 %v853_v51  ;;  %v947_v51 = vld [vmem:[%s6390_s9 + $0xd0] sm:$0xff] }
 0x7f9   :  { %882 = vmatpush.msrb.mxu1 %v851_v54  ;;  %v945_v54 = vld [vmem:[%s6390_s9 + $0xc0] sm:$0xff] }
 0x7fb   :  { %883 = vmatpush.msrb.mxu1 %v849_v56  ;;  %v943_v56 = vld [vmem:[%s6390_s9 + $0xb0] sm:$0xff] }
 0x7fd   :  { %884 = vmatpush.msrb.mxu1 %v847_v58  ;;  %v941_v58 = vld [vmem:[%s6390_s9 + $0xa0] sm:$0xff] }
 0x7ff   :  { %885 = vmatpush.msrb.mxu1 %v845_v60 }
 0x801   :  { %886 = vmatpush.msrb.mxu1 %v843_v52 }
 0x806   :  { %v583_v45 = vpop.permute.xlu2 %582 }
 0x807   :  { %588 = vst.msk [vmem:[#allocation3 + $0x8] sm:$0xff] %vm586_vm4, %v583_v45 }
 0x826   :  { %v732_v46 = vpop.permute.xlu1 %731 }
 0x827   :  { %737 = vst.msk [vmem:[#allocation3 + $0x8] sm:$0xff] %vm735_vm5, %v732_v46 }
 0x82e   :  { %v739_v47 = vld [vmem:[#allocation3 + $0x8] sm:$0xff] }
 0x82f   :  { %4104 = vmatmul.msk.f32.gmra.mxu0 %vm104_vm0, %v739_v47  ;;  %v952_v47 = vld [vmem:[%s6390_s9 + $0xf8] sm:$0xff] }
 0x830   :  { %980 = vmatpush.msra.mxu0 %v952_v47  ;;  %v4114_v47 = vld [vmem:[%s6409_s29 + $0xa8] sm:$0xff] }
 0x832   :  { %981 = vmatpush.msra.mxu0 %v951_v23  ;;  %v4111_v23 = vld [vmem:[%s6409_s29 + $0x90] sm:$0xff] }
 0x834   :  { %982 = vmatpush.msra.mxu0 %v950_v48  ;;  %v4112_v48 = vld [vmem:[%s6409_s29 + $0x98] sm:$0xff] }
 0x836   :  { %983 = vmatpush.msra.mxu0 %v949_v49  ;;  %v4109_v49 = vld [vmem:[%s6409_s29 + $0x80] sm:$0xff] }
 0x838   :  { %984 = vmatpush.msra.mxu0 %v948_v50  ;;  %v4110_v50 = vld [vmem:[%s6409_s29 + $0x88] sm:$0xff] }
 0x83a   :  { %985 = vmatpush.msra.mxu0 %v947_v51 }
 0x83c   :  { %986 = vmatpush.msra.mxu0 %v946_v53 }
 0x83e   :  { %987 = vmatpush.msra.mxu0 %v945_v54 }
 0x840   :  { %988 = vmatpush.msra.mxu0 %v944_v55 }
 0x842   :  { %989 = vmatpush.msra.mxu0 %v943_v56 }
 0x844   :  { %990 = vmatpush.msra.mxu0 %v942_v57 }
 0x846   :  { %991 = vmatpush.msra.mxu0 %v941_v58 }
 0x848   :  { %992 = vmatpush.msra.mxu0 %v940_v61 }
 0x84a   :  { %993 = vmatpush.msra.mxu0 %v939_v62 }
 0x868   :  { %v787_v63 = vpop.xlane.xlu0 %786 }
 0x869   :  { %v791_v0 = vmul.f32 0.015625, %v787_v63 }
 0x86a   :  { %v797_v1 = vpop.xlane.xlu2 %796 }
 0x86b   :  { %v803_v2 = vmul.f32 %v791_v0, %v791_v0  ;;  %v801_v3 = vmul.f32 0.015625, %v797_v1  ;;  %v807_v12 = vsub.f32 %v4963_v41, %v791_v0  ;;  %v923_v41 = vld [vmem:[%s6390_s9 + $0x10] sm:$0xff]  ;;  %v938_v1 = vld [vmem:[%s6390_s9 + $0x88] sm:$0xff] }
 0x86c   :  { %970 = vmatpush.msrb.mxu3 %v923_v41  ;;  %994 = vmatpush.msra.mxu0 %v938_v1  ;;  %v4122_v41 = vld [vmem:[%s6409_s29 + $0xe8] sm:$0xff] }
 0x86d   :  { %v805_v4 = vsub.f32 %v801_v3, %v803_v2  ;;  %v937_v3 = vld [vmem:[%s6390_s9 + $0x80] sm:$0xff] }
 0x86e   :  { %995 = vmatpush.msra.mxu0 %v937_v3 }
 0x86f   :  { %v809_v5 = vadd.f32 1e-05, %v805_v4 }
 0x871   :  { %4531 = vrsqrt.f32 %v809_v5  ;;  %vm817_vm7 = vweird.f32 %v809_v5 }
 0x877   :  { %v4532_v6 = vpop.eup %4531 }
 0x878   :  { %v812_v7 = vmul.f32 %v4532_v6, %v809_v5  ;;  %vm818_vm6 = vweird.f32 %v4532_v6 }
 0x879   :  { %vm819_vm8 = vmor %vm817_vm7, %vm818_vm6 }
 0x87a   :  { %v813_v8 = vmul.f32 %v4532_v6, %v812_v7 }
 0x87c   :  { %v814_v9 = vmul.f32 0.5, %v813_v8 }
 0x87e   :  { %v815_v10 = vsub.f32 1.5, %v814_v9 }
 0x880   :  { %v816_v11 = vmul.f32 %v4532_v6, %v815_v10 }
 0x882   :  { %v820_v14 = vsel %vm819_vm8, %v4532_v6, %v816_v11 }
 0x883   :  { %v831_v15 = vmul.f32 %v820_v14, %v807_v12 }
 0x885   :  { %v836_v17 = vmul.f32 %v5025_v13, %v831_v15 }
 0x887   :  { %v5034_v38 = vadd.f32 %v5030_v16, %v836_v17  ;;  %v862_v17 = vperm.slane %v5100_v42, 1  ;;  %v4117_v42 = vld [vmem:[%s6409_s29 + $0xc0] sm:$0xff] }
 0x889   :  { %4105 = vmatmul.msk.f32.vlgmr.msrb.gmra.mxu1 %vm104_vm0, %v5034_v38  ;;  %4107 = vmatmul.msk.f32.vlgmr.msrb.gmra.mxu0 %vm104_vm0, %v5034_v38 }
 0x8ac   :  { %v778_v33 = vpop.f32.mrf.mxu0 }
 0x8ad   :  { %v779_v34 = vadd.f32 %v4959_v37, %v778_v33  ;;  %v921_v37 = vld [vmem:[%s6390_s9] sm:$0xff] }
 0x8af   :  { %v5081_v35 = vadd.f32 %v779_v34, %v4823_v26  ;;  %v922_v26 = vld [vmem:[%s6390_s9 + $0x8] sm:$0xff] }
 0x8b0   :  { %971 = vmatpush.msrb.mxu3 %v922_v26  ;;  %v4119_v26 = vld [vmem:[%s6409_s29 + $0xd0] sm:$0xff] }
 0x8b1   :  { %v788_v36 = vsel %vm104_vm0, %v5081_v35, 0.0  ;;  %v794_v39 = vmul.f32 %v5081_v35, %v5081_v35 }
 0x8b2   :  { %789 = vadd.xlane.f32.xlu1 %v788_v36  ;;  %972 = vmatpush.msrb.mxu3 %v921_v37  ;;  %v4120_v37 = vld [vmem:[%s6409_s29 + $0xd8] sm:$0xff] }
 0x8b3   :  { %v798_v40 = vsel %vm104_vm0, %v794_v39, 0.0  ;;  %v4123_v39 = vld [vmem:[%s6409_s29 + $0xf0] sm:$0xff] }
 0x8b4   :  { %799 = vadd.xlane.f32.xlu0 %v798_v40  ;;  %v4124_v40 = vld [vmem:[%s6409_s29 + $0xf8] sm:$0xff]  ;;  %1103 = vmatpush.msra.mxu1 %v4123_v39 }
 0x8b5   :  { %1126 = vmatpush.msra.mxu2 %v4124_v40 }
 0x8b7   :  { %1127 = vmatpush.msra.mxu2 %v4122_v41 }
 0x8b9   :  { %1128 = vmatpush.msra.mxu2 %v4120_v37 }
 0x906   :  { %v888_v44 = vpop.f32.mrf.mxu1  ;;  %v911_v19 = vpop.f32.mrf.mxu0 }
 0x907   :  { %v889_v45 = vadd.f32 %v888_v44, %v861_v43  ;;  %v912_v20 = vadd.f32 %v911_v19, %v862_v17  ;;  %v4115_v44 = vld [vmem:[%s6409_s29 + $0xb0] sm:$0xff] }
 0x909   :  { %v917_v46 = vmax.f32 %v889_v45, 0.0  ;;  %v918_v21 = vmax.f32 %v912_v20, 0.0  ;;  %v4116_v45 = vld [vmem:[%s6409_s29 + $0xb8] sm:$0xff] }
 0x90b   :  { %973 = vmatmul.f32.vlgmr.msrb.gmra.mxu3 %v917_v46  ;;  %v4113_v46 = vld [vmem:[%s6409_s29 + $0xa0] sm:$0xff] }
 0x925   :  { %v790_v59 = vpop.xlane.xlu1 %789 }
 0x926   :  { %v792_v60 = vmul.f32 0.015625, %v790_v59 }
 0x927   :  { %v800_v52 = vpop.xlane.xlu0 %799 }
 0x928   :  { %v804_v63 = vmul.f32 %v792_v60, %v792_v60  ;;  %v802_v0 = vmul.f32 0.015625, %v800_v52  ;;  %v808_v11 = vsub.f32 %v5081_v35, %v792_v60 }
 0x92a   :  { %v806_v2 = vsub.f32 %v802_v0, %v804_v63 }
 0x92c   :  { %v810_v4 = vadd.f32 1e-05, %v806_v2 }
 0x92e   :  { %4533 = vrsqrt.f32 %v810_v4  ;;  %vm827_vm10 = vweird.f32 %v810_v4 }
 0x934   :  { %v4534_v5 = vpop.eup %4533 }
 0x935   :  { %v822_v6 = vmul.f32 %v4534_v5, %v810_v4  ;;  %vm828_vm9 = vweird.f32 %v4534_v5 }
 0x936   :  { %vm829_vm11 = vmor %vm827_vm10, %vm828_vm9 }
 0x937   :  { %v823_v7 = vmul.f32 %v4534_v5, %v822_v6 }
 0x939   :  { %v824_v8 = vmul.f32 0.5, %v823_v7 }
 0x93b   :  { %v825_v9 = vsub.f32 1.5, %v824_v8 }
 0x93d   :  { %v826_v10 = vmul.f32 %v4534_v5, %v825_v9  ;;  %v4479_v9 = vld [vmem:[%s6393_s13] ss:$0 sm:$0xff] }
 0x93f   :  { %v830_v12 = vsel %vm829_vm11, %v4534_v5, %v826_v10 }
 0x940   :  { %v832_v14 = vmul.f32 %v830_v12, %v808_v11  ;;  %v4480_v12 = vld [vmem:[%s6394_s14] ss:$0 sm:$0xff] }
 0x942   :  { %v837_v15 = vmul.f32 %v5025_v13, %v832_v14 }
 0x944   :  { %v5157_v18 = vadd.f32 %v5030_v16, %v837_v15  ;;  %v4478_v16 = vld [vmem:[%s6391_s10] ss:$0 sm:$0xff] }
 0x946   :  { %4106 = vmatmul.msk.f32.gmra.mxu1 %vm104_vm0, %v5157_v18  ;;  %4108 = vmatmul.msk.f32.gmra.mxu0 %vm104_vm0, %v5157_v18 }
 0x94e   :  { %996 = vmatmul.f32.vlgmr.msra.gmra.mxu0 %v918_v21 }
 0x98e   :  { %v974_v29 = vpop.f32.mrf.mxu3 }
 0x98f   :  { %v975_v30 = vadd.f32 %v4478_v16, %v974_v29  ;;  %v4125_v29 = vld [vmem:[%s6384_s4 + $0x2] sm:$0x3] }
 0x9c3   :  { %v891_v22 = vpop.f32.mrf.mxu1  ;;  %v914_v24 = vpop.f32.mrf.mxu0 }
 0x9c4   :  { %v892_v13 = vadd.f32 %v891_v22, %v861_v43  ;;  %v915_v25 = vadd.f32 %v914_v24, %v862_v17  ;;  %v4118_v43 = vld [vmem:[%s6409_s29 + $0xc8] sm:$0xff] }
 0x9c5   :  { %1129 = vmatpush.msra.mxu2 %v4118_v43 }
 0x9c6   :  { %v920_v27 = vmax.f32 %v915_v25, 0.0  ;;  %v919_v28 = vmax.f32 %v892_v13, 0.0 }
 0x9c7   :  { %1130 = vmatpush.msra.mxu2 %v4116_v45 }
 0x9c8   :  { %976 = vmatmul.f32.gmra.mxu3 %v919_v28  ;;  %999 = vmatmul.f32.gmra.mxu0 %v920_v27 }
 0x9c9   :  { %1131 = vmatpush.msra.mxu2 %v4114_v47 }
 0x9cb   :  { %v997_v31 = vpop.f32.mrf.mxu0  ;;  %1132 = vmatpush.msra.mxu2 %v4112_v48 }
 0x9cc   :  { %v998_v32 = vadd.f32 %v997_v31, %v975_v30 }
 0x9cd   :  { %1133 = vmatpush.msra.mxu2 %v4110_v50 }
 0x9ce   :  { %v5169_v33 = vadd.f32 %v998_v32, %v5034_v38  ;;  %v4121_v38 = vld [vmem:[%s6409_s29 + $0xe0] sm:$0xff]  ;;  %v1085_v32 = vperm.slane %v4125_v29, 0 }
 0x9cf   :  { %1104 = vmatpush.msra.mxu1 %v4121_v38  ;;  %v1086_v38 = vperm.slane %v4125_v29, 1 }
 0x9d0   :  { %v1007_v34 = vsel %vm104_vm0, %v5169_v33, 0.0  ;;  %v1015_v35 = vmul.f32 %v5169_v33, %v5169_v33 }
 0x9d1   :  { %1008 = vadd.xlane.f32.xlu2 %v1007_v34  ;;  %1105 = vmatpush.msra.mxu1 %v4119_v26 }
 0x9d2   :  { %v1017_v36 = vsel %vm104_vm0, %v1015_v35, 0.0 }
 0x9d3   :  { %1018 = vadd.xlane.f32.xlu1 %v1017_v36  ;;  %1106 = vmatpush.msra.mxu1 %v4117_v42 }
 0x9d5   :  { %1107 = vmatpush.msra.mxu1 %v4115_v44 }
 0x9d7   :  { %1108 = vmatpush.msra.mxu1 %v4113_v46 }
 0x9d9   :  { %1109 = vmatpush.msra.mxu1 %v4111_v23 }
 0x9db   :  { %1110 = vmatpush.msra.mxu1 %v4109_v49 }
 0xa44   :  { %v1009_v51 = vpop.xlane.xlu2 %1008 }
 0xa45   :  { %v1013_v53 = vmul.f32 0.015625, %v1009_v51  ;;  %v1000_v61 = vpop.f32.mrf.mxu0 }
 0xa46   :  { %v1019_v54 = vpop.xlane.xlu1 %1018 }
 0xa47   :  { %v1025_v55 = vmul.f32 %v1013_v53, %v1013_v53  ;;  %v1023_v56 = vmul.f32 0.015625, %v1019_v54  ;;  %v1029_v8 = vsub.f32 %v5169_v33, %v1013_v53 }
 0xa49   :  { %v1027_v57 = vsub.f32 %v1023_v56, %v1025_v55 }
 0xa4b   :  { %v1031_v58 = vadd.f32 1e-05, %v1027_v57  ;;  %v977_v59 = vpop.f32.mrf.mxu3 }
 0xa4c   :  { %v978_v60 = vadd.f32 %v4478_v16, %v977_v59 }
 0xa4d   :  { %4535 = vrsqrt.f32 %v1031_v58  ;;  %vm1039_vm13 = vweird.f32 %v1031_v58 }
 0xa4e   :  { %v1001_v52 = vadd.f32 %v1000_v61, %v978_v60 }
 0xa50   :  { %v1004_v62 = vadd.f32 %v1001_v52, %v5157_v18 }
 0xa52   :  { %v1010_v63 = vsel %vm104_vm0, %v1004_v62, 0.0  ;;  %v1016_v0 = vmul.f32 %v1004_v62, %v1004_v62 }
 0xa53   :  { %v4536_v1 = vpop.eup %4535  ;;  %1011 = vadd.xlane.f32.xlu0 %v1010_v63 }
 0xa54   :  { %v1034_v2 = vmul.f32 %v4536_v1, %v1031_v58  ;;  %v1020_v3 = vsel %vm104_vm0, %v1016_v0, 0.0  ;;  %vm1040_vm12 = vweird.f32 %v4536_v1 }
 0xa55   :  { %1021 = vadd.xlane.f32.xlu2 %v1020_v3  ;;  %vm1041_vm14 = vmor %vm1039_vm13, %vm1040_vm12 }
 0xa56   :  { %v1035_v4 = vmul.f32 %v4536_v1, %v1034_v2 }
 0xa58   :  { %v1036_v5 = vmul.f32 0.5, %v1035_v4 }
 0xa5a   :  { %v1037_v6 = vsub.f32 1.5, %v1036_v5 }
 0xa5c   :  { %v1038_v7 = vmul.f32 %v4536_v1, %v1037_v6 }
 0xa5e   :  { %v1042_v10 = vsel %vm1041_vm14, %v4536_v1, %v1038_v7 }
 0xa5f   :  { %v1053_v11 = vmul.f32 %v1042_v10, %v1029_v8 }
 0xa61   :  { %v1058_v14 = vmul.f32 %v4479_v9, %v1053_v11 }
 0xa63   :  { %v5234_v15 = vadd.f32 %v4480_v12, %v1058_v14 }
 0xa65   :  { %4126 = vmatmul.msk.f32.vlgmr.msra.gmra.mxu1 %vm104_vm0, %v5234_v15  ;;  %4128 = vmatmul.msk.f32.vlgmr.msra.gmra.mxu2 %vm104_vm0, %v5234_v15 }
 0xac6   :  { %v1012_v17 = vpop.xlane.xlu0 %1011 }
 0xac7   :  { %v1014_v18 = vmul.f32 0.015625, %v1012_v17 }
 0xac8   :  { %v1022_v19 = vpop.xlane.xlu2 %1021 }
 0xac9   :  { %v1026_v20 = vmul.f32 %v1014_v18, %v1014_v18  ;;  %v1024_v21 = vmul.f32 0.015625, %v1022_v19  ;;  %v1030_v31 = vsub.f32 %v1004_v62, %v1014_v18 }
 0xacb   :  { %v1028_v22 = vsub.f32 %v1024_v21, %v1026_v20 }
 0xacd   :  { %v1032_v24 = vadd.f32 1e-05, %v1028_v22 }
 0xacf   :  { %4537 = vrsqrt.f32 %v1032_v24  ;;  %vm1049_vm6 = vweird.f32 %v1032_v24 }
 0xad5   :  { %v4538_v13 = vpop.eup %4537 }
 0xad6   :  { %v1044_v25 = vmul.f32 %v4538_v13, %v1032_v24  ;;  %vm1050_vm15 = vweird.f32 %v4538_v13 }
 0xad7   :  { %vm1051_vm7 = vmor %vm1049_vm6, %vm1050_vm15 }
 0xad8   :  { %v1045_v16 = vmul.f32 %v4538_v13, %v1044_v25 }
 0xada   :  { %v1046_v27 = vmul.f32 0.5, %v1045_v16 }
 0xadc   :  { %v1047_v28 = vsub.f32 1.5, %v1046_v27 }
 0xade   :  { %v1048_v30 = vmul.f32 %v4538_v13, %v1047_v28 }
 0xae0   :  { %v1052_v33 = vsel %vm1051_vm7, %v4538_v13, %v1048_v30 }
 0xae1   :  { %v1054_v34 = vmul.f32 %v1052_v33, %v1030_v31 }
 0xae2   :  { %v1112_v35 = vpop.f32.mrf.mxu1 }
 0xae3   :  { %v1113_v36 = vadd.f32 %v1112_v35, %v1085_v32  ;;  %v1059_v39 = vmul.f32 %v4479_v9, %v1054_v34 }
 0xae5   :  { %v5243_v40 = vadd.f32 %v4480_v12, %v1059_v39  ;;  %1280 = vrot.lane.b32.xlu2 %v1113_v36, %s4660_s24  ;;  %1150 = vrot.lane.b32.xlu1 %v1113_v36, %s4661_s25 }
 0xae7   :  { %4127 = vmatmul.msk.f32.gmra.mxu1 %vm104_vm0, %v5243_v40  ;;  %4129 = vmatmul.msk.f32.gmra.mxu2 %vm104_vm0, %v5243_v40 }
 0xae8   :  { %v1135_v41 = vpop.f32.mrf.mxu2 }
 0xae9   :  { %v1136_v26 = vadd.f32 %v1135_v41, %v1086_v38 }
 0xaeb   :  { %1142 = vst.msk [vmem:[#allocation2 + $0x8] sm:$0xff] %vm104_vm0, %v1136_v26 }
 0xaed   :  { %1428 = vrot.lane.b32.xlu1 %v1113_v36, %s4664_s28 }
 0xaf2   :  { %v5253_v37 = vld [vmem:[#allocation2 + $0x8] sm:$0xff] }
 0xaf3   :  { %1243 = vmatpush.msra.mxu3 %v5253_v37 }
 0xaf5   :  { %1576 = vrot.lane.b32.xlu1 %v1113_v36, %s6404_s0 }
 0xb3f   :  { %v1281_v54 = vpop.permute.xlu2 %1280 }
 0xb57   :  { %v1151_v42 = vpop.permute.xlu1 %1150 }
 0xb58   :  { %4130 = vmatpush.xpose.msk.msrb.mxu1 %vm168_vm1, %v1151_v42 }
 0xb5b   :  { %4131 = vmatmul.msk.f32.vlgmr.msrb.gmra.mxu1 %vm168_vm1, %v1113_v36 }
 0xb5f   :  { %v1429_v23 = vpop.permute.xlu1 %1428 }
 0xb64   :  { %v1115_v43 = vpop.f32.mrf.mxu1 }
 0xb65   :  { %v1116_v44 = vadd.f32 %v1115_v43, %v1085_v32 }
 0xb67   :  { %1309 = vrot.lane.b32.xlu1 %v1116_v44, %s4660_s24  ;;  %1177 = vrot.lane.b32.xlu0 %v1116_v44, %s4661_s25  ;;  %v1577_v48 = vpop.permute.xlu1 %1576 }
 0xb6a   :  { %v1138_v45 = vpop.f32.mrf.mxu2 }
 0xb6b   :  { %v1139_v46 = vadd.f32 %v1138_v45, %v1086_v38 }
 0xb6d   :  { %1144 = vst.msk [vmem:[#allocation2 + $0x18] sm:$0xff] %vm104_vm0, %v1139_v46 }
 0xb6f   :  { %1457 = vrot.lane.b32.xlu1 %v1116_v44, %s4664_s28  ;;  %1278 = vrot.lane.b32.xlu0 %v1113_v36, %s4662_s26 }
 0xb74   :  { %v5264_v47 = vld [vmem:[#allocation2 + $0x18] sm:$0xff] }
 0xb75   :  { %1266 = vmatpush.msra.mxu1 %v5264_v47 }
 0xb77   :  { %1605 = vrot.lane.b32.xlu1 %v1116_v44, %s6404_s0  ;;  %1426 = vrot.lane.b32.xlu0 %v1113_v36, %s6402_s27 }
 0xbd8   :  { %v1173_v49 = vpop.f32.mrf.mxu1 }
 0xbd9   :  { %v1310_v50 = vpop.permute.xlu1 %1309  ;;  %v1178_v51 = vpop.permute.xlu0 %1177  ;;  %v1203_v53 = vsel %vm220_vm2, %v1173_v49, -inf }
 0xbda   :  { %1204 = vmax.xlane.f32.xlu2 %v1203_v53  ;;  %4132 = vmatpush.xpose.msk.msrb.mxu2 %vm168_vm1, %v1178_v51 }
 0xbdb   :  { %4138 = vmatpush.xpose.msk.msrb.mxu3 %vm168_vm1, %v1310_v50 }
 0xbdd   :  { %4133 = vmatmul.msk.f32.vlgmr.msrb.gmra.mxu2 %vm168_vm1, %v1116_v44 }
 0xbde   :  { %4136 = vmatpush.xpose.msk.msra.mxu2 %vm168_vm1, %v1281_v54 }
 0xbe1   :  { %v1279_v55 = vpop.permute.xlu0 %1278  ;;  %v1458_v4 = vpop.permute.xlu1 %1457 }
 0xbe2   :  { %4142 = vmatpush.xpose.msk.msrb.mxu2 %vm168_vm1, %v1429_v23 }
 0xbe5   :  { %4137 = vmatmul.msk.f32.vlgmr.msra.gmra.mxu2 %vm168_vm1, %v1279_v55 }
 0xbe6   :  { %4148 = vmatpush.xpose.msk.msra.mxu2 %vm168_vm1, %v1577_v48 }
 0xbe9   :  { %v1427_v56 = vpop.permute.xlu0 %1426  ;;  %v1606_v8 = vpop.permute.xlu1 %1605 }
 0xbed   :  { %4143 = vmatmul.msk.f32.vlgmr.msrb.gmra.mxu2 %vm168_vm1, %v1427_v56 }
 0xbf2   :  { %1574 = vrot.lane.b32.xlu2 %v1113_v36, %s6410_s18 }
 0xbfa   :  { %1307 = vrot.lane.b32.xlu2 %v1116_v44, %s4662_s26 }
 0xc02   :  { %1455 = vrot.lane.b32.xlu2 %v1116_v44, %s6402_s27 }
 0xc0a   :  { %1603 = vrot.lane.b32.xlu2 %v1116_v44, %s6410_s18 }
 0xc4d   :  { %v1205_v57 = vpop.xlane.xlu2 %1204 }
 0xc4e   :  { %v1209_v58 = vsub.f32 %v1173_v49, %v1205_v57 }
 0xc50   :  { %v1211_v59 = vmul.f32 1.442695, %v1209_v58 }
 0xc52   :  { %4539 = vpow2.f32 %v1211_v59 }
 0xc55   :  { %v1575_v60 = vpop.permute.xlu2 %1574 }
 0xc56   :  { %4149 = vmatmul.msk.f32.vlgmr.msra.gmra.mxu2 %vm168_vm1, %v1575_v60 }
 0xc58   :  { %v4540_v61 = vpop.eup %4539 }
 0xc59   :  { %v1215_v52 = vsel %vm220_vm2, %v4540_v61, 0.0 }
 0xc5a   :  { %1216 = vadd.xlane.f32.xlu0 %v1215_v52 }
 0xc5d   :  { %v1308_v3 = vpop.permute.xlu2 %1307 }
 0xc60   :  { %v5284_v62 = vpop.f32.mrf.mxu2 }
 0xc61   :  { %v1206_v19 = vsel %vm220_vm2, %v5284_v62, -inf }
 0xc65   :  { %v1456_v6 = vpop.permute.xlu2 %1455 }
 0xc68   :  { %v1303_v63 = vpop.f32.mrf.mxu2 }
 0xc69   :  { %v1335_v0 = vsel %vm220_vm2, %v1303_v63, -inf }
 0xc6a   :  { %1336 = vmax.xlane.f32.xlu1 %v1335_v0 }
 0xc6d   :  { %v1604_v12 = vpop.permute.xlu2 %1603 }
 0xc70   :  { %v1451_v1 = vpop.f32.mrf.mxu2 }
 0xc71   :  { %v1483_v2 = vsel %vm220_vm2, %v1451_v1, -inf }
 0xc72   :  { %1484 = vmax.xlane.f32.xlu2 %v1483_v2 }
 0xc8a   :  { %1358 = vrot.lane.b32.xlu2 %v5253_v37, %s4662_s26 }
 0xccd   :  { %v1217_v5 = vpop.xlane.xlu0 %1216 }
 0xcce   :  { %4541 = vrcp.f32 %v1217_v5 }
 0xcd4   :  { %v4542_v7 = vpop.eup %4541 }
 0xcd5   :  { %v1223_v9 = vmul.f32 %v4542_v7, %v4540_v61 }
 0xcd7   :  { %4134 = vmatmul.msk.f32.vlgmr.msra.gmra.mxu3 %vm220_vm2, %v1223_v9 }
 0xcd8   :  { %4144 = vmatpush.xpose.msk.msra.mxu3 %vm168_vm1, %v1458_v4 }
 0xcd9   :  { %v1599_v10 = vpop.f32.mrf.mxu2 }
 0xcda   :  { %v1631_v11 = vsel %vm220_vm2, %v1599_v10, -inf }
 0xcdb   :  { %1632 = vmax.xlane.f32.xlu0 %v1631_v11 }
 0xcdd   :  { %v1337_v14 = vpop.xlane.xlu1 %1336 }
 0xcde   :  { %v1341_v17 = vsub.f32 %v1303_v63, %v1337_v14 }
 0xcdf   :  { %4139 = vmatmul.msk.f32.vlgmr.msrb.gmra.mxu3 %vm168_vm1, %v1308_v3 }
 0xce0   :  { %v1343_v18 = vmul.f32 1.442695, %v1341_v17  ;;  %4150 = vmatpush.xpose.msk.msrb.mxu3 %vm168_vm1, %v1606_v8 }
 0xce2   :  { %4543 = vpow2.f32 %v1343_v18 }
 0xce3   :  { %1207 = vmax.xlane.f32.xlu0 %v1206_v19 }
 0xce5   :  { %v1485_v20 = vpop.xlane.xlu2 %1484 }
 0xce6   :  { %v1489_v21 = vsub.f32 %v1451_v1, %v1485_v20 }
 0xce7   :  { %4145 = vmatmul.msk.f32.vlgmr.msra.gmra.mxu3 %vm168_vm1, %v1456_v6 }
 0xce8   :  { %v4544_v22 = vpop.eup %4543  ;;  %v1491_v24 = vmul.f32 1.442695, %v1489_v21 }
 0xce9   :  { %v1347_v13 = vsel %vm220_vm2, %v4544_v22, 0.0 }
 0xcea   :  { %4545 = vpow2.f32 %v1491_v24 }
 0xceb   :  { %1348 = vadd.xlane.f32.xlu0 %v1347_v13 }
 0xced   :  { %v1359_v25 = vpop.permute.xlu2 %1358 }
 0xcee   :  { %1379 = vmatpush.msrb.mxu0 %v1359_v25 }
 0xcef   :  { %4151 = vmatmul.msk.f32.vlgmr.msrb.gmra.mxu3 %vm168_vm1, %v1604_v12 }
 0xcf0   :  { %v4546_v16 = vpop.eup %4545 }
 0xcf1   :  { %v1495_v27 = vsel %vm220_vm2, %v4546_v16, 0.0 }
 0xcf3   :  { %1496 = vadd.xlane.f32.xlu0 %v1495_v27 }
 0xd4e   :  { %v1633_v28 = vpop.xlane.xlu0 %1632 }
 0xd4f   :  { %v1637_v29 = vsub.f32 %v1599_v10, %v1633_v28 }
 0xd51   :  { %v1639_v30 = vmul.f32 1.442695, %v1637_v29  ;;  %v4161_v29 = vld [vmem:[%s6386_s5 + $0x78] sm:$0xff] }
 0xd52   :  { %1747 = vmatpush.msrb.mxu2 %v4161_v29  ;;  %v5443_v29 = vld [vmem:[%s6388_s12 + $0x1] ss:$0 sm:$0xff] }
 0xd53   :  { %4547 = vpow2.f32 %v1639_v30  ;;  %v4160_v30 = vld [vmem:[%s6386_s5 + $0x70] sm:$0xff] }
 0xd54   :  { %1748 = vmatpush.msrb.mxu2 %v4160_v30 }
 0xd56   :  { %v1208_v31 = vpop.xlane.xlu0 %1207 }
 0xd57   :  { %v1210_v45 = vsub.f32 %v5284_v62, %v1208_v31  ;;  %v4159_v31 = vld [vmem:[%s6386_s5 + $0x68] sm:$0xff] }
 0xd58   :  { %1749 = vmatpush.msrb.mxu2 %v4159_v31 }
 0xd59   :  { %v4548_v32 = vpop.eup %4547  ;;  %v1213_v46 = vmul.f32 1.442695, %v1210_v45 }
 0xd5a   :  { %v1245_v33 = vpop.f32.mrf.mxu3  ;;  %v1643_v34 = vsel %vm220_vm2, %v4548_v32, 0.0 }
 0xd5b   :  { %1271 = vst.msk [vmem:[#allocation3] sm:$0xff] %vm168_vm1, %v1245_v33  ;;  %1644 = vadd.xlane.f32.xlu0 %v1643_v34  ;;  %v4157_v33 = vld [vmem:[%s6386_s5 + $0x58] sm:$0xff]  ;;  %v4156_v34 = vld [vmem:[%s6386_s5 + $0x50] sm:$0xff] }
 0xd5e   :  { %v1349_v35 = vpop.xlane.xlu0 %1348 }
 0xd5f   :  { %4549 = vrcp.f32 %v1349_v35  ;;  %v4155_v35 = vld [vmem:[%s6386_s5 + $0x48] sm:$0xff] }
 0xd60   :  { %4551 = vpow2.f32 %v1213_v46 }
 0xd62   :  { %v1332_v36 = vpop.f32.mrf.mxu3 }
 0xd63   :  { %v1338_v39 = vsel %vm220_vm2, %v1332_v36, -inf }
 0xd64   :  { %1339 = vmax.xlane.f32.xlu1 %v1338_v39 }
 0xd65   :  { %v4550_v38 = vpop.eup %4549 }
 0xd66   :  { %v1355_v41 = vmul.f32 %v4550_v38, %v4544_v22  ;;  %v4552_v23 = vpop.eup %4551  ;;  %v1497_v49 = vpop.xlane.xlu0 %1496 }
 0xd67   :  { %v1218_v48 = vsel %vm220_vm2, %v4552_v23, 0.0 }
 0xd68   :  { %4140 = vmatmul.msk.f32.vlgmr.msrb.gmra.mxu0 %vm220_vm2, %v1355_v41 }
 0xd6a   :  { %v1480_v26 = vpop.f32.mrf.mxu3 }
 0xd6b   :  { %v1486_v42 = vsel %vm220_vm2, %v1480_v26, -inf }
 0xd6c   :  { %1487 = vmax.xlane.f32.xlu0 %v1486_v42 }
 0xd72   :  { %v1628_v43 = vpop.f32.mrf.mxu3 }
 0xd73   :  { %v1634_v44 = vsel %vm220_vm2, %v1628_v43, -inf }
 0xd74   :  { %1635 = vmax.xlane.f32.xlu2 %v1634_v44 }
 0xd7d   :  { %1506 = vrot.lane.b32.xlu1 %v5253_v37, %s6402_s27 }
 0xd80   :  { %1654 = vrot.lane.b32.xlu0 %v5253_v37, %s6410_s18 }
 0xda7   :  { %1219 = vadd.xlane.f32.xlu1 %v1218_v48  ;;  %v4481_v48 = vld [vmem:[%s6385_s6 + $0x1] ss:$0 sm:$0xff] }
 0xdce   :  { %v1645_v50 = vpop.xlane.xlu0 %1644 }
 0xdd7   :  { %v1340_v51 = vpop.xlane.xlu1 %1339 }
 0xdd8   :  { %v1342_v53 = vsub.f32 %v1332_v36, %v1340_v51  ;;  %v4154_v36 = vld [vmem:[%s6386_s5 + $0x40] sm:$0xff] }
 0xdda   :  { %v1345_v54 = vmul.f32 1.442695, %v1342_v53 }
 0xddc   :  { %4553 = vpow2.f32 %v1345_v54 }
 0xddf   :  { %v1488_v55 = vpop.xlane.xlu0 %1487 }
 0xde0   :  { %v1490_v56 = vsub.f32 %v1480_v26, %v1488_v55 }
 0xde2   :  { %v4554_v57 = vpop.eup %4553  ;;  %v1493_v58 = vmul.f32 1.442695, %v1490_v56  ;;  %v4181_v56 = vld [vmem:[%s6389_s7 + $0xf0] sm:$0xff] }
 0xde3   :  { %v1350_v37 = vsel %vm220_vm2, %v4554_v57, 0.0  ;;  %1864 = vmatpush.msra.mxu3 %v4181_v56  ;;  %v4207_v56 = vld [vmem:[%s6390_s9 + $0x198] sm:$0xff] }
 0xde4   :  { %4555 = vpow2.f32 %v1493_v58  ;;  %1351 = vadd.xlane.f32.xlu0 %v1350_v37  ;;  %v4180_v58 = vld [vmem:[%s6389_s7 + $0xe8] sm:$0xff]  ;;  %v4177_v37 = vld [vmem:[%s6389_s7 + $0xd0] sm:$0xff] }
 0xde5   :  { %4557 = vrcp.f32 %v1497_v49  ;;  %v1381_v7 = vpop.f32.mrf.mxu0 }
 0xde7   :  { %v1636_v59 = vpop.xlane.xlu2 %1635 }
 0xde8   :  { %v1638_v60 = vsub.f32 %v1628_v43, %v1636_v59  ;;  %v4178_v59 = vld [vmem:[%s6389_s7 + $0xd8] sm:$0xff] }
 0xdea   :  { %v4556_v61 = vpop.eup %4555  ;;  %v1641_v52 = vmul.f32 1.442695, %v1638_v60  ;;  %v4175_v60 = vld [vmem:[%s6389_s7 + $0xc0] sm:$0xff] }
 0xdeb   :  { %v1498_v62 = vsel %vm220_vm2, %v4556_v61, 0.0  ;;  %v4558_v63 = vpop.eup %4557 }
 0xdec   :  { %4559 = vpow2.f32 %v1641_v52  ;;  %1499 = vadd.xlane.f32.xlu2 %v1498_v62  ;;  %v1503_v0 = vmul.f32 %v4558_v63, %v4546_v16  ;;  %v4173_v52 = vld [vmem:[%s6389_s7 + $0xb0] sm:$0xff]  ;;  %v4174_v62 = vld [vmem:[%s6389_s7 + $0xb8] sm:$0xff]  ;;  %v4171_v63 = vld [vmem:[%s6389_s7 + $0xa0] sm:$0xff] }
 0xded   :  { %4561 = vrcp.f32 %v1645_v50 }
 0xdef   :  { %v1507_v1 = vpop.permute.xlu1 %1506 }
 0xdf0   :  { %1527 = vmatpush.msra.mxu0 %v1507_v1  ;;  %v4169_v1 = vld [vmem:[%s6389_s7 + $0x90] sm:$0xff] }
 0xdf1   :  { %4146 = vmatmul.msk.f32.vlgmr.msra.gmra.mxu0 %vm220_vm2, %v1503_v0  ;;  %v4172_v0 = vld [vmem:[%s6389_s7 + $0xa8] sm:$0xff] }
 0xdf2   :  { %v4560_v2 = vpop.eup %4559  ;;  %v1655_v3 = vpop.permute.xlu0 %1654 }
 0xdf3   :  { %1675 = vmatpush.msrb.mxu0 %v1655_v3  ;;  %v1646_v4 = vsel %vm220_vm2, %v4560_v2, 0.0  ;;  %v4562_v5 = vpop.eup %4561  ;;  %v4167_v3 = vld [vmem:[%s6389_s7 + $0x80] sm:$0xff] }
 0xdf4   :  { %1647 = vadd.xlane.f32.xlu1 %v1646_v4  ;;  %v1651_v6 = vmul.f32 %v4562_v5, %v4548_v32  ;;  %v4158_v32 = vld [vmem:[%s6386_s5 + $0x60] sm:$0xff]  ;;  %v4168_v4 = vld [vmem:[%s6389_s7 + $0x88] sm:$0xff] }
 0xdf5   :  { %1750 = vmatpush.msrb.mxu2 %v4158_v32  ;;  %v4219_v32 = vld [vmem:[%s6390_s9 + $0x1f8] sm:$0xff] }
 0xdf7   :  { %1751 = vmatpush.msrb.mxu2 %v4157_v33  ;;  %v4218_v33 = vld [vmem:[%s6390_s9 + $0x1f0] sm:$0xff] }
 0xdf8   :  { %1533 = vrot.lane.b32.xlu0 %v5264_v47, %s6402_s27 }
 0xdf9   :  { %4152 = vmatmul.msk.f32.vlgmr.msrb.gmra.mxu0 %vm220_vm2, %v1651_v6  ;;  %1752 = vmatpush.msrb.mxu2 %v4156_v34  ;;  %v4217_v34 = vld [vmem:[%s6390_s9 + $0x1e8] sm:$0xff] }
 0xdfb   :  { %1753 = vmatpush.msrb.mxu2 %v4155_v35  ;;  %v4203_v35 = vld [vmem:[%s6390_s9 + $0x178] sm:$0xff] }
 0xdfd   :  { %1754 = vmatpush.msrb.mxu2 %v4154_v36  ;;  %v4216_v36 = vld [vmem:[%s6390_s9 + $0x1e0] sm:$0xff] }
 0xdff   :  { %1967 = vmatpush.msra.mxu2 %v4219_v32 }
 0xe01   :  { %1968 = vmatpush.msra.mxu2 %v4218_v33 }
 0xe03   :  { %1969 = vmatpush.msra.mxu2 %v4217_v34 }
 0xe04   :  { %1385 = vrot.lane.b32.xlu2 %v5264_v47, %s4662_s26 }
 0xe05   :  { %1970 = vmatpush.msra.mxu2 %v4216_v36 }
 0xe0c   :  { %1413 = vrot.lane.b32.xlu2 %v1381_v7, %s6404_s0 }
 0xe0d   :  { %1681 = vrot.lane.b32.xlu1 %v5264_v47, %s6410_s18 }
 0xe1a   :  { %v1220_v8 = vpop.xlane.xlu1 %1219 }
 0xe1b   :  { %4563 = vrcp.f32 %v1220_v8 }
 0xe21   :  { %v4564_v9 = vpop.eup %4563 }
 0xe22   :  { %v1224_v10 = vmul.f32 %v4564_v9, %v4552_v23 }
 0xe24   :  { %4135 = vmatmul.msk.f32.vlgmr.msra.gmra.mxu1 %vm220_vm2, %v1224_v10 }
 0xe57   :  { %v1352_v11 = vpop.xlane.xlu0 %1351 }
 0xe58   :  { %4565 = vrcp.f32 %v1352_v11 }
 0xe5e   :  { %v4566_v14 = vpop.eup %4565 }
 0xe5f   :  { %v1500_v12 = vpop.xlane.xlu2 %1499  ;;  %v1356_v17 = vmul.f32 %v4566_v14, %v4554_v57  ;;  %v4182_v57 = vld [vmem:[%s6389_s7 + $0xf8] sm:$0xff] }
 0xe60   :  { %4567 = vrcp.f32 %v1500_v12  ;;  %1887 = vmatpush.msra.mxu0 %v4182_v57  ;;  %v4193_v57 = vld [vmem:[%s6390_s9 + $0x128] sm:$0xff] }
 0xe62   :  { %1888 = vmatpush.msra.mxu0 %v4180_v58 }
 0xe64   :  { %1889 = vmatpush.msra.mxu0 %v4178_v59  ;;  %v4205_v59 = vld [vmem:[%s6390_s9 + $0x188] sm:$0xff] }
 0xe66   :  { %v4568_v20 = vpop.eup %4567 }
 0xe67   :  { %v1386_v18 = vpop.permute.xlu2 %1385  ;;  %v1504_v21 = vmul.f32 %v4568_v20, %v4556_v61  ;;  %v1648_v24 = vpop.xlane.xlu1 %1647  ;;  %v4176_v61 = vld [vmem:[%s6389_s7 + $0xc8] sm:$0xff] }
 0xe68   :  { %1406 = vmatpush.msrb.mxu1 %v1386_v18  ;;  %4569 = vrcp.f32 %v1648_v24  ;;  %1890 = vmatpush.msra.mxu0 %v4176_v61  ;;  %v4191_v61 = vld [vmem:[%s6390_s9 + $0x118] sm:$0xff] }
 0xe69   :  { %4141 = vmatmul.msk.f32.vlgmr.msrb.gmra.mxu1 %vm220_vm2, %v1356_v17 }
 0xe6a   :  { %v1534_v19 = vpop.permute.xlu0 %1533  ;;  %1891 = vmatpush.msra.mxu0 %v4174_v62 }
 0xe6b   :  { %1554 = vmatpush.msra.mxu1 %v1534_v19 }
 0xe6c   :  { %1892 = vmatpush.msra.mxu0 %v4172_v0 }
 0xe6e   :  { %v1529_v47 = vpop.f32.mrf.mxu0  ;;  %v4570_v25 = vpop.eup %4569 }
 0xe6f   :  { %1561 = vrot.lane.b32.xlu0 %v1529_v47, %s4664_s28  ;;  %v1414_v22 = vpop.permute.xlu2 %1413  ;;  %v1652_v16 = vmul.f32 %v4570_v25, %v4560_v2  ;;  %v4170_v2 = vld [vmem:[%s6389_s7 + $0x98] sm:$0xff] }
 0xe70   :  { %1419 = vst.msk [vmem:[#allocation3] sm:$0xff] %vm437_vm3, %v1414_v22  ;;  %1893 = vmatpush.msra.mxu0 %v4170_v2 }
 0xe71   :  { %4147 = vmatmul.msk.f32.vlgmr.msra.gmra.mxu1 %vm220_vm2, %v1504_v21 }
 0xe72   :  { %1894 = vmatpush.msra.mxu0 %v4168_v4 }
 0xe76   :  { %v1677_v13 = vpop.f32.mrf.mxu0 }
 0xe77   :  { %1709 = vrot.lane.b32.xlu2 %v1677_v13, %s4660_s24 }
 0xe7f   :  { %v1682_v27 = vpop.permute.xlu1 %1681 }
 0xe80   :  { %1702 = vmatpush.msrb.mxu1 %v1682_v27 }
 0xe81   :  { %4153 = vmatmul.msk.f32.vlgmr.msrb.gmra.mxu1 %vm220_vm2, %v1652_v16  ;;  %v5438_v16 = vld [vmem:[%s6387_s11 + $0x1] ss:$0 sm:$0xff] }
 0xe82   :  { %1944 = vmatpush.msra.mxu1 %v4203_v35 }
 0xea1   :  { %v1268_v28 = vpop.f32.mrf.mxu1 }
 0xea2   :  { %1272 = vst.msk [vmem:[#allocation3 + $0x8] sm:$0xff] %vm168_vm1, %v1268_v28 }
 0xed1   :  { %v1710_v38 = vpop.permute.xlu2 %1709 }
 0xee1   :  { %v1562_v39 = vpop.permute.xlu0 %1561 }
 0xee2   :  { %1567 = vst.msk [vmem:[#allocation3] sm:$0xff] %vm586_vm4, %v1562_v39  ;;  %v4202_v39 = vld [vmem:[%s6390_s9 + $0x170] sm:$0xff] }
 0xee3   :  { %1715 = vst.msk [vmem:[#allocation3] sm:$0xff] %vm735_vm5, %v1710_v38  ;;  %v4215_v38 = vld [vmem:[%s6390_s9 + $0x1d8] sm:$0xff]  ;;  %1945 = vmatpush.msra.mxu1 %v4202_v39 }
 0xee4   :  { %1971 = vmatpush.msra.mxu2 %v4215_v38 }
 0xee6   :  { %v1408_v41 = vpop.f32.mrf.mxu1 }
 0xee7   :  { %1415 = vrot.lane.b32.xlu1 %v1408_v41, %s6404_s0  ;;  %v4201_v41 = vld [vmem:[%s6390_s9 + $0x168] sm:$0xff] }
 0xee8   :  { %1946 = vmatpush.msra.mxu1 %v4201_v41 }
 0xeea   :  { %v1717_v26 = vld [vmem:[#allocation3] sm:$0xff] }
 0xeeb   :  { %4163 = vmatmul.msk.f32.vlgmr.msrb.gmra.mxu2 %vm104_vm0, %v1717_v26  ;;  %v4214_v26 = vld [vmem:[%s6390_s9 + $0x1d0] sm:$0xff] }
 0xeec   :  { %1972 = vmatpush.msra.mxu2 %v4214_v26 }
 0xeee   :  { %v1556_v42 = vpop.f32.mrf.mxu1 }
 0xeef   :  { %1563 = vrot.lane.b32.xlu0 %v1556_v42, %s4664_s28  ;;  %v4200_v42 = vld [vmem:[%s6390_s9 + $0x160] sm:$0xff] }
 0xef0   :  { %1947 = vmatpush.msra.mxu1 %v4200_v42 }
 0xefe   :  { %v1704_v43 = vpop.f32.mrf.mxu1 }
 0xeff   :  { %1711 = vrot.lane.b32.xlu2 %v1704_v43, %s4660_s24  ;;  %v4213_v43 = vld [vmem:[%s6390_s9 + $0x1c8] sm:$0xff] }
 0xf00   :  { %1973 = vmatpush.msra.mxu2 %v4213_v43 }
 0xf59   :  { %v1416_v44 = vpop.permute.xlu1 %1415  ;;  %v1712_v46 = vpop.permute.xlu2 %1711 }
 0xf5a   :  { %1420 = vst.msk [vmem:[#allocation3 + $0x8] sm:$0xff] %vm437_vm3, %v1416_v44  ;;  %v4199_v44 = vld [vmem:[%s6390_s9 + $0x158] sm:$0xff] }
 0xf5b   :  { %1948 = vmatpush.msra.mxu1 %v4199_v44  ;;  %v4237_v44 = vld [vmem:[%s6409_s29 + $0x170] sm:$0xff] }
 0xf61   :  { %v1564_v45 = vpop.permute.xlu0 %1563 }
 0xf62   :  { %1568 = vst.msk [vmem:[#allocation3 + $0x8] sm:$0xff] %vm586_vm4, %v1564_v45  ;;  %v4212_v45 = vld [vmem:[%s6390_s9 + $0x1c0] sm:$0xff] }
 0xf63   :  { %1716 = vst.msk [vmem:[#allocation3 + $0x8] sm:$0xff] %vm735_vm5, %v1712_v46  ;;  %1974 = vmatpush.msra.mxu2 %v4212_v45  ;;  %v4198_v46 = vld [vmem:[%s6390_s9 + $0x150] sm:$0xff]  ;;  %v4238_v45 = vld [vmem:[%s6409_s29 + $0x178] sm:$0xff] }
 0xf64   :  { %1949 = vmatpush.msra.mxu1 %v4198_v46  ;;  %2115 = vmatpush.msrb.mxu0 %v4238_v45  ;;  %v4236_v46 = vld [vmem:[%s6409_s29 + $0x168] sm:$0xff] }
 0xf66   :  { %2116 = vmatpush.msrb.mxu0 %v4236_v46 }
 0xf6a   :  { %v1718_v23 = vld [vmem:[#allocation3 + $0x8] sm:$0xff] }
 0xf6b   :  { %4164 = vmatmul.msk.f32.gmra.mxu2 %vm104_vm0, %v1718_v23  ;;  %v4211_v23 = vld [vmem:[%s6390_s9 + $0x1b8] sm:$0xff] }
 0xf6c   :  { %1975 = vmatpush.msra.mxu2 %v4211_v23  ;;  %v4233_v23 = vld [vmem:[%s6409_s29 + $0x150] sm:$0xff] }
 0xf6e   :  { %v1756_v49 = vpop.f32.mrf.mxu2 }
 0xf6f   :  { %v1757_v50 = vadd.f32 %v4481_v48, %v1756_v49  ;;  %v4210_v49 = vld [vmem:[%s6390_s9 + $0x1b0] sm:$0xff] }
 0xf70   :  { %1976 = vmatpush.msra.mxu2 %v4210_v49  ;;  %v4231_v49 = vld [vmem:[%s6409_s29 + $0x140] sm:$0xff] }
 0xf71   :  { %v5371_v51 = vadd.f32 %v1757_v50, %v5234_v15  ;;  %v4179_v15 = vld [vmem:[%s6389_s7 + $0xe0] sm:$0xff] }
 0xf72   :  { %1865 = vmatpush.msra.mxu3 %v4179_v15  ;;  %v4196_v50 = vld [vmem:[%s6390_s9 + $0x140] sm:$0xff]  ;;  %v4206_v15 = vld [vmem:[%s6390_s9 + $0x190] sm:$0xff] }
 0xf73   :  { %v1768_v53 = vsel %vm104_vm0, %v5371_v51, 0.0  ;;  %v1776_v54 = vmul.f32 %v5371_v51, %v5371_v51 }
 0xf74   :  { %1769 = vadd.xlane.f32.xlu1 %v1768_v53  ;;  %1866 = vmatpush.msra.mxu3 %v4177_v37  ;;  %v4195_v53 = vld [vmem:[%s6390_s9 + $0x138] sm:$0xff]  ;;  %v4192_v37 = vld [vmem:[%s6390_s9 + $0x120] sm:$0xff] }
 0xf75   :  { %v1778_v55 = vsel %vm104_vm0, %v1776_v54, 0.0  ;;  %v4208_v54 = vld [vmem:[%s6390_s9 + $0x1a0] sm:$0xff] }
 0xf76   :  { %1779 = vadd.xlane.f32.xlu0 %v1778_v55  ;;  %1867 = vmatpush.msra.mxu3 %v4175_v60  ;;  %v4194_v55 = vld [vmem:[%s6390_s9 + $0x130] sm:$0xff] }
 0xf78   :  { %1868 = vmatpush.msra.mxu3 %v4173_v52  ;;  %v4204_v52 = vld [vmem:[%s6390_s9 + $0x180] sm:$0xff] }
 0xf7a   :  { %1869 = vmatpush.msra.mxu3 %v4171_v63 }
 0xf7c   :  { %1870 = vmatpush.msra.mxu3 %v4169_v1  ;;  %v4190_v1 = vld [vmem:[%s6390_s9 + $0x110] sm:$0xff] }
 0xf7e   :  { %1871 = vmatpush.msra.mxu3 %v4167_v3  ;;  %v4189_v3 = vld [vmem:[%s6390_s9 + $0x108] sm:$0xff] }
 0xf80   :  { %2092 = vmatpush.msrb.mxu3 %v4237_v44 }
 0xfe7   :  { %v1770_v5 = vpop.xlane.xlu1 %1769 }
 0xfe8   :  { %v1774_v6 = vmul.f32 0.015625, %v1770_v5  ;;  %v4188_v5 = vld [vmem:[%s6390_s9 + $0x100] sm:$0xff] }
 0xfe9   :  { %v1780_v7 = vpop.xlane.xlu0 %1779 }
 0xfea   :  { %v1786_v8 = vmul.f32 %v1774_v6, %v1774_v6  ;;  %v1784_v9 = vmul.f32 0.015625, %v1780_v7 }
 0xfec   :  { %v1788_v10 = vsub.f32 %v1784_v9, %v1786_v8 }
 0xfee   :  { %v1792_v11 = vadd.f32 1e-05, %v1788_v10  ;;  %v1759_v12 = vpop.f32.mrf.mxu2 }
 0xfef   :  { %v1760_v14 = vadd.f32 %v4481_v48, %v1759_v12  ;;  %v4197_v48 = vld [vmem:[%s6390_s9 + $0x148] sm:$0xff]  ;;  %v4183_v12 = vld [vmem:[%s6392_s8 + $0x2] sm:$0x3] }
 0xff0   :  { %4571 = vrsqrt.f32 %v1792_v11  ;;  %vm1800_vm9 = vweird.f32 %v1792_v11  ;;  %1950 = vmatpush.msra.mxu1 %v4197_v48  ;;  %v4234_v48 = vld [vmem:[%s6409_s29 + $0x158] sm:$0xff] }
 0xff1   :  { %v5427_v17 = vadd.f32 %v1760_v14, %v5243_v40  ;;  %v1790_v40 = vsub.f32 %v5371_v51, %v1774_v6  ;;  %v4209_v51 = vld [vmem:[%s6390_s9 + $0x1a8] sm:$0xff]  ;;  %2117 = vmatpush.msrb.mxu0 %v4234_v48 }
 0xff2   :  { %1951 = vmatpush.msra.mxu1 %v4196_v50  ;;  %1977 = vmatpush.msra.mxu2 %v4209_v51  ;;  %v4232_v50 = vld [vmem:[%s6409_s29 + $0x148] sm:$0xff]  ;;  %v4229_v51 = vld [vmem:[%s6409_s29 + $0x130] sm:$0xff] }
 0xff3   :  { %v1771_v18 = vsel %vm104_vm0, %v5427_v17, 0.0  ;;  %v1777_v19 = vmul.f32 %v5427_v17, %v5427_v17  ;;  %2118 = vmatpush.msrb.mxu0 %v4232_v50 }
 0xff4   :  { %1772 = vadd.xlane.f32.xlu2 %v1771_v18  ;;  %1952 = vmatpush.msra.mxu1 %v4195_v53  ;;  %v4230_v53 = vld [vmem:[%s6409_s29 + $0x138] sm:$0xff] }
 0xff5   :  { %v1781_v20 = vsel %vm104_vm0, %v1777_v19, 0.0  ;;  %1978 = vmatpush.msra.mxu2 %v4208_v54  ;;  %v1847_v19 = vperm.slane %v4183_v12, 1  ;;  %2119 = vmatpush.msrb.mxu0 %v4230_v53  ;;  %v4227_v54 = vld [vmem:[%s6409_s29 + $0x120] sm:$0xff] }
 0xff6   :  { %v4572_v47 = vpop.eup %4571  ;;  %1782 = vadd.xlane.f32.xlu1 %v1781_v20  ;;  %1953 = vmatpush.msra.mxu1 %v4194_v55  ;;  %v4228_v55 = vld [vmem:[%s6409_s29 + $0x128] sm:$0xff] }
 0xff7   :  { %v1795_v21 = vmul.f32 %v4572_v47, %v1792_v11  ;;  %vm1801_vm8 = vweird.f32 %v4572_v47  ;;  %1979 = vmatpush.msra.mxu2 %v4207_v56  ;;  %2120 = vmatpush.msrb.mxu0 %v4228_v55  ;;  %v4225_v56 = vld [vmem:[%s6409_s29 + $0x110] sm:$0xff] }
 0xff8   :  { %vm1802_vm10 = vmor %vm1800_vm9, %vm1801_vm8  ;;  %1954 = vmatpush.msra.mxu1 %v4193_v57  ;;  %v4226_v57 = vld [vmem:[%s6409_s29 + $0x118] sm:$0xff] }
 0xff9   :  { %v1796_v22 = vmul.f32 %v4572_v47, %v1795_v21  ;;  %1980 = vmatpush.msra.mxu2 %v4206_v15  ;;  %v4223_v15 = vld [vmem:[%s6409_s29 + $0x100] sm:$0xff]  ;;  %2121 = vmatpush.msrb.mxu0 %v4226_v57 }
 0xffa   :  { %1955 = vmatpush.msra.mxu1 %v4192_v37 }
 0xffb   :  { %v1797_v24 = vmul.f32 0.5, %v1796_v22  ;;  %1981 = vmatpush.msra.mxu2 %v4205_v59 }
 0xffc   :  { %1956 = vmatpush.msra.mxu1 %v4191_v61 }
 0xffd   :  { %v1798_v13 = vsub.f32 1.5, %v1797_v24  ;;  %1982 = vmatpush.msra.mxu2 %v4204_v52 }
 0xffe   :  { %1957 = vmatpush.msra.mxu1 %v4190_v1 }
 0xfff   :  { %v1799_v25 = vmul.f32 %v4572_v47, %v1798_v13 }
0x1000   :  { %1958 = vmatpush.msra.mxu1 %v4189_v3 }
0x1001   :  { %v1803_v27 = vsel %vm1802_vm10, %v4572_v47, %v1799_v25  ;;  %v1846_v25 = vperm.slane %v4183_v12, 0 }
0x1002   :  { %v1814_v28 = vmul.f32 %v1803_v27, %v1790_v40  ;;  %1959 = vmatpush.msra.mxu1 %v4188_v5 }
0x1004   :  { %v1819_v30 = vmul.f32 %v5438_v16, %v1814_v28 }
0x1006   :  { %v5447_v31 = vadd.f32 %v5443_v29, %v1819_v30 }
0x1008   :  { %4184 = vmatmul.msk.f32.vlgmr.msra.gmra.mxu3 %vm104_vm0, %v5447_v31  ;;  %4186 = vmatmul.msk.f32.vlgmr.msra.gmra.mxu0 %vm104_vm0, %v5447_v31 }
0x1067   :  { %v1773_v58 = vpop.xlane.xlu2 %1772 }
0x1068   :  { %v1775_v60 = vmul.f32 0.015625, %v1773_v58  ;;  %v4224_v58 = vld [vmem:[%s6409_s29 + $0x108] sm:$0xff] }
0x1069   :  { %v1783_v62 = vpop.xlane.xlu1 %1782  ;;  %2122 = vmatpush.msrb.mxu0 %v4224_v58 }
0x106a   :  { %v1787_v63 = vmul.f32 %v1775_v60, %v1775_v60  ;;  %v1785_v0 = vmul.f32 0.015625, %v1783_v62  ;;  %v1791_v14 = vsub.f32 %v5427_v17, %v1775_v60 }
0x106c   :  { %v1789_v2 = vsub.f32 %v1785_v0, %v1787_v63 }
0x106e   :  { %v1793_v4 = vadd.f32 1e-05, %v1789_v2 }
0x1070   :  { %4573 = vrsqrt.f32 %v1793_v4  ;;  %vm1810_vm12 = vweird.f32 %v1793_v4 }
0x1076   :  { %v4574_v6 = vpop.eup %4573 }
0x1077   :  { %v1805_v7 = vmul.f32 %v4574_v6, %v1793_v4  ;;  %vm1811_vm11 = vweird.f32 %v4574_v6 }
0x1078   :  { %vm1812_vm13 = vmor %vm1810_vm12, %vm1811_vm11 }
0x1079   :  { %v1806_v8 = vmul.f32 %v4574_v6, %v1805_v7 }
0x107b   :  { %v1807_v9 = vmul.f32 0.5, %v1806_v8 }
0x107d   :  { %v1808_v10 = vsub.f32 1.5, %v1807_v9 }
0x107f   :  { %v1809_v11 = vmul.f32 %v4574_v6, %v1808_v10 }
0x1081   :  { %v1813_v18 = vsel %vm1812_vm13, %v4574_v6, %v1809_v11 }
0x1082   :  { %v1815_v20 = vmul.f32 %v1813_v18, %v1791_v14 }
0x1084   :  { %v1820_v47 = vmul.f32 %v5438_v16, %v1815_v20 }
0x1085   :  { %v1896_v21 = vpop.f32.mrf.mxu0 }
0x1086   :  { %v1897_v22 = vadd.f32 %v1896_v21, %v1847_v19  ;;  %v5555_v24 = vadd.f32 %v5443_v29, %v1820_v47  ;;  %v4484_v29 = vld [vmem:[%s6391_s10 + $0x1] ss:$0 sm:$0xff] }
0x1087   :  { %v4486_v21 = vld [vmem:[%s6394_s14 + $0x1] ss:$0 sm:$0xff] }
0x1088   :  { %v1903_v13 = vmax.f32 %v1897_v22, 0.0  ;;  %4185 = vmatmul.msk.f32.gmra.mxu3 %vm104_vm0, %v5555_v24  ;;  %4187 = vmatmul.msk.f32.gmra.mxu0 %vm104_vm0, %v5555_v24 }
0x108a   :  { %1983 = vmatmul.f32.vlgmr.msra.gmra.mxu2 %v1903_v13 }
0x108b   :  { %v1873_v17 = vpop.f32.mrf.mxu3 }
0x108c   :  { %v1874_v40 = vadd.f32 %v1873_v17, %v1846_v25 }
0x108e   :  { %v1902_v27 = vmax.f32 %v1874_v40, 0.0 }
0x1090   :  { %1960 = vmatmul.f32.vlgmr.msra.gmra.mxu1 %v1902_v27 }
0x1105   :  { %v1899_v28 = vpop.f32.mrf.mxu0 }
0x1106   :  { %v1900_v16 = vadd.f32 %v1899_v28, %v1847_v19  ;;  %v4485_v19 = vld [vmem:[%s6393_s13 + $0x1] ss:$0 sm:$0xff] }
0x1108   :  { %v1905_v30 = vmax.f32 %v1900_v16, 0.0 }
0x110a   :  { %1986 = vmatmul.f32.gmra.mxu2 %v1905_v30 }
0x110b   :  { %v1876_v32 = vpop.f32.mrf.mxu3 }
0x110c   :  { %v1877_v33 = vadd.f32 %v1876_v32, %v1846_v25 }
0x110d   :  { %v1961_v34 = vpop.f32.mrf.mxu1  ;;  %v1984_v39 = vpop.f32.mrf.mxu2 }
0x110e   :  { %v1904_v35 = vmax.f32 %v1877_v33, 0.0  ;;  %v1962_v36 = vadd.f32 %v4484_v29, %v1961_v34 }
0x1110   :  { %v1985_v38 = vadd.f32 %v1984_v39, %v1962_v36  ;;  %1963 = vmatmul.f32.gmra.mxu1 %v1904_v35  ;;  %v4239_v36 = vld [vmem:[%s6384_s4 + $0x4] sm:$0x3] }
0x1112   :  { %v5565_v41 = vadd.f32 %v1985_v38, %v5447_v31  ;;  %v4235_v31 = vld [vmem:[%s6409_s29 + $0x160] sm:$0xff] }
0x1113   :  { %2093 = vmatpush.msrb.mxu3 %v4235_v31  ;;  %v2074_v31 = vperm.slane %v4239_v36, 0 }
0x1114   :  { %v1996_v26 = vsel %vm104_vm0, %v5565_v41, 0.0  ;;  %v2004_v42 = vmul.f32 %v5565_v41, %v5565_v41 }
0x1115   :  { %1997 = vadd.xlane.f32.xlu0 %v1996_v26  ;;  %2094 = vmatpush.msrb.mxu3 %v4233_v23 }
0x1116   :  { %v2006_v43 = vsel %vm104_vm0, %v2004_v42, 0.0 }
0x1117   :  { %2007 = vadd.xlane.f32.xlu2 %v2006_v43  ;;  %2095 = vmatpush.msrb.mxu3 %v4231_v49 }
0x1119   :  { %2096 = vmatpush.msrb.mxu3 %v4229_v51 }
0x111b   :  { %2097 = vmatpush.msrb.mxu3 %v4227_v54 }
0x111d   :  { %2098 = vmatpush.msrb.mxu3 %v4225_v56 }
0x111f   :  { %2099 = vmatpush.msrb.mxu3 %v4223_v15 }
0x1188   :  { %v1998_v37 = vpop.xlane.xlu0 %1997 }
0x1189   :  { %v2002_v59 = vmul.f32 0.015625, %v1998_v37 }
0x118a   :  { %v2008_v60 = vpop.xlane.xlu2 %2007 }
0x118b   :  { %v2014_v61 = vmul.f32 %v2002_v59, %v2002_v59  ;;  %v2012_v52 = vmul.f32 0.015625, %v2008_v60  ;;  %v2018_v18 = vsub.f32 %v5565_v41, %v2002_v59  ;;  %v2075_v41 = vperm.slane %v4239_v36, 1 }
0x118d   :  { %v2016_v62 = vsub.f32 %v2012_v52, %v2014_v61  ;;  %v1964_v63 = vpop.f32.mrf.mxu1  ;;  %v1987_v2 = vpop.f32.mrf.mxu2 }
0x118e   :  { %v1965_v0 = vadd.f32 %v4484_v29, %v1964_v63 }
0x118f   :  { %v2020_v1 = vadd.f32 1e-05, %v2016_v62 }
0x1190   :  { %v1988_v3 = vadd.f32 %v1987_v2, %v1965_v0 }
0x1191   :  { %4575 = vrsqrt.f32 %v2020_v1  ;;  %vm2028_vm15 = vweird.f32 %v2020_v1 }
0x1192   :  { %v1991_v4 = vadd.f32 %v1988_v3, %v5555_v24 }
0x1194   :  { %v1999_v5 = vsel %vm104_vm0, %v1991_v4, 0.0  ;;  %v2005_v6 = vmul.f32 %v1991_v4, %v1991_v4 }
0x1195   :  { %2000 = vadd.xlane.f32.xlu1 %v1999_v5 }
0x1196   :  { %v2009_v7 = vsel %vm104_vm0, %v2005_v6, 0.0 }
0x1197   :  { %v4576_v8 = vpop.eup %4575  ;;  %2010 = vadd.xlane.f32.xlu0 %v2009_v7 }
0x1198   :  { %v2023_v9 = vmul.f32 %v4576_v8, %v2020_v1  ;;  %vm2029_vm14 = vweird.f32 %v4576_v8 }
0x1199   :  { %vm2030_vm6 = vmor %vm2028_vm15, %vm2029_vm14 }
0x119a   :  { %v2024_v10 = vmul.f32 %v4576_v8, %v2023_v9 }
0x119c   :  { %v2025_v11 = vmul.f32 0.5, %v2024_v10 }
0x119e   :  { %v2026_v12 = vsub.f32 1.5, %v2025_v11 }
0x11a0   :  { %v2027_v14 = vmul.f32 %v4576_v8, %v2026_v12 }
0x11a2   :  { %v2031_v20 = vsel %vm2030_vm6, %v4576_v8, %v2027_v14 }
0x11a3   :  { %v2042_v47 = vmul.f32 %v2031_v20, %v2018_v18 }
0x11a5   :  { %v2047_v22 = vmul.f32 %v4485_v19, %v2042_v47 }
0x11a7   :  { %v5630_v24 = vadd.f32 %v4486_v21, %v2047_v22 }
0x11a9   :  { %4240 = vmatmul.msk.f32.vlgmr.msrb.gmra.mxu3 %vm104_vm0, %v5630_v24  ;;  %4242 = vmatmul.msk.f32.vlgmr.msrb.gmra.mxu0 %vm104_vm0, %v5630_v24 }
0x1208   :  { %v2001_v13 = vpop.xlane.xlu1 %2000 }
0x1209   :  { %v2003_v25 = vmul.f32 0.015625, %v2001_v13 }
0x120a   :  { %v2011_v17 = vpop.xlane.xlu0 %2010 }
0x120b   :  { %v2015_v40 = vmul.f32 %v2003_v25, %v2003_v25  ;;  %v2013_v27 = vmul.f32 0.015625, %v2011_v17  ;;  %v2019_v39 = vsub.f32 %v1991_v4, %v2003_v25 }
0x120d   :  { %v2017_v28 = vsub.f32 %v2013_v27, %v2015_v40 }
0x120f   :  { %v2021_v16 = vadd.f32 1e-05, %v2017_v28 }
0x1211   :  { %4577 = vrsqrt.f32 %v2021_v16  ;;  %vm2038_vm8 = vweird.f32 %v2021_v16 }
0x1217   :  { %v4578_v30 = vpop.eup %4577 }
0x1218   :  { %v2033_v29 = vmul.f32 %v4578_v30, %v2021_v16  ;;  %vm2039_vm7 = vweird.f32 %v4578_v30 }
0x1219   :  { %vm2040_vm9 = vmor %vm2038_vm8, %vm2039_vm7 }
0x121a   :  { %v2034_v32 = vmul.f32 %v4578_v30, %v2033_v29 }
0x121c   :  { %v2035_v33 = vmul.f32 0.5, %v2034_v32 }
0x121e   :  { %v2036_v34 = vsub.f32 1.5, %v2035_v33 }
0x1220   :  { %v2037_v35 = vmul.f32 %v4578_v30, %v2036_v34 }
0x1222   :  { %v2041_v38 = vsel %vm2040_vm9, %v4578_v30, %v2037_v35 }
0x1223   :  { %v2043_v26 = vmul.f32 %v2041_v38, %v2019_v39 }
0x1225   :  { %v2048_v42 = vmul.f32 %v4485_v19, %v2043_v26 }
0x1226   :  { %v2124_v43 = vpop.f32.mrf.mxu0 }
0x1227   :  { %v2125_v44 = vadd.f32 %v2124_v43, %v2075_v41  ;;  %v5639_v45 = vadd.f32 %v4486_v21, %v2048_v42 }
0x1229   :  { %2131 = vst.msk [vmem:[#allocation2 + $0x8] sm:$0xff] %vm104_vm0, %v2125_v44  ;;  %4241 = vmatmul.msk.f32.gmra.mxu3 %vm104_vm0, %v5639_v45  ;;  %4243 = vmatmul.msk.f32.gmra.mxu0 %vm104_vm0, %v5639_v45 }
0x122c   :  { %v2101_v46 = vpop.f32.mrf.mxu3 }
0x122d   :  { %v2102_v23 = vadd.f32 %v2101_v46, %v2074_v31 }
0x122f   :  { %2269 = vrot.lane.b32.xlu0 %v2102_v23, %s4660_s24  ;;  %2139 = vrot.lane.b32.xlu2 %v2102_v23, %s4661_s25 }
0x1230   :  { %v5648_v48 = vld [vmem:[#allocation2 + $0x8] sm:$0xff] }
0x1231   :  { %2232 = vmatpush.msrb.mxu1 %v5648_v48 }
0x1237   :  { %2417 = vrot.lane.b32.xlu0 %v2102_v23, %s4664_s28  ;;  %2267 = vrot.lane.b32.xlu2 %v2102_v23, %s4662_s26 }
0x123f   :  { %2563 = vrot.lane.b32.xlu0 %v2102_v23, %s6410_s18  ;;  %2565 = vrot.lane.b32.xlu2 %v2102_v23, %s6404_s0 }
0x1289   :  { %v2140_v49 = vpop.permute.xlu2 %2139 }
0x128a   :  { %4244 = vmatpush.xpose.msk.msra.mxu3 %vm168_vm1, %v2140_v49 }
0x128d   :  { %4245 = vmatmul.msk.f32.vlgmr.msra.gmra.mxu3 %vm168_vm1, %v2102_v23 }
0x1291   :  { %v2268_v37 = vpop.permute.xlu2 %2267 }
0x1299   :  { %v2566_v60 = vpop.permute.xlu2 %2565 }
0x12a1   :  { %v2270_v15 = vpop.permute.xlu0 %2269 }
0x12a6   :  { %v2127_v50 = vpop.f32.mrf.mxu0 }
0x12a7   :  { %v2128_v51 = vadd.f32 %v2127_v50, %v2075_v41 }
0x12a9   :  { %2133 = vst.msk [vmem:[#allocation2 + $0x18] sm:$0xff] %vm104_vm0, %v2128_v51  ;;  %v2418_v59 = vpop.permute.xlu0 %2417 }
0x12ac   :  { %v2104_v53 = vpop.f32.mrf.mxu3 }
0x12ad   :  { %v2105_v54 = vadd.f32 %v2104_v53, %v2074_v31 }
0x12af   :  { %2166 = vrot.lane.b32.xlu1 %v2105_v54, %s4661_s25  ;;  %2446 = vrot.lane.b32.xlu0 %v2105_v54, %s4664_s28 }
0x12b0   :  { %v5660_v55 = vld [vmem:[#allocation2 + $0x18] sm:$0xff] }
0x12b1   :  { %2255 = vmatpush.msrb.mxu3 %v5660_v55  ;;  %v2564_v52 = vpop.permute.xlu0 %2563 }
0x12b7   :  { %2415 = vrot.lane.b32.xlu1 %v2102_v23, %s6411_s19 }
0x1310   :  { %v2162_v56 = vpop.f32.mrf.mxu3 }
0x1311   :  { %v2192_v57 = vsel %vm220_vm2, %v2162_v56, -inf }
0x1312   :  { %2193 = vmax.xlane.f32.xlu1 %v2192_v57 }
0x1321   :  { %v2167_v58 = vpop.permute.xlu1 %2166  ;;  %v2447_v18 = vpop.permute.xlu0 %2446 }
0x1322   :  { %4246 = vmatpush.xpose.msk.msra.mxu0 %vm168_vm1, %v2167_v58 }
0x1325   :  { %4247 = vmatmul.msk.f32.vlgmr.msra.gmra.mxu0 %vm168_vm1, %v2105_v54 }
0x1326   :  { %4250 = vmatpush.xpose.msk.msrb.mxu0 %vm168_vm1, %v2270_v15 }
0x1329   :  { %v2416_v61 = vpop.permute.xlu1 %2415 }
0x132a   :  { %4256 = vmatpush.xpose.msk.msra.mxu0 %vm168_vm1, %v2418_v59 }
0x132b   :  { %2298 = vrot.lane.b32.xlu1 %v2105_v54, %s4660_s24 }
0x132d   :  { %4251 = vmatmul.msk.f32.vlgmr.msrb.gmra.mxu0 %vm168_vm1, %v2268_v37 }
0x132e   :  { %4262 = vmatpush.xpose.msk.msrb.mxu0 %vm168_vm1, %v2566_v60 }
0x1333   :  { %2444 = vrot.lane.b32.xlu1 %v2105_v54, %s6411_s19 }
0x1335   :  { %4257 = vmatmul.msk.f32.vlgmr.msra.gmra.mxu0 %vm168_vm1, %v2416_v61 }
0x133b   :  { %2592 = vrot.lane.b32.xlu1 %v2105_v54, %s6410_s18 }
0x133d   :  { %4263 = vmatmul.msk.f32.vlgmr.msrb.gmra.mxu0 %vm168_vm1, %v2564_v52 }
0x1385   :  { %v2194_v62 = vpop.xlane.xlu1 %2193 }
0x1386   :  { %v2198_v63 = vsub.f32 %v2162_v56, %v2194_v62 }
0x1388   :  { %v2200_v0 = vmul.f32 1.442695, %v2198_v63 }
0x138a   :  { %4579 = vpow2.f32 %v2200_v0 }
0x1390   :  { %v4580_v1 = vpop.eup %4579 }
0x1391   :  { %v2204_v2 = vsel %vm220_vm2, %v4580_v1, 0.0 }
0x1392   :  { %2205 = vadd.xlane.f32.xlu2 %v2204_v2 }
0x139d   :  { %v2299_v3 = vpop.permute.xlu1 %2298 }
0x139e   :  { %4252 = vmatpush.xpose.msk.msra.mxu1 %vm168_vm1, %v2299_v3 }
0x13a2   :  { %v5678_v4 = vpop.f32.mrf.mxu0 }
0x13a3   :  { %v2195_v38 = vsel %vm220_vm2, %v5678_v4, -inf }
0x13a5   :  { %v2445_v20 = vpop.permute.xlu1 %2444 }
0x13aa   :  { %2296 = vrot.lane.b32.xlu2 %v2105_v54, %s4662_s26  ;;  %v2292_v5 = vpop.f32.mrf.mxu0 }
0x13ab   :  { %v2324_v6 = vsel %vm220_vm2, %v2292_v5, -inf }
0x13ac   :  { %2325 = vmax.xlane.f32.xlu0 %v2324_v6 }
0x13ad   :  { %v2593_v29 = vpop.permute.xlu1 %2592 }
0x13b2   :  { %v2440_v7 = vpop.f32.mrf.mxu0 }
0x13b3   :  { %v2472_v8 = vsel %vm220_vm2, %v2440_v7, -inf }
0x13b4   :  { %2473 = vmax.xlane.f32.xlu0 %v2472_v8 }
0x13ba   :  { %v2588_v9 = vpop.f32.mrf.mxu0 }
0x13bb   :  { %v2620_v10 = vsel %vm220_vm2, %v2588_v9, -inf }
0x13c8   :  { %2594 = vrot.lane.b32.xlu0 %v2105_v54, %s6404_s0 }
0x13d3   :  { %2621 = vmax.xlane.f32.xlu2 %v2620_v10 }
0x13eb   :  { %2347 = vrot.lane.b32.xlu2 %v5648_v48, %s4662_s26 }
0x13f3   :  { %2643 = vrot.lane.b32.xlu2 %v5648_v48, %s6410_s18 }
0x1405   :  { %v2206_v11 = vpop.xlane.xlu2 %2205 }
0x1406   :  { %4581 = vrcp.f32 %v2206_v11 }
0x140c   :  { %v4582_v12 = vpop.eup %4581 }
0x140d   :  { %v2212_v14 = vmul.f32 %v4582_v12, %v4580_v1  ;;  %v2297_v19 = vpop.permute.xlu2 %2296 }
0x140f   :  { %4248 = vmatmul.msk.f32.vlgmr.msrb.gmra.mxu1 %vm220_vm2, %v2212_v14 }
0x1410   :  { %4258 = vmatpush.xpose.msk.msrb.mxu1 %vm168_vm1, %v2447_v18 }
0x1417   :  { %4253 = vmatmul.msk.f32.vlgmr.msra.gmra.mxu1 %vm168_vm1, %v2297_v19 }
0x141f   :  { %v2326_v47 = vpop.xlane.xlu0 %2325  ;;  %4259 = vmatmul.msk.f32.vlgmr.msrb.gmra.mxu1 %vm168_vm1, %v2445_v20 }
0x1420   :  { %v2330_v21 = vsub.f32 %v2292_v5, %v2326_v47 }
0x1422   :  { %v2332_v22 = vmul.f32 1.442695, %v2330_v21 }
0x1424   :  { %4583 = vpow2.f32 %v2332_v22 }
0x1427   :  { %v2474_v13 = vpop.xlane.xlu0 %2473 }
0x1428   :  { %v2478_v25 = vsub.f32 %v2440_v7, %v2474_v13 }
0x142a   :  { %v4584_v17 = vpop.eup %4583  ;;  %v2480_v40 = vmul.f32 1.442695, %v2478_v25 }
0x142b   :  { %v2336_v27 = vsel %vm220_vm2, %v4584_v17, 0.0 }
0x142c   :  { %4585 = vpow2.f32 %v2480_v40  ;;  %2337 = vadd.xlane.f32.xlu0 %v2336_v27  ;;  %v4275_v40 = vld [vmem:[%s6386_s5 + $0xb8] sm:$0xff]  ;;  %v4274_v27 = vld [vmem:[%s6386_s5 + $0xb0] sm:$0xff] }
0x142d   :  { %2736 = vmatpush.msra.mxu0 %v4275_v40 }
0x142f   :  { %2737 = vmatpush.msra.mxu0 %v4274_v27 }
0x1432   :  { %v4586_v28 = vpop.eup %4585 }
0x1433   :  { %v2484_v16 = vsel %vm220_vm2, %v4586_v28, 0.0 }
0x1434   :  { %2485 = vadd.xlane.f32.xlu1 %v2484_v16 }
0x143a   :  { %v2595_v30 = vpop.permute.xlu0 %2594 }
0x143b   :  { %4264 = vmatpush.xpose.msk.msra.mxu1 %vm168_vm1, %v2595_v30 }
0x143e   :  { %4265 = vmatmul.msk.f32.vlgmr.msra.gmra.mxu1 %vm168_vm1, %v2593_v29  ;;  %v4271_v29 = vld [vmem:[%s6386_s5 + $0x98] sm:$0xff] }
0x1446   :  { %v2622_v32 = vpop.xlane.xlu2 %2621 }
0x1447   :  { %v2626_v33 = vsub.f32 %v2588_v9, %v2622_v32  ;;  %v4270_v32 = vld [vmem:[%s6386_s5 + $0x90] sm:$0xff] }
0x1449   :  { %v2628_v34 = vmul.f32 1.442695, %v2626_v33  ;;  %v4269_v33 = vld [vmem:[%s6386_s5 + $0x88] sm:$0xff] }
0x144b   :  { %4587 = vpow2.f32 %v2628_v34  ;;  %v4268_v34 = vld [vmem:[%s6386_s5 + $0x80] sm:$0xff] }
0x144d   :  { %2495 = vrot.lane.b32.xlu1 %v5648_v48, %s6411_s19 }
0x144e   :  { %v2348_v35 = vpop.permute.xlu2 %2347 }
0x144f   :  { %2368 = vmatpush.msrb.mxu2 %v2348_v35 }
0x1451   :  { %v4588_v36 = vpop.eup %4587 }
0x1452   :  { %v2632_v39 = vsel %vm220_vm2, %v4588_v36, 0.0 }
0x1453   :  { %2633 = vadd.xlane.f32.xlu0 %v2632_v39 }
0x1456   :  { %v2644_v53 = vpop.permute.xlu2 %2643 }
0x145b   :  { %2196 = vmax.xlane.f32.xlu0 %v2195_v38 }
0x148c   :  { %v2234_v41 = vpop.f32.mrf.mxu1 }
0x148d   :  { %2260 = vst.msk [vmem:[#allocation3] sm:$0xff] %vm168_vm1, %v2234_v41 }
0x1494   :  { %v2321_v26 = vpop.f32.mrf.mxu1 }
0x1495   :  { %v2327_v42 = vsel %vm220_vm2, %v2321_v26, -inf }
0x1496   :  { %2328 = vmax.xlane.f32.xlu2 %v2327_v42 }
0x149c   :  { %v2469_v43 = vpop.f32.mrf.mxu1 }
0x149d   :  { %v2475_v44 = vsel %vm220_vm2, %v2469_v43, -inf }
0x149e   :  { %2476 = vmax.xlane.f32.xlu0 %v2475_v44 }
0x149f   :  { %v2338_v31 = vpop.xlane.xlu0 %2337 }
0x14a0   :  { %4589 = vrcp.f32 %v2338_v31 }
0x14a6   :  { %v4590_v46 = vpop.eup %4589 }
0x14a7   :  { %v2344_v23 = vmul.f32 %v4590_v46, %v4584_v17  ;;  %v2486_v48 = vpop.xlane.xlu1 %2485 }
0x14a8   :  { %4591 = vrcp.f32 %v2486_v48  ;;  %v5760_v48 = vld [vmem:[%s6385_s6 + $0x2] ss:$0 sm:$0xff] }
0x14a9   :  { %4254 = vmatmul.msk.f32.vlgmr.msrb.gmra.mxu2 %vm220_vm2, %v2344_v23 }
0x14ae   :  { %v4592_v49 = vpop.eup %4591 }
0x14af   :  { %v2492_v50 = vmul.f32 %v4592_v49, %v4586_v28  ;;  %v4273_v28 = vld [vmem:[%s6386_s5 + $0xa8] sm:$0xff] }
0x14b0   :  { %2738 = vmatpush.msra.mxu0 %v4273_v28  ;;  %v5829_v28 = vld [vmem:[%s6387_s11 + $0x2] ss:$0 sm:$0xff] }
0x14b2   :  { %2374 = vrot.lane.b32.xlu0 %v5660_v55, %s4662_s26 }
0x14bb   :  { %v2617_v59 = vpop.f32.mrf.mxu1 }
0x14bc   :  { %v2623_v52 = vsel %vm220_vm2, %v2617_v59, -inf }
0x14bf   :  { %v2496_v51 = vpop.permute.xlu1 %2495 }
0x14c0   :  { %2516 = vmatpush.msra.mxu2 %v2496_v51 }
0x14c1   :  { %4260 = vmatmul.msk.f32.vlgmr.msra.gmra.mxu2 %vm220_vm2, %v2492_v50 }
0x14c2   :  { %2664 = vmatpush.msrb.mxu2 %v2644_v53 }
0x14c6   :  { %v2634_v54 = vpop.xlane.xlu0 %2633 }
0x14c7   :  { %4593 = vrcp.f32 %v2634_v54 }
0x14cd   :  { %v4594_v56 = vpop.eup %4593 }
0x14ce   :  { %v2640_v57 = vmul.f32 %v4594_v56, %v4588_v36  ;;  %v2197_v15 = vpop.xlane.xlu0 %2196 }
0x14cf   :  { %v2199_v58 = vsub.f32 %v5678_v4, %v2197_v15 }
0x14d0   :  { %4266 = vmatmul.msk.f32.vlgmr.msrb.gmra.mxu2 %vm220_vm2, %v2640_v57 }
0x14d1   :  { %v2202_v37 = vmul.f32 1.442695, %v2199_v58 }
0x14d3   :  { %4595 = vpow2.f32 %v2202_v37 }
0x14d9   :  { %v4596_v60 = vpop.eup %4595 }
0x14da   :  { %v2207_v61 = vsel %vm220_vm2, %v4596_v60, 0.0 }
0x14db   :  { %2208 = vadd.xlane.f32.xlu1 %v2207_v61  ;;  %v4296_v61 = vld [vmem:[%s6389_s7 + $0x178] sm:$0xff] }
0x14dc   :  { %2624 = vmax.xlane.f32.xlu0 %v2623_v52  ;;  %2876 = vmatpush.msra.mxu2 %v4296_v61  ;;  %v4293_v52 = vld [vmem:[%s6389_s7 + $0x160] sm:$0xff] }
0x1509   :  { %v2329_v62 = vpop.xlane.xlu2 %2328 }
0x150a   :  { %v2331_v63 = vsub.f32 %v2321_v26, %v2329_v62  ;;  %v4294_v62 = vld [vmem:[%s6389_s7 + $0x168] sm:$0xff] }
0x150b   :  { %2877 = vmatpush.msra.mxu2 %v4294_v62  ;;  %v4304_v62 = vld [vmem:[%s6390_s9 + $0x210] sm:$0xff] }
0x150c   :  { %v2334_v0 = vmul.f32 1.442695, %v2331_v63  ;;  %v4291_v63 = vld [vmem:[%s6389_s7 + $0x150] sm:$0xff] }
0x150e   :  { %4597 = vpow2.f32 %v2334_v0  ;;  %v4292_v0 = vld [vmem:[%s6389_s7 + $0x158] sm:$0xff] }
0x150f   :  { %2878 = vmatpush.msra.mxu2 %v4292_v0  ;;  %v4302_v0 = vld [vmem:[%s6390_s9 + $0x200] sm:$0xff] }
0x1511   :  { %v2477_v1 = vpop.xlane.xlu0 %2476 }
0x1512   :  { %v2479_v2 = vsub.f32 %v2469_v43, %v2477_v1  ;;  %v4289_v1 = vld [vmem:[%s6389_s7 + $0x140] sm:$0xff] }
0x1514   :  { %v4598_v3 = vpop.eup %4597  ;;  %v2482_v4 = vmul.f32 1.442695, %v2479_v2  ;;  %v4290_v2 = vld [vmem:[%s6389_s7 + $0x148] sm:$0xff] }
0x1515   :  { %v2339_v5 = vsel %vm220_vm2, %v4598_v3, 0.0  ;;  %2879 = vmatpush.msra.mxu2 %v4290_v2  ;;  %v4320_v2 = vld [vmem:[%s6390_s9 + $0x290] sm:$0xff] }
0x1516   :  { %4599 = vpow2.f32 %v2482_v4  ;;  %2340 = vadd.xlane.f32.xlu0 %v2339_v5  ;;  %v4288_v4 = vld [vmem:[%s6389_s7 + $0x138] sm:$0xff] }
0x1517   :  { %2880 = vmatpush.msra.mxu2 %v4288_v4  ;;  %v4318_v4 = vld [vmem:[%s6390_s9 + $0x280] sm:$0xff] }
0x151c   :  { %v4600_v6 = vpop.eup %4599 }
0x151d   :  { %v2487_v7 = vsel %vm220_vm2, %v4600_v6, 0.0 }
0x151e   :  { %2488 = vadd.xlane.f32.xlu0 %v2487_v7  ;;  %v4286_v7 = vld [vmem:[%s6389_s7 + $0x128] sm:$0xff] }
0x151f   :  { %2881 = vmatpush.msra.mxu2 %v4286_v7 }
0x1524   :  { %v2375_v8 = vpop.permute.xlu0 %2374 }
0x1525   :  { %2395 = vmatpush.msra.mxu3 %v2375_v8  ;;  %v4283_v8 = vld [vmem:[%s6389_s7 + $0x110] sm:$0xff] }
0x152c   :  { %v2370_v9 = vpop.f32.mrf.mxu2 }
0x152d   :  { %2402 = vrot.lane.b32.xlu1 %v2370_v9, %s6404_s0  ;;  %v4284_v9 = vld [vmem:[%s6389_s7 + $0x118] sm:$0xff] }
0x152e   :  { %2882 = vmatpush.msra.mxu2 %v4284_v9 }
0x1532   :  { %2670 = vrot.lane.b32.xlu0 %v5660_v55, %s6410_s18 }
0x1544   :  { %v2518_v10 = vpop.f32.mrf.mxu2 }
0x1545   :  { %2550 = vrot.lane.b32.xlu0 %v2518_v10, %s4664_s28  ;;  %v4281_v10 = vld [vmem:[%s6389_s7 + $0x100] sm:$0xff] }
0x154e   :  { %v2209_v11 = vpop.xlane.xlu1 %2208 }
0x154f   :  { %4601 = vrcp.f32 %v2209_v11  ;;  %v2625_v12 = vpop.xlane.xlu0 %2624  ;;  %v4282_v11 = vld [vmem:[%s6389_s7 + $0x108] sm:$0xff] }
0x1550   :  { %v2627_v14 = vsub.f32 %v2617_v59, %v2625_v12  ;;  %2883 = vmatpush.msra.mxu2 %v4282_v11 }
0x1552   :  { %v2630_v18 = vmul.f32 1.442695, %v2627_v14 }
0x1553   :  { %v2666_v19 = vpop.f32.mrf.mxu2 }
0x1554   :  { %4603 = vpow2.f32 %v2630_v18  ;;  %2698 = vrot.lane.b32.xlu0 %v2666_v19, %s4660_s24 }
0x1555   :  { %v4602_v20 = vpop.eup %4601 }
0x1556   :  { %v2213_v47 = vmul.f32 %v4602_v20, %v4596_v60  ;;  %v4295_v60 = vld [vmem:[%s6389_s7 + $0x170] sm:$0xff] }
0x1557   :  { %2853 = vmatpush.msrb.mxu1 %v4295_v60 }
0x1558   :  { %4249 = vmatmul.msk.f32.vlgmr.msrb.gmra.mxu3 %vm220_vm2, %v2213_v47 }
0x1559   :  { %2854 = vmatpush.msrb.mxu1 %v4293_v52 }
0x155a   :  { %v4604_v21 = vpop.eup %4603 }
0x155b   :  { %v2635_v22 = vsel %vm220_vm2, %v4604_v21, 0.0  ;;  %2855 = vmatpush.msrb.mxu1 %v4291_v63  ;;  %v4323_v63 = vld [vmem:[%s6390_s9 + $0x2a8] sm:$0xff] }
0x155c   :  { %2636 = vadd.xlane.f32.xlu2 %v2635_v22 }
0x155d   :  { %2856 = vmatpush.msrb.mxu1 %v4289_v1  ;;  %v4321_v1 = vld [vmem:[%s6390_s9 + $0x298] sm:$0xff] }
0x1574   :  { %2522 = vrot.lane.b32.xlu2 %v5660_v55, %s6411_s19  ;;  %v4272_v55 = vld [vmem:[%s6386_s5 + $0xa0] sm:$0xff] }
0x1575   :  { %2739 = vmatpush.msra.mxu0 %v4272_v55 }
0x1577   :  { %2740 = vmatpush.msra.mxu0 %v4271_v29 }
0x1579   :  { %2741 = vmatpush.msra.mxu0 %v4270_v32 }
0x157b   :  { %2742 = vmatpush.msra.mxu0 %v4269_v33  ;;  %v4317_v33 = vld [vmem:[%s6390_s9 + $0x278] sm:$0xff] }
0x157d   :  { %2743 = vmatpush.msra.mxu0 %v4268_v34  ;;  %v4316_v34 = vld [vmem:[%s6390_s9 + $0x270] sm:$0xff] }
0x1589   :  { %v2341_v13 = vpop.xlane.xlu0 %2340 }
0x158a   :  { %4605 = vrcp.f32 %v2341_v13 }
0x1590   :  { %v4606_v25 = vpop.eup %4605 }
0x1591   :  { %v2345_v17 = vmul.f32 %v4606_v25, %v4598_v3  ;;  %v2489_v30 = vpop.xlane.xlu0 %2488  ;;  %v4287_v3 = vld [vmem:[%s6389_s7 + $0x130] sm:$0xff] }
0x1592   :  { %4607 = vrcp.f32 %v2489_v30  ;;  %2857 = vmatpush.msrb.mxu1 %v4287_v3  ;;  %v5834_v30 = vld [vmem:[%s6388_s12 + $0x2] ss:$0 sm:$0xff]  ;;  %v4319_v3 = vld [vmem:[%s6390_s9 + $0x288] sm:$0xff] }
0x1593   :  { %4255 = vmatmul.msk.f32.vlgmr.msra.gmra.mxu3 %vm220_vm2, %v2345_v17 }
0x1598   :  { %v4608_v26 = vpop.eup %4607 }
0x1599   :  { %v2493_v42 = vmul.f32 %v4608_v26, %v4600_v6  ;;  %v4285_v6 = vld [vmem:[%s6389_s7 + $0x120] sm:$0xff] }
0x159a   :  { %2858 = vmatpush.msrb.mxu1 %v4285_v6  ;;  %v4330_v26 = vld [vmem:[%s6390_s9 + $0x2e0] sm:$0xff] }
0x159c   :  { %2859 = vmatpush.msrb.mxu1 %v4283_v8 }
0x159e   :  { %2860 = vmatpush.msrb.mxu1 %v4281_v10 }
0x159f   :  { %v2403_v16 = vpop.permute.xlu1 %2402 }
0x15a0   :  { %2408 = vst.msk [vmem:[#allocation3] sm:$0xff] %vm437_vm3, %v2403_v16 }
0x15a4   :  { %v2671_v35 = vpop.permute.xlu0 %2670 }
0x15b7   :  { %v2551_v36 = vpop.permute.xlu0 %2550 }
0x15b8   :  { %2556 = vst.msk [vmem:[#allocation3] sm:$0xff] %vm586_vm4, %v2551_v36  ;;  %v4315_v36 = vld [vmem:[%s6390_s9 + $0x268] sm:$0xff] }
0x15c6   :  { %v2699_v39 = vpop.permute.xlu0 %2698 }
0x15c7   :  { %2704 = vst.msk [vmem:[#allocation3] sm:$0xff] %vm735_vm5, %v2699_v39  ;;  %v4332_v39 = vld [vmem:[%s6390_s9 + $0x2f0] sm:$0xff] }
0x15ce   :  { %v2706_v38 = vld [vmem:[#allocation3] sm:$0xff] }
0x15cf   :  { %4277 = vmatmul.msk.f32.vlgmr.msra.gmra.mxu0 %vm104_vm0, %v2706_v38  ;;  %v2637_v41 = vpop.xlane.xlu2 %2636  ;;  %v4331_v38 = vld [vmem:[%s6390_s9 + $0x2e8] sm:$0xff] }
0x15d0   :  { %4609 = vrcp.f32 %v2637_v41  ;;  %v4314_v41 = vld [vmem:[%s6390_s9 + $0x260] sm:$0xff] }
0x15d6   :  { %v4610_v31 = vpop.eup %4609 }
0x15d7   :  { %v2523_v43 = vpop.permute.xlu2 %2522  ;;  %v2641_v46 = vmul.f32 %v4610_v31, %v4604_v21  ;;  %v4328_v31 = vld [vmem:[%s6390_s9 + $0x2d0] sm:$0xff] }
0x15d8   :  { %2543 = vmatpush.msrb.mxu3 %v2523_v43  ;;  %v4329_v43 = vld [vmem:[%s6390_s9 + $0x2d8] sm:$0xff] }
0x15d9   :  { %4261 = vmatmul.msk.f32.vlgmr.msrb.gmra.mxu3 %vm220_vm2, %v2493_v42  ;;  %v4313_v42 = vld [vmem:[%s6390_s9 + $0x258] sm:$0xff] }
0x15da   :  { %2691 = vmatpush.msra.mxu3 %v2671_v35  ;;  %v4333_v35 = vld [vmem:[%s6390_s9 + $0x2f8] sm:$0xff] }
0x15db   :  { %v2257_v44 = vpop.f32.mrf.mxu3  ;;  %2956 = vmatpush.msrb.mxu0 %v4333_v35 }
0x15dc   :  { %2261 = vst.msk [vmem:[#allocation3 + $0x8] sm:$0xff] %vm168_vm1, %v2257_v44  ;;  %2933 = vmatpush.msrb.mxu3 %v4317_v33  ;;  %v4312_v44 = vld [vmem:[%s6390_s9 + $0x250] sm:$0xff] }
0x15dd   :  { %2957 = vmatpush.msrb.mxu0 %v4332_v39  ;;  %v5958_v39 = vld [vmem:[%s6391_s10 + $0x2] ss:$0 sm:$0xff] }
0x15de   :  { %2934 = vmatpush.msrb.mxu3 %v4316_v34 }
0x15df   :  { %2958 = vmatpush.msrb.mxu0 %v4331_v38 }
0x15e0   :  { %2935 = vmatpush.msrb.mxu3 %v4315_v36 }
0x15e1   :  { %4267 = vmatmul.msk.f32.vlgmr.msra.gmra.mxu3 %vm220_vm2, %v2641_v46  ;;  %2959 = vmatpush.msrb.mxu0 %v4330_v26  ;;  %v4311_v46 = vld [vmem:[%s6390_s9 + $0x248] sm:$0xff] }
0x15e2   :  { %2936 = vmatpush.msrb.mxu3 %v4314_v41 }
0x15e3   :  { %2960 = vmatpush.msrb.mxu0 %v4329_v43 }
0x15e4   :  { %2937 = vmatpush.msrb.mxu3 %v4313_v42 }
0x15e5   :  { %2961 = vmatpush.msrb.mxu0 %v4328_v31 }
0x15e6   :  { %2938 = vmatpush.msrb.mxu3 %v4312_v44 }
0x15e8   :  { %2939 = vmatpush.msrb.mxu3 %v4311_v46 }
0x1616   :  { %v2397_v23 = vpop.f32.mrf.mxu3 }
0x1617   :  { %2404 = vrot.lane.b32.xlu2 %v2397_v23, %s6404_s0  ;;  %v4327_v23 = vld [vmem:[%s6390_s9 + $0x2c8] sm:$0xff] }
0x1618   :  { %2962 = vmatpush.msrb.mxu0 %v4327_v23 }
0x164c   :  { %v2745_v49 = vpop.f32.mrf.mxu0 }
0x164d   :  { %v2746_v50 = vadd.f32 %v5760_v48, %v2745_v49  ;;  %v4310_v49 = vld [vmem:[%s6390_s9 + $0x240] sm:$0xff] }
0x164e   :  { %2940 = vmatpush.msrb.mxu3 %v4310_v49 }
0x164f   :  { %v5764_v51 = vadd.f32 %v2746_v50, %v5630_v24  ;;  %v4326_v50 = vld [vmem:[%s6390_s9 + $0x2c0] sm:$0xff] }
0x1650   :  { %2963 = vmatpush.msrb.mxu0 %v4326_v50 }
0x1651   :  { %v2757_v53 = vsel %vm104_vm0, %v5764_v51, 0.0  ;;  %v2765_v15 = vmul.f32 %v5764_v51, %v5764_v51 }
0x1652   :  { %2758 = vadd.xlane.f32.xlu2 %v2757_v53  ;;  %v4325_v53 = vld [vmem:[%s6390_s9 + $0x2b8] sm:$0xff] }
0x1653   :  { %v2767_v58 = vsel %vm104_vm0, %v2765_v15, 0.0  ;;  %2964 = vmatpush.msrb.mxu0 %v4325_v53  ;;  %v4306_v15 = vld [vmem:[%s6390_s9 + $0x220] sm:$0xff]  ;;  %v4352_v53 = vld [vmem:[%s6409_s29 + $0x1f8] sm:$0xff] }
0x1654   :  { %3104 = vmatpush.msrb.mxu2 %v4352_v53 }
0x165c   :  { %v2545_v54 = vpop.f32.mrf.mxu3 }
0x165d   :  { %2552 = vrot.lane.b32.xlu0 %v2545_v54, %s4664_s28  ;;  %v4308_v54 = vld [vmem:[%s6390_s9 + $0x230] sm:$0xff] }
0x1664   :  { %v2693_v56 = vpop.f32.mrf.mxu3 }
0x1665   :  { %2700 = vrot.lane.b32.xlu1 %v2693_v56, %s4660_s24  ;;  %v4324_v56 = vld [vmem:[%s6390_s9 + $0x2b0] sm:$0xff] }
0x1666   :  { %2965 = vmatpush.msrb.mxu0 %v4324_v56  ;;  %v4350_v56 = vld [vmem:[%s6409_s29 + $0x1e8] sm:$0xff] }
0x1667   :  { %3105 = vmatpush.msrb.mxu2 %v4350_v56 }
0x1668   :  { %2966 = vmatpush.msrb.mxu0 %v4323_v63  ;;  %v4337_v63 = vld [vmem:[%s6409_s29 + $0x180] sm:$0xff] }
0x1671   :  { %v2405_v57 = vpop.permute.xlu2 %2404 }
0x1672   :  { %2409 = vst.msk [vmem:[#allocation3 + $0x8] sm:$0xff] %vm437_vm3, %v2405_v57  ;;  %v4307_v57 = vld [vmem:[%s6390_s9 + $0x228] sm:$0xff] }
0x1687   :  { %2768 = vadd.xlane.f32.xlu0 %v2767_v58  ;;  %v4305_v58 = vld [vmem:[%s6390_s9 + $0x218] sm:$0xff] }
0x16c5   :  { %v2759_v5 = vpop.xlane.xlu2 %2758 }
0x16c6   :  { %v2763_v12 = vmul.f32 0.015625, %v2759_v5  ;;  %v4297_v5 = vld [vmem:[%s6392_s8 + $0x4] sm:$0x3] }
0x16c7   :  { %v2835_v6 = vperm.slane %v4297_v5, 0  ;;  %v2836_v10 = vperm.slane %v4297_v5, 1 }
0x16c8   :  { %v2775_v18 = vmul.f32 %v2763_v12, %v2763_v12  ;;  %v2779_v27 = vsub.f32 %v5764_v51, %v2763_v12  ;;  %v4309_v51 = vld [vmem:[%s6390_s9 + $0x238] sm:$0xff] }
0x16c9   :  { %2941 = vmatpush.msrb.mxu3 %v4309_v51 }
0x16cb   :  { %2942 = vmatpush.msrb.mxu3 %v4308_v54  ;;  %v4349_v54 = vld [vmem:[%s6409_s29 + $0x1e0] sm:$0xff] }
0x16cd   :  { %2943 = vmatpush.msrb.mxu3 %v4307_v57  ;;  %v4347_v57 = vld [vmem:[%s6409_s29 + $0x1d0] sm:$0xff] }
0x16cf   :  { %v2553_v24 = vpop.permute.xlu0 %2552  ;;  %2944 = vmatpush.msrb.mxu3 %v4306_v15  ;;  %v4348_v15 = vld [vmem:[%s6409_s29 + $0x1d8] sm:$0xff] }
0x16d0   :  { %2557 = vst.msk [vmem:[#allocation3 + $0x8] sm:$0xff] %vm586_vm4, %v2553_v24  ;;  %3106 = vmatpush.msrb.mxu2 %v4348_v15 }
0x16d1   :  { %2945 = vmatpush.msrb.mxu3 %v4305_v58  ;;  %v4345_v58 = vld [vmem:[%s6409_s29 + $0x1c0] sm:$0xff] }
0x16d3   :  { %2946 = vmatpush.msrb.mxu3 %v4304_v62  ;;  %v4340_v62 = vld [vmem:[%s6409_s29 + $0x198] sm:$0xff] }
0x16d7   :  { %v2701_v37 = vpop.permute.xlu1 %2700 }
0x16d8   :  { %2705 = vst.msk [vmem:[#allocation3 + $0x8] sm:$0xff] %vm735_vm5, %v2701_v37 }
0x16df   :  { %v2707_v59 = vld [vmem:[#allocation3 + $0x8] sm:$0xff] }
0x16e0   :  { %4278 = vmatmul.msk.f32.gmra.mxu0 %vm104_vm0, %v2707_v59 }
0x16fa   :  { %v2769_v14 = vpop.xlane.xlu0 %2768 }
0x16fb   :  { %v2773_v19 = vmul.f32 0.015625, %v2769_v14 }
0x16fd   :  { %v2777_v20 = vsub.f32 %v2773_v19, %v2775_v18 }
0x16ff   :  { %v2781_v47 = vadd.f32 1e-05, %v2777_v20 }
0x1701   :  { %4611 = vrsqrt.f32 %v2781_v47  ;;  %vm2789_vm11 = vweird.f32 %v2781_v47 }
0x1707   :  { %v4612_v21 = vpop.eup %4611 }
0x1708   :  { %v2784_v22 = vmul.f32 %v4612_v21, %v2781_v47  ;;  %vm2790_vm10 = vweird.f32 %v4612_v21 }
0x1709   :  { %vm2791_vm12 = vmor %vm2789_vm11, %vm2790_vm10 }
0x170a   :  { %v2785_v13 = vmul.f32 %v4612_v21, %v2784_v22 }
0x170c   :  { %v2786_v25 = vmul.f32 0.5, %v2785_v13 }
0x170e   :  { %v2787_v17 = vsub.f32 1.5, %v2786_v25 }
0x1710   :  { %v2788_v40 = vmul.f32 %v4612_v21, %v2787_v17 }
0x1712   :  { %v2792_v55 = vsel %vm2791_vm12, %v4612_v21, %v2788_v40 }
0x1713   :  { %v2803_v16 = vmul.f32 %v2792_v55, %v2779_v27 }
0x1715   :  { %v2808_v29 = vmul.f32 %v5829_v28, %v2803_v16 }
0x1717   :  { %v5838_v32 = vadd.f32 %v5834_v30, %v2808_v29 }
0x1719   :  { %4298 = vmatmul.msk.f32.vlgmr.msrb.gmra.mxu1 %vm104_vm0, %v5838_v32  ;;  %4300 = vmatmul.msk.f32.vlgmr.msra.gmra.mxu2 %vm104_vm0, %v5838_v32 }
0x175d   :  { %v2748_v24 = vpop.f32.mrf.mxu0 }
0x175e   :  { %v2749_v37 = vadd.f32 %v5760_v48, %v2748_v24  ;;  %v4322_v48 = vld [vmem:[%s6390_s9 + $0x2a0] sm:$0xff]  ;;  %v4346_v24 = vld [vmem:[%s6409_s29 + $0x1c8] sm:$0xff] }
0x175f   :  { %2967 = vmatpush.msrb.mxu0 %v4322_v48  ;;  %3107 = vmatpush.msrb.mxu2 %v4346_v24 }
0x1760   :  { %v2752_v59 = vadd.f32 %v2749_v37, %v5639_v45  ;;  %v4303_v45 = vld [vmem:[%s6390_s9 + $0x208] sm:$0xff]  ;;  %v4343_v37 = vld [vmem:[%s6409_s29 + $0x1b0] sm:$0xff] }
0x1761   :  { %2947 = vmatpush.msrb.mxu3 %v4303_v45  ;;  %2968 = vmatpush.msrb.mxu0 %v4321_v1  ;;  %v4338_v45 = vld [vmem:[%s6409_s29 + $0x188] sm:$0xff] }
0x1762   :  { %v2760_v60 = vsel %vm104_vm0, %v2752_v59, 0.0  ;;  %v2766_v61 = vmul.f32 %v2752_v59, %v2752_v59 }
0x1763   :  { %2761 = vadd.xlane.f32.xlu1 %v2760_v60  ;;  %2948 = vmatpush.msrb.mxu3 %v4302_v0  ;;  %v4341_v60 = vld [vmem:[%s6409_s29 + $0x1a0] sm:$0xff] }
0x1764   :  { %v2770_v52 = vsel %vm104_vm0, %v2766_v61, 0.0  ;;  %2969 = vmatpush.msrb.mxu0 %v4320_v2  ;;  %v4342_v61 = vld [vmem:[%s6409_s29 + $0x1a8] sm:$0xff] }
0x1765   :  { %2771 = vadd.xlane.f32.xlu2 %v2770_v52  ;;  %v4339_v52 = vld [vmem:[%s6409_s29 + $0x190] sm:$0xff] }
0x1766   :  { %2970 = vmatpush.msrb.mxu0 %v4319_v3 }
0x1768   :  { %2971 = vmatpush.msrb.mxu0 %v4318_v4 }
0x1796   :  { %v2862_v7 = vpop.f32.mrf.mxu1 }
0x1797   :  { %v2863_v8 = vadd.f32 %v2862_v7, %v2835_v6 }
0x1799   :  { %v2891_v9 = vmax.f32 %v2863_v8, 0.0 }
0x179b   :  { %2949 = vmatmul.f32.vlgmr.msrb.gmra.mxu3 %v2891_v9 }
0x179c   :  { %v2885_v11 = vpop.f32.mrf.mxu2 }
0x179d   :  { %v2886_v12 = vadd.f32 %v2885_v11, %v2836_v10 }
0x179f   :  { %v2892_v14 = vmax.f32 %v2886_v12, 0.0 }
0x17a1   :  { %2972 = vmatmul.f32.vlgmr.msrb.gmra.mxu0 %v2892_v14  ;;  %v4491_v14 = vld [vmem:[%s6393_s13 + $0x2] ss:$0 sm:$0xff] }
0x17d6   :  { %v2762_v18 = vpop.xlane.xlu1 %2761 }
0x17d7   :  { %v2764_v19 = vmul.f32 0.015625, %v2762_v18 }
0x17d8   :  { %v2772_v20 = vpop.xlane.xlu2 %2771 }
0x17d9   :  { %v2776_v47 = vmul.f32 %v2764_v19, %v2764_v19  ;;  %v2774_v21 = vmul.f32 0.015625, %v2772_v20  ;;  %v2780_v29 = vsub.f32 %v2752_v59, %v2764_v19  ;;  %v4344_v59 = vld [vmem:[%s6409_s29 + $0x1b8] sm:$0xff]  ;;  %v4492_v20 = vld [vmem:[%s6394_s14 + $0x2] ss:$0 sm:$0xff] }
0x17da   :  { %3108 = vmatpush.msrb.mxu2 %v4344_v59 }
0x17db   :  { %v2778_v22 = vsub.f32 %v2774_v21, %v2776_v47 }
0x17dc   :  { %3109 = vmatpush.msrb.mxu2 %v4342_v61 }
0x17dd   :  { %v2782_v13 = vadd.f32 1e-05, %v2778_v22 }
0x17de   :  { %3110 = vmatpush.msrb.mxu2 %v4340_v62 }
0x17df   :  { %4613 = vrsqrt.f32 %v2782_v13  ;;  %vm2799_vm14 = vweird.f32 %v2782_v13 }
0x17e0   :  { %3111 = vmatpush.msrb.mxu2 %v4338_v45 }
0x17e5   :  { %v4614_v25 = vpop.eup %4613 }
0x17e6   :  { %v2794_v17 = vmul.f32 %v4614_v25, %v2782_v13  ;;  %vm2800_vm13 = vweird.f32 %v4614_v25 }
0x17e7   :  { %vm2801_vm15 = vmor %vm2799_vm14, %vm2800_vm13 }
0x17e8   :  { %v2795_v40 = vmul.f32 %v4614_v25, %v2794_v17 }
0x17ea   :  { %v2796_v27 = vmul.f32 0.5, %v2795_v40 }
0x17ec   :  { %v2797_v55 = vsub.f32 1.5, %v2796_v27 }
0x17ee   :  { %v2798_v16 = vmul.f32 %v4614_v25, %v2797_v55 }
0x17f0   :  { %v2802_v33 = vsel %vm2801_vm15, %v4614_v25, %v2798_v16 }
0x17f1   :  { %v2804_v34 = vmul.f32 %v2802_v33, %v2780_v29  ;;  %v4353_v29 = vld [vmem:[%s6384_s4 + $0x6] sm:$0x3]  ;;  %s6412_s4 = smov 16  }
0x17f2   :  { %v3063_v33 = vperm.slane %v4353_v29, 0 }
0x17f3   :  { %v2809_v35 = vmul.f32 %v5829_v28, %v2804_v34 }
0x17f5   :  { %v5949_v36 = vadd.f32 %v5834_v30, %v2809_v35 }
0x17f7   :  { %4299 = vmatmul.msk.f32.gmra.mxu1 %vm104_vm0, %v5949_v36  ;;  %4301 = vmatmul.msk.f32.gmra.mxu2 %vm104_vm0, %v5949_v36 }
0x181e   :  { %v2950_v38 = vpop.f32.mrf.mxu3  ;;  %v2973_v26 = vpop.f32.mrf.mxu0 }
0x181f   :  { %v2951_v41 = vadd.f32 %v5958_v39, %v2950_v38 }
0x1821   :  { %v2974_v42 = vadd.f32 %v2973_v26, %v2951_v41 }
0x1823   :  { %v5962_v28 = vadd.f32 %v2974_v42, %v5838_v32  ;;  %v4351_v32 = vld [vmem:[%s6409_s29 + $0x1f0] sm:$0xff] }
0x1824   :  { %3081 = vmatpush.msra.mxu1 %v4351_v32 }
0x1825   :  { %v2985_v30 = vsel %vm104_vm0, %v5962_v28, 0.0  ;;  %v2993_v43 = vmul.f32 %v5962_v28, %v5962_v28 }
0x1826   :  { %2986 = vadd.xlane.f32.xlu0 %v2985_v30  ;;  %3082 = vmatpush.msra.mxu1 %v4349_v54 }
0x1827   :  { %v2995_v44 = vsel %vm104_vm0, %v2993_v43, 0.0 }
0x1828   :  { %2996 = vadd.xlane.f32.xlu1 %v2995_v44  ;;  %3083 = vmatpush.msra.mxu1 %v4347_v57 }
0x182a   :  { %3084 = vmatpush.msra.mxu1 %v4345_v58 }
0x182c   :  { %3085 = vmatpush.msra.mxu1 %v4343_v37 }
0x182e   :  { %3086 = vmatpush.msra.mxu1 %v4341_v60 }
0x1830   :  { %3087 = vmatpush.msra.mxu1 %v4339_v52 }
0x1832   :  { %3088 = vmatpush.msra.mxu1 %v4337_v63 }
0x1874   :  { %v2865_v31 = vpop.f32.mrf.mxu1 }
0x1875   :  { %v2866_v46 = vadd.f32 %v2865_v31, %v2835_v6 }
0x1877   :  { %v2893_v23 = vmax.f32 %v2866_v46, 0.0 }
0x1879   :  { %2952 = vmatmul.f32.gmra.mxu3 %v2893_v23 }
0x187a   :  { %v2888_v49 = vpop.f32.mrf.mxu2 }
0x187b   :  { %v2889_v50 = vadd.f32 %v2888_v49, %v2836_v10 }
0x187d   :  { %v2894_v51 = vmax.f32 %v2889_v50, 0.0 }
0x187f   :  { %2975 = vmatmul.f32.gmra.mxu0 %v2894_v51 }
0x1899   :  { %v2987_v48 = vpop.xlane.xlu0 %2986 }
0x189a   :  { %v2991_v0 = vmul.f32 0.015625, %v2987_v48 }
0x189b   :  { %v2997_v1 = vpop.xlane.xlu1 %2996 }
0x189c   :  { %v3003_v2 = vmul.f32 %v2991_v0, %v2991_v0  ;;  %v3001_v3 = vmul.f32 0.015625, %v2997_v1  ;;  %v3007_v12 = vsub.f32 %v5962_v28, %v2991_v0 }
0x189e   :  { %v3005_v4 = vsub.f32 %v3001_v3, %v3003_v2 }
0x18a0   :  { %v3009_v5 = vadd.f32 1e-05, %v3005_v4 }
0x18a2   :  { %4615 = vrsqrt.f32 %v3009_v5  ;;  %vm3017_vm7 = vweird.f32 %v3009_v5 }
0x18a8   :  { %v4616_v6 = vpop.eup %4615 }
0x18a9   :  { %v3012_v7 = vmul.f32 %v4616_v6, %v3009_v5  ;;  %vm3018_vm6 = vweird.f32 %v4616_v6 }
0x18aa   :  { %vm3019_vm8 = vmor %vm3017_vm7, %vm3018_vm6 }
0x18ab   :  { %v3013_v8 = vmul.f32 %v4616_v6, %v3012_v7 }
0x18ad   :  { %v3014_v9 = vmul.f32 0.5, %v3013_v8 }
0x18af   :  { %v3015_v10 = vsub.f32 1.5, %v3014_v9 }
0x18b1   :  { %v3016_v11 = vmul.f32 %v4616_v6, %v3015_v10 }
0x18b3   :  { %v3020_v18 = vsel %vm3019_vm8, %v4616_v6, %v3016_v11 }
0x18b4   :  { %v3031_v19 = vmul.f32 %v3020_v18, %v3007_v12 }
0x18b6   :  { %v3036_v47 = vmul.f32 %v4491_v14, %v3031_v19 }
0x18b8   :  { %v6024_v21 = vadd.f32 %v4492_v20, %v3036_v47 }
0x18ba   :  { %4354 = vmatmul.msk.f32.vlgmr.msra.gmra.mxu1 %vm104_vm0, %v6024_v21  ;;  %4356 = vmatmul.msk.f32.vlgmr.msrb.gmra.mxu2 %vm104_vm0, %v6024_v21 }
0x18fc   :  { %v2953_v22 = vpop.f32.mrf.mxu3  ;;  %v2976_v25 = vpop.f32.mrf.mxu0 }
0x18fd   :  { %v2954_v13 = vadd.f32 %v5958_v39, %v2953_v22  ;;  %v3064_v39 = vperm.slane %v4353_v29, 1 }
0x18ff   :  { %v2977_v17 = vadd.f32 %v2976_v25, %v2954_v13 }
0x1901   :  { %v2980_v40 = vadd.f32 %v2977_v17, %v5949_v36 }
0x1903   :  { %v2988_v27 = vsel %vm104_vm0, %v2980_v40, 0.0  ;;  %v2994_v55 = vmul.f32 %v2980_v40, %v2980_v40 }
0x1904   :  { %2989 = vadd.xlane.f32.xlu2 %v2988_v27 }
0x1905   :  { %v2998_v16 = vsel %vm104_vm0, %v2994_v55, 0.0 }
0x1906   :  { %2999 = vadd.xlane.f32.xlu0 %v2998_v16 }
0x1937   :  { %v3090_v34 = vpop.f32.mrf.mxu1 }
0x1938   :  { %v6037_v35 = vadd.f32 %v3090_v34, %v3063_v33 }
0x193a   :  { %3128 = vrot.lane.b32.xlu1 %v6037_v35, %s4661_s25  ;;  %3258 = vrot.lane.b32.xlu2 %v6037_v35, %s4660_s24 }
0x193d   :  { %v3113_v36 = vpop.f32.mrf.mxu2 }
0x193e   :  { %v3114_v38 = vadd.f32 %v3113_v36, %v3064_v39 }
0x1940   :  { %3120 = vst.msk [vmem:[#allocation2 + $0x8] sm:$0xff] %vm104_vm0, %v3114_v38 }
0x1942   :  { %3256 = vrot.lane.b32.xlu1 %v6037_v35, %s4662_s26 }
0x1947   :  { %v6046_v41 = vld [vmem:[#allocation2 + $0x8] sm:$0xff] }
0x1948   :  { %3221 = vmatpush.msra.mxu3 %v6046_v41 }
0x194a   :  { %3406 = vrot.lane.b32.xlu1 %v6037_v35, %s4664_s28 }
0x1952   :  { %3404 = vrot.lane.b32.xlu1 %v6037_v35, %s6411_s19 }
0x1977   :  { %v2990_v26 = vpop.xlane.xlu2 %2989 }
0x1978   :  { %v2992_v42 = vmul.f32 0.015625, %v2990_v26 }
0x1979   :  { %v3000_v28 = vpop.xlane.xlu0 %2999 }
0x197a   :  { %v3004_v30 = vmul.f32 %v2992_v42, %v2992_v42  ;;  %v3002_v43 = vmul.f32 0.015625, %v3000_v28  ;;  %v3008_v53 = vsub.f32 %v2980_v40, %v2992_v42 }
0x197c   :  { %v3006_v44 = vsub.f32 %v3002_v43, %v3004_v30 }
0x197e   :  { %v3010_v31 = vadd.f32 1e-05, %v3006_v44 }
0x1980   :  { %4617 = vrsqrt.f32 %v3010_v31  ;;  %vm3027_vm10 = vweird.f32 %v3010_v31 }
0x1986   :  { %v4618_v46 = vpop.eup %4617 }
0x1987   :  { %v3022_v23 = vmul.f32 %v4618_v46, %v3010_v31  ;;  %vm3028_vm9 = vweird.f32 %v4618_v46 }
0x1988   :  { %vm3029_vm11 = vmor %vm3027_vm10, %vm3028_vm9  ;;  %vm4069_vm9 = vcmask 122880  }
0x1989   :  { %v3023_v49 = vmul.f32 %v4618_v46, %v3022_v23 }
0x198b   :  { %v3024_v50 = vmul.f32 0.5, %v3023_v49 }
0x198d   :  { %v3025_v51 = vsub.f32 1.5, %v3024_v50 }
0x198f   :  { %v3026_v32 = vmul.f32 %v4618_v46, %v3025_v51 }
0x1991   :  { %v3030_v54 = vsel %vm3029_vm11, %v4618_v46, %v3026_v32 }
0x1992   :  { %v3032_v56 = vmul.f32 %v3030_v54, %v3008_v53 }
0x1994   :  { %v3037_v57 = vmul.f32 %v4491_v14, %v3032_v56  ;;  %v3259_v48 = vpop.permute.xlu2 %3258 }
0x1996   :  { %v6053_v15 = vadd.f32 %v4492_v20, %v3037_v57 }
0x1998   :  { %4355 = vmatmul.msk.f32.gmra.mxu1 %vm104_vm0, %v6053_v15  ;;  %4357 = vmatmul.msk.f32.gmra.mxu2 %vm104_vm0, %v6053_v15 }
0x19ac   :  { %v3129_v58 = vpop.permute.xlu1 %3128 }
0x19ad   :  { %4358 = vmatpush.xpose.msk.msrb.mxu1 %vm168_vm1, %v3129_v58 }
0x19b0   :  { %4359 = vmatmul.msk.f32.vlgmr.msrb.gmra.mxu1 %vm168_vm1, %v6037_v35 }
0x19b4   :  { %v3257_v63 = vpop.permute.xlu1 %3256 }
0x19bc   :  { %v3407_v0 = vpop.permute.xlu1 %3406 }
0x19c4   :  { %v3405_v3 = vpop.permute.xlu1 %3404 }
0x1a15   :  { %v3093_v24 = vpop.f32.mrf.mxu1 }
0x1a16   :  { %v3094_v37 = vadd.f32 %v3093_v24, %v3063_v33 }
0x1a18   :  { %3433 = vrot.lane.b32.xlu1 %v3094_v37, %s6411_s19  ;;  %3155 = vrot.lane.b32.xlu0 %v3094_v37, %s4661_s25 }
0x1a1b   :  { %v3116_v59 = vpop.f32.mrf.mxu2 }
0x1a1c   :  { %v3117_v60 = vadd.f32 %v3116_v59, %v3064_v39 }
0x1a1e   :  { %3122 = vst.msk [vmem:[#allocation2 + $0x18] sm:$0xff] %vm104_vm0, %v3117_v60 }
0x1a20   :  { %3581 = vrot.lane.b32.xlu1 %v3094_v37, %s6410_s18  ;;  %3287 = vrot.lane.b32.xlu0 %v3094_v37, %s4660_s24 }
0x1a25   :  { %v6067_v61 = vld [vmem:[#allocation2 + $0x18] sm:$0xff] }
0x1a26   :  { %3244 = vmatpush.msra.mxu1 %v6067_v61  ;;  %v4463_v56 = vpack.i.bf16 %v6067_v61, %v6046_v41 }
0x1a28   :  { %3285 = vrot.lane.b32.xlu0 %v3094_v37, %s4662_s26 }
0x1a2d   :  { %v3151_v52 = vpop.f32.mrf.mxu1 }
0x1a2e   :  { %v3181_v62 = vsel %vm220_vm2, %v3151_v52, -inf }
0x1a2f   :  { %3182 = vmax.xlane.f32.xlu2 %v3181_v62 }
0x1a30   :  { %3554 = vrot.lane.b32.xlu0 %v6037_v35, %s6412_s4 }
0x1a38   :  { %3583 = vrot.lane.b32.xlu0 %v3094_v37, %s6412_s4 }
0x1a47   :  { %3435 = vrot.lane.b32.xlu2 %v3094_v37, %s4664_s28 }
0x1a8a   :  { %v3156_v45 = vpop.permute.xlu0 %3155  ;;  %v3434_v40 = vpop.permute.xlu1 %3433 }
0x1a8b   :  { %4360 = vmatpush.xpose.msk.msra.mxu2 %vm168_vm1, %v3156_v45 }
0x1a8e   :  { %4361 = vmatmul.msk.f32.vlgmr.msra.gmra.mxu2 %vm168_vm1, %v3094_v37 }
0x1a8f   :  { %4364 = vmatpush.xpose.msk.msrb.mxu2 %vm168_vm1, %v3259_v48 }
0x1a92   :  { %v3288_v1 = vpop.permute.xlu0 %3287  ;;  %v3582_v27 = vpop.permute.xlu1 %3581 }
0x1a93   :  { %4370 = vmatpush.xpose.msk.msra.mxu2 %vm168_vm1, %v3407_v0  ;;  %4366 = vmatpush.xpose.msk.msrb.mxu3 %vm168_vm1, %v3288_v1 }
0x1a96   :  { %4365 = vmatmul.msk.f32.vlgmr.msrb.gmra.mxu2 %vm168_vm1, %v3257_v63 }
0x1a9a   :  { %v3286_v2 = vpop.permute.xlu0 %3285 }
0x1a9e   :  { %4371 = vmatmul.msk.f32.vlgmr.msra.gmra.mxu2 %vm168_vm1, %v3405_v3 }
0x1aa2   :  { %v3555_v4 = vpop.permute.xlu0 %3554  ;;  %v3183_v5 = vpop.xlane.xlu2 %3182 }
0x1aa3   :  { %v3187_v6 = vsub.f32 %v3151_v52, %v3183_v5  ;;  %4376 = vmatpush.xpose.msk.msrb.mxu2 %vm168_vm1, %v3555_v4 }
0x1aa5   :  { %v3189_v7 = vmul.f32 1.442695, %v3187_v6 }
0x1aa7   :  { %4619 = vpow2.f32 %v3189_v7 }
0x1aaa   :  { %v3436_v14 = vpop.permute.xlu2 %3435  ;;  %v3584_v17 = vpop.permute.xlu0 %3583 }
0x1aad   :  { %v4620_v8 = vpop.eup %4619 }
0x1aae   :  { %v3193_v9 = vsel %vm220_vm2, %v4620_v8, 0.0 }
0x1aaf   :  { %3194 = vadd.xlane.f32.xlu2 %v3193_v9 }
0x1ac7   :  { %3552 = vrot.lane.b32.xlu2 %v6037_v35, %s6410_s18 }
0x1b11   :  { %v3178_v10 = vpop.f32.mrf.mxu2 }
0x1b12   :  { %v3184_v11 = vsel %vm220_vm2, %v3178_v10, -inf }
0x1b13   :  { %3185 = vmax.xlane.f32.xlu2 %v3184_v11 }
0x1b19   :  { %v3281_v12 = vpop.f32.mrf.mxu2 }
0x1b1a   :  { %v3313_v18 = vsel %vm220_vm2, %v3281_v12, -inf }
0x1b1b   :  { %3314 = vmax.xlane.f32.xlu0 %v3313_v18 }
0x1b21   :  { %v3429_v19 = vpop.f32.mrf.mxu2 }
0x1b22   :  { %v3195_v20 = vpop.xlane.xlu2 %3194  ;;  %v3461_v47 = vsel %vm220_vm2, %v3429_v19, -inf }
0x1b23   :  { %4621 = vrcp.f32 %v3195_v20  ;;  %3462 = vmax.xlane.f32.xlu2 %v3461_v47 }
0x1b29   :  { %v4622_v22 = vpop.eup %4621 }
0x1b2a   :  { %v3201_v13 = vmul.f32 %v4622_v22, %v4620_v8  ;;  %v3553_v25 = vpop.permute.xlu2 %3552 }
0x1b2b   :  { %4377 = vmatmul.msk.f32.vlgmr.msrb.gmra.mxu2 %vm168_vm1, %v3553_v25 }
0x1b2c   :  { %4362 = vmatmul.msk.f32.vlgmr.msra.gmra.mxu3 %vm220_vm2, %v3201_v13 }
0x1b2d   :  { %4372 = vmatpush.xpose.msk.msra.mxu3 %vm168_vm1, %v3436_v14 }
0x1b34   :  { %4367 = vmatmul.msk.f32.vlgmr.msrb.gmra.mxu3 %vm168_vm1, %v3286_v2 }
0x1b35   :  { %4378 = vmatpush.xpose.msk.msrb.mxu3 %vm168_vm1, %v3584_v17 }
0x1b3c   :  { %4373 = vmatmul.msk.f32.vlgmr.msra.gmra.mxu3 %vm168_vm1, %v3434_v40 }
0x1b44   :  { %4379 = vmatmul.msk.f32.vlgmr.msrb.gmra.mxu3 %vm168_vm1, %v3582_v27 }
0x1b86   :  { %v3186_v55 = vpop.xlane.xlu2 %3185 }
0x1b87   :  { %v3188_v16 = vsub.f32 %v3178_v10, %v3186_v55 }
0x1b89   :  { %v3191_v29 = vmul.f32 1.442695, %v3188_v16 }
0x1b8b   :  { %4623 = vpow2.f32 %v3191_v29 }
0x1b8e   :  { %v3315_v39 = vpop.xlane.xlu0 %3314 }
0x1b8f   :  { %v3319_v38 = vsub.f32 %v3281_v12, %v3315_v39 }
0x1b91   :  { %v4624_v33 = vpop.eup %4623  ;;  %v3321_v30 = vmul.f32 1.442695, %v3319_v38 }
0x1b92   :  { %v3196_v34 = vsel %vm220_vm2, %v4624_v33, 0.0 }
0x1b93   :  { %3197 = vadd.xlane.f32.xlu0 %v3196_v34  ;;  %4625 = vpow2.f32 %v3321_v30 }
0x1b96   :  { %v3463_v36 = vpop.xlane.xlu2 %3462 }
0x1b97   :  { %v3467_v42 = vsub.f32 %v3429_v19, %v3463_v36 }
0x1b99   :  { %v3469_v43 = vmul.f32 1.442695, %v3467_v42  ;;  %v4626_v49 = vpop.eup %4625 }
0x1b9a   :  { %v3325_v53 = vsel %vm220_vm2, %v4626_v49, 0.0 }
0x1b9b   :  { %4627 = vpow2.f32 %v3469_v43 }
0x1ba1   :  { %v6102_v50 = vpop.eup %4627 }
0x1ba2   :  { %v3473_v54 = vsel %vm220_vm2, %v6102_v50, 0.0 }
0x1bae   :  { %v3577_v44 = vpop.f32.mrf.mxu2 }
0x1baf   :  { %v3223_v35 = vpop.f32.mrf.mxu3  ;;  %v3609_v46 = vsel %vm220_vm2, %v3577_v44, -inf }
0x1bb0   :  { %3249 = vst.msk [vmem:[#allocation3] sm:$0xff] %vm168_vm1, %v3223_v35 }
0x1bb7   :  { %v3310_v26 = vpop.f32.mrf.mxu3 }
0x1bb8   :  { %v3316_v28 = vsel %vm220_vm2, %v3310_v26, -inf }
0x1bb9   :  { %3317 = vmax.xlane.f32.xlu1 %v3316_v28 }
0x1bbf   :  { %v3458_v31 = vpop.f32.mrf.mxu3 }
0x1bc0   :  { %v3464_v23 = vsel %vm220_vm2, %v3458_v31, -inf }
0x1bc1   :  { %3610 = vmax.xlane.f32.xlu1 %v3609_v46  ;;  %3465 = vmax.xlane.f32.xlu0 %v3464_v23 }
0x1bc7   :  { %v3606_v51 = vpop.f32.mrf.mxu3 }
0x1bc8   :  { %v3612_v32 = vsel %vm220_vm2, %v3606_v51, -inf }
0x1bc9   :  { %3613 = vmax.xlane.f32.xlu2 %v3612_v32  ;;  %3326 = vadd.xlane.f32.xlu1 %v3325_v53  ;;  %v4388_v32 = vld [vmem:[%s6386_s5 + $0xf0] sm:$0xff]  ;;  %v4387_v53 = vld [vmem:[%s6386_s5 + $0xe8] sm:$0xff] }
0x1bca   :  { %3474 = vadd.xlane.f32.xlu0 %v3473_v54  ;;  %v4386_v54 = vld [vmem:[%s6386_s5 + $0xe0] sm:$0xff] }
0x1be2   :  { %4464 = vrot.lane.b32.xlu1 %v4463_v56, %s4662_s26 }
0x1bea   :  { %3659 = vrot.lane.b32.xlu1 %v6067_v61, %s6410_s18 }
0x1c06   :  { %v3198_v57 = vpop.xlane.xlu0 %3197 }
0x1c07   :  { %4629 = vrcp.f32 %v3198_v57  ;;  %v4385_v57 = vld [vmem:[%s6386_s5 + $0xd8] sm:$0xff] }
0x1c0d   :  { %v4630_v58 = vpop.eup %4629 }
0x1c0e   :  { %v3202_v24 = vmul.f32 %v4630_v58, %v4624_v33  ;;  %v4384_v58 = vld [vmem:[%s6386_s5 + $0xd0] sm:$0xff] }
0x1c10   :  { %4363 = vmatmul.msk.f32.vlgmr.msra.gmra.mxu1 %vm220_vm2, %v3202_v24  ;;  %v4383_v24 = vld [vmem:[%s6386_s5 + $0xc8] sm:$0xff] }
0x1c2c   :  { %v3318_v37 = vpop.xlane.xlu1 %3317 }
0x1c2d   :  { %v3320_v59 = vsub.f32 %v3310_v26, %v3318_v37 }
0x1c2f   :  { %v3323_v60 = vmul.f32 1.442695, %v3320_v59  ;;  %v4382_v59 = vld [vmem:[%s6386_s5 + $0xc0] sm:$0xff] }
0x1c31   :  { %4631 = vpow2.f32 %v3323_v60 }
0x1c34   :  { %v3611_v52 = vpop.xlane.xlu1 %3610  ;;  %v3466_v62 = vpop.xlane.xlu0 %3465 }
0x1c35   :  { %v3615_v63 = vsub.f32 %v3577_v44, %v3611_v52  ;;  %v3468_v45 = vsub.f32 %v3458_v31, %v3466_v62 }
0x1c37   :  { %v4632_v48 = vpop.eup %4631  ;;  %v3617_v0 = vmul.f32 1.442695, %v3615_v63  ;;  %v3471_v1 = vmul.f32 1.442695, %v3468_v45 }
0x1c38   :  { %v3328_v2 = vsel %vm220_vm2, %v4632_v48, 0.0 }
0x1c39   :  { %4633 = vpow2.f32 %v3617_v0  ;;  %3329 = vadd.xlane.f32.xlu2 %v3328_v2 }
0x1c3a   :  { %4635 = vpow2.f32 %v3471_v1 }
0x1c3c   :  { %v3614_v61 = vpop.xlane.xlu2 %3613  ;;  %v3327_v11 = vpop.xlane.xlu1 %3326 }
0x1c3d   :  { %v3616_v3 = vsub.f32 %v3606_v51, %v3614_v61  ;;  %v3475_v22 = vpop.xlane.xlu0 %3474  ;;  %v4389_v51 = vld [vmem:[%s6386_s5 + $0xf8] sm:$0xff] }
0x1c3e   :  { %3725 = vmatpush.msra.mxu2 %v4389_v51  ;;  %v4428_v51 = vld [vmem:[%s6390_s9 + $0x360] sm:$0xff] }
0x1c3f   :  { %v4634_v4 = vpop.eup %4633  ;;  %v3619_v5 = vmul.f32 1.442695, %v3616_v3 }
0x1c40   :  { %v4636_v6 = vpop.eup %4635  ;;  %v3621_v7 = vsel %vm220_vm2, %v4634_v4, 0.0  ;;  %3726 = vmatpush.msra.mxu2 %v4388_v32 }
0x1c41   :  { %4637 = vpow2.f32 %v3619_v5  ;;  %v3476_v8 = vsel %vm220_vm2, %v4636_v6, 0.0  ;;  %3622 = vadd.xlane.f32.xlu0 %v3621_v7 }
0x1c42   :  { %3477 = vadd.xlane.f32.xlu2 %v3476_v8  ;;  %4639 = vrcp.f32 %v3327_v11  ;;  %3727 = vmatpush.msra.mxu2 %v4387_v53  ;;  %v4410_v11 = vld [vmem:[%s6389_s7 + $0x1f8] sm:$0xff] }
0x1c44   :  { %3728 = vmatpush.msra.mxu2 %v4386_v54  ;;  %v4443_v54 = vld [vmem:[%s6390_s9 + $0x3d8] sm:$0xff] }
0x1c46   :  { %3729 = vmatpush.msra.mxu2 %v4385_v57  ;;  %v4427_v57 = vld [vmem:[%s6390_s9 + $0x358] sm:$0xff] }
0x1c47   :  { %v4638_v9 = vpop.eup %4637 }
0x1c48   :  { %v3624_v10 = vsel %vm220_vm2, %v4638_v9, 0.0  ;;  %v4640_v12 = vpop.eup %4639  ;;  %3730 = vmatpush.msra.mxu2 %v4384_v58  ;;  %v4442_v58 = vld [vmem:[%s6390_s9 + $0x3d0] sm:$0xff] }
0x1c49   :  { %3625 = vadd.xlane.f32.xlu0 %v3624_v10  ;;  %v3333_v20 = vmul.f32 %v4640_v12, %v4626_v49  ;;  %v4409_v10 = vld [vmem:[%s6389_s7 + $0x1f0] sm:$0xff]  ;;  %v4408_v12 = vld [vmem:[%s6389_s7 + $0x1e8] sm:$0xff] }
0x1c4a   :  { %3731 = vmatpush.msra.mxu2 %v4383_v24  ;;  %3842 = vmatpush.msra.mxu3 %v4409_v10 }
0x1c4c   :  { %3732 = vmatpush.msra.mxu2 %v4382_v59  ;;  %v4441_v59 = vld [vmem:[%s6390_s9 + $0x3c8] sm:$0xff] }
0x1c54   :  { %v4465_v14 = vpop.permute.xlu1 %4464 }
0x1c55   :  { %v4467_v18 = vunpack.i.h.bf16 %v4465_v14  ;;  %v4466_v19 = vunpack.i.l.bf16 %v4465_v14  ;;  %v4405_v14 = vld [vmem:[%s6389_s7 + $0x1d0] sm:$0xff] }
0x1c57   :  { %3357 = vmatpush.msra.mxu0 %v4466_v19  ;;  %3384 = vmatpush.msrb.mxu1 %v4467_v18  ;;  %v4406_v18 = vld [vmem:[%s6389_s7 + $0x1d8] sm:$0xff]  ;;  %v4403_v19 = vld [vmem:[%s6389_s7 + $0x1c0] sm:$0xff] }
0x1c58   :  { %4368 = vmatmul.msk.f32.vlgmr.msra.gmra.mxu0 %vm220_vm2, %v3333_v20  ;;  %v4404_v20 = vld [vmem:[%s6389_s7 + $0x1c8] sm:$0xff] }
0x1c5a   :  { %4469 = vrot.lane.b32.xlu2 %v4463_v56, %s6411_s19 }
0x1c5c   :  { %v3660_v36 = vpop.permute.xlu1 %3659 }
0x1c5d   :  { %3632 = vrot.lane.b32.xlu0 %v6046_v41, %s6410_s18 }
0x1c8d   :  { %v3246_v47 = vpop.f32.mrf.mxu1 }
0x1c8e   :  { %3250 = vst.msk [vmem:[#allocation3 + $0x8] sm:$0xff] %vm168_vm1, %v3246_v47  ;;  %v4401_v47 = vld [vmem:[%s6389_s7 + $0x1b0] sm:$0xff] }
0x1cac   :  { %v3330_v13 = vpop.xlane.xlu2 %3329 }
0x1cad   :  { %4641 = vrcp.f32 %v3330_v13  ;;  %v4399_v13 = vld [vmem:[%s6389_s7 + $0x1a0] sm:$0xff] }
0x1cae   :  { %4643 = vrcp.f32 %v3475_v22  ;;  %v4402_v22 = vld [vmem:[%s6389_s7 + $0x1b8] sm:$0xff] }
0x1cb3   :  { %v4642_v25 = vpop.eup %4641 }
0x1cb4   :  { %v3334_v17 = vmul.f32 %v4642_v25, %v4632_v48  ;;  %v3623_v40 = vpop.xlane.xlu0 %3622  ;;  %v4644_v55 = vpop.eup %4643  ;;  %v4493_v48 = vld [vmem:[%s6385_s6 + $0x3] ss:$0 sm:$0xff]  ;;  %v4400_v25 = vld [vmem:[%s6389_s7 + $0x1a8] sm:$0xff] }
0x1cb5   :  { %v3478_v27 = vpop.xlane.xlu2 %3477  ;;  %v3481_v35 = vmul.f32 %v4644_v55, %v6102_v50 }
0x1cb6   :  { %4645 = vrcp.f32 %v3478_v27  ;;  %4369 = vmatmul.msk.f32.vlgmr.msrb.gmra.mxu1 %vm220_vm2, %v3334_v17  ;;  %v4397_v17 = vld [vmem:[%s6389_s7 + $0x190] sm:$0xff] }
0x1cbc   :  { %v4646_v16 = vpop.eup %4645  ;;  %v3626_v29 = vpop.xlane.xlu0 %3625 }
0x1cbd   :  { %v4470_v33 = vpop.permute.xlu2 %4469  ;;  %4647 = vrcp.f32 %v3626_v29  ;;  %v3482_v39 = vmul.f32 %v4646_v16, %v4636_v6  ;;  %v4395_v16 = vld [vmem:[%s6389_s7 + $0x180] sm:$0xff]  ;;  %v4396_v29 = vld [vmem:[%s6389_s7 + $0x188] sm:$0xff] }
0x1cbe   :  { %v4472_v41 = vunpack.i.h.bf16 %v4470_v33  ;;  %v4471_v34 = vunpack.i.l.bf16 %v4470_v33  ;;  %4649 = vrcp.f32 %v3623_v40  ;;  %v4398_v40 = vld [vmem:[%s6389_s7 + $0x198] sm:$0xff] }
0x1cc0   :  { %3505 = vmatpush.msrb.mxu0 %v4471_v34  ;;  %3532 = vmatpush.msra.mxu1 %v4472_v41 }
0x1cc1   :  { %4374 = vmatmul.msk.f32.vlgmr.msrb.gmra.mxu0 %vm220_vm2, %v3481_v35  ;;  %4375 = vmatmul.msk.f32.vlgmr.msra.gmra.mxu1 %vm220_vm2, %v3482_v39 }
0x1cc2   :  { %3680 = vmatpush.msrb.mxu1 %v3660_v36 }
0x1cc3   :  { %v4648_v38 = vpop.eup %4647 }
0x1cc4   :  { %v3630_v26 = vmul.f32 %v4648_v38, %v4638_v9  ;;  %v4650_v42 = vpop.eup %4649 }
0x1cc5   :  { %v3629_v28 = vmul.f32 %v4650_v42, %v4634_v4  ;;  %v4446_v42 = vld [vmem:[%s6390_s9 + $0x3f0] sm:$0xff] }
0x1cc9   :  { %4381 = vmatmul.msk.f32.vlgmr.msrb.gmra.mxu1 %vm220_vm2, %v3630_v26  ;;  %v4447_v26 = vld [vmem:[%s6390_s9 + $0x3f8] sm:$0xff] }
0x1cca   :  { %3945 = vmatpush.msrb.mxu2 %v4447_v26 }
0x1ccc   :  { %3946 = vmatpush.msrb.mxu2 %v4446_v42 }
0x1ccf   :  { %v3633_v30 = vpop.permute.xlu0 %3632 }
0x1cd0   :  { %3653 = vmatpush.msra.mxu0 %v3633_v30  ;;  %v4431_v30 = vld [vmem:[%s6390_s9 + $0x378] sm:$0xff] }
0x1cd1   :  { %4380 = vmatmul.msk.f32.vlgmr.msra.gmra.mxu0 %vm220_vm2, %v3629_v28  ;;  %3922 = vmatpush.msra.mxu1 %v4431_v30 }
0x1cd2   :  { %3865 = vmatpush.msrb.mxu0 %v4410_v11  ;;  %v4437_v11 = vld [vmem:[%s6390_s9 + $0x3a8] sm:$0xff] }
0x1cd4   :  { %3866 = vmatpush.msrb.mxu0 %v4408_v12 }
0x1cd5   :  { %v3359_v43 = vpop.f32.mrf.mxu0 }
0x1cd6   :  { %3391 = vrot.lane.b32.xlu1 %v3359_v43, %s6412_s4  ;;  %3867 = vmatpush.msrb.mxu0 %v4406_v18  ;;  %v4430_v43 = vld [vmem:[%s6390_s9 + $0x370] sm:$0xff] }
0x1cd7   :  { %3923 = vmatpush.msra.mxu1 %v4430_v43 }
0x1cd8   :  { %3868 = vmatpush.msrb.mxu0 %v4404_v20  ;;  %v4435_v20 = vld [vmem:[%s6390_s9 + $0x398] sm:$0xff] }
0x1cda   :  { %3869 = vmatpush.msrb.mxu0 %v4402_v22 }
0x1cdc   :  { %3870 = vmatpush.msrb.mxu0 %v4400_v25 }
0x1cde   :  { %3871 = vmatpush.msrb.mxu0 %v4398_v40 }
0x1ce0   :  { %3872 = vmatpush.msrb.mxu0 %v4396_v29  ;;  %v4419_v29 = vld [vmem:[%s6390_s9 + $0x318] sm:$0xff] }
0x1d33   :  { %v3386_v44 = vpop.f32.mrf.mxu1 }
0x1d34   :  { %3393 = vrot.lane.b32.xlu1 %v3386_v44, %s6412_s4 }
0x1d3e   :  { %v3507_v31 = vpop.f32.mrf.mxu0  ;;  %v3534_v46 = vpop.f32.mrf.mxu1 }
0x1d3f   :  { %3539 = vrot.lane.b32.xlu2 %v3507_v31, %s4664_s28 }
0x1d46   :  { %v3682_v50 = vpop.f32.mrf.mxu1 }
0x1d47   :  { %3541 = vrot.lane.b32.xlu2 %v3534_v46, %s4664_s28  ;;  %v4445_v46 = vld [vmem:[%s6390_s9 + $0x3e8] sm:$0xff] }
0x1d48   :  { %v3392_v23 = vpop.permute.xlu1 %3391  ;;  %3947 = vmatpush.msrb.mxu2 %v4445_v46 }
0x1d49   :  { %3397 = vst.msk [vmem:[#allocation3] sm:$0xff] %vm437_vm3, %v3392_v23  ;;  %v4429_v23 = vld [vmem:[%s6390_s9 + $0x368] sm:$0xff] }
0x1d4a   :  { %3924 = vmatpush.msra.mxu1 %v4429_v23 }
0x1d4c   :  { %3925 = vmatpush.msra.mxu1 %v4428_v51 }
0x1d4e   :  { %v3655_v49 = vpop.f32.mrf.mxu0  ;;  %3926 = vmatpush.msra.mxu1 %v4427_v57 }
0x1d4f   :  { %3687 = vrot.lane.b32.xlu0 %v3655_v49, %s4660_s24 }
0x1d57   :  { %3689 = vrot.lane.b32.xlu0 %v3682_v50, %s4660_s24  ;;  %v4444_v50 = vld [vmem:[%s6390_s9 + $0x3e0] sm:$0xff] }
0x1d58   :  { %3948 = vmatpush.msrb.mxu2 %v4444_v50 }
0x1d5a   :  { %3949 = vmatpush.msrb.mxu2 %v4443_v54 }
0x1d5c   :  { %3950 = vmatpush.msrb.mxu2 %v4442_v58 }
0x1d5e   :  { %3951 = vmatpush.msrb.mxu2 %v4441_v59 }
0x1d99   :  { %v3540_v56 = vpop.permute.xlu2 %3539 }
0x1d9a   :  { %3545 = vst.msk [vmem:[#allocation3] sm:$0xff] %vm586_vm4, %v3540_v56 }
0x1da1   :  { %v3542_v60 = vpop.permute.xlu2 %3541 }
0x1da6   :  { %v3394_v37 = vpop.permute.xlu1 %3393 }
0x1da7   :  { %3398 = vst.msk [vmem:[#allocation3 + $0x8] sm:$0xff] %vm437_vm3, %v3394_v37  ;;  %v4426_v37 = vld [vmem:[%s6390_s9 + $0x350] sm:$0xff] }
0x1da8   :  { %3546 = vst.msk [vmem:[#allocation3 + $0x8] sm:$0xff] %vm586_vm4, %v3542_v60  ;;  %3927 = vmatpush.msra.mxu1 %v4426_v37 }
0x1dc1   :  { %v3688_v52 = vpop.permute.xlu0 %3687 }
0x1dc2   :  { %3693 = vst.msk [vmem:[#allocation3] sm:$0xff] %vm735_vm5, %v3688_v52  ;;  %v4425_v52 = vld [vmem:[%s6390_s9 + $0x348] sm:$0xff] }
0x1dc3   :  { %3928 = vmatpush.msra.mxu1 %v4425_v52 }
0x1dc9   :  { %v3690_v62 = vpop.permute.xlu0 %3689  ;;  %v3695_v63 = vld [vmem:[#allocation3] sm:$0xff] }
0x1dca   :  { %3694 = vst.msk [vmem:[#allocation3 + $0x8] sm:$0xff] %vm735_vm5, %v3690_v62  ;;  %4391 = vmatmul.msk.f32.vlgmr.msra.gmra.mxu2 %vm104_vm0, %v3695_v63  ;;  %v4440_v62 = vld [vmem:[%s6390_s9 + $0x3c0] sm:$0xff] }
0x1dcb   :  { %3952 = vmatpush.msrb.mxu2 %v4440_v62 }
0x1dd1   :  { %v3696_v45 = vld [vmem:[#allocation3 + $0x8] sm:$0xff] }
0x1dd2   :  { %4392 = vmatmul.msk.f32.gmra.mxu2 %vm104_vm0, %v3696_v45  ;;  %v4424_v45 = vld [vmem:[%s6390_s9 + $0x340] sm:$0xff] }
0x1dd3   :  { %3929 = vmatpush.msra.mxu1 %v4424_v45 }
0x1e4d   :  { %v3734_v0 = vpop.f32.mrf.mxu2 }
0x1e4e   :  { %v3735_v1 = vadd.f32 %v4493_v48, %v3734_v0  ;;  %v4439_v0 = vld [vmem:[%s6390_s9 + $0x3b8] sm:$0xff] }
0x1e4f   :  { %3953 = vmatpush.msrb.mxu2 %v4439_v0 }
0x1e50   :  { %v6171_v2 = vadd.f32 %v3735_v1, %v6024_v21 }
0x1e52   :  { %v3746_v61 = vsel %vm104_vm0, %v6171_v2, 0.0  ;;  %v3754_v3 = vmul.f32 %v6171_v2, %v6171_v2 }
0x1e53   :  { %3747 = vadd.xlane.f32.xlu1 %v3746_v61 }
0x1e54   :  { %v3756_v4 = vsel %vm104_vm0, %v3754_v3, 0.0  ;;  %v4423_v3 = vld [vmem:[%s6390_s9 + $0x338] sm:$0xff] }
0x1e55   :  { %3757 = vadd.xlane.f32.xlu2 %v3756_v4  ;;  %v3737_v5 = vpop.f32.mrf.mxu2  ;;  %3930 = vmatpush.msra.mxu1 %v4423_v3 }
0x1e56   :  { %v3738_v6 = vadd.f32 %v4493_v48, %v3737_v5  ;;  %v4494_v5 = vld [vmem:[%s6387_s11 + $0x3] ss:$0 sm:$0xff] }
0x1e58   :  { %v6179_v7 = vadd.f32 %v3738_v6, %v6053_v15  ;;  %v4407_v15 = vld [vmem:[%s6389_s7 + $0x1e0] sm:$0xff]  ;;  %v4438_v6 = vld [vmem:[%s6390_s9 + $0x3b0] sm:$0xff] }
0x1e59   :  { %3843 = vmatpush.msra.mxu3 %v4407_v15  ;;  %3954 = vmatpush.msrb.mxu2 %v4438_v6 }
0x1e5a   :  { %v3749_v8 = vsel %vm104_vm0, %v6179_v7, 0.0  ;;  %v3755_v21 = vmul.f32 %v6179_v7, %v6179_v7 }
0x1e5b   :  { %3750 = vadd.xlane.f32.xlu0 %v3749_v8  ;;  %3844 = vmatpush.msra.mxu3 %v4405_v14  ;;  %v4436_v14 = vld [vmem:[%s6390_s9 + $0x3a0] sm:$0xff] }
0x1e5c   :  { %v3759_v9 = vsel %vm104_vm0, %v3755_v21, 0.0  ;;  %3955 = vmatpush.msrb.mxu2 %v4437_v11 }
0x1e5d   :  { %3760 = vadd.xlane.f32.xlu2 %v3759_v9  ;;  %3845 = vmatpush.msra.mxu3 %v4403_v19  ;;  %v4422_v9 = vld [vmem:[%s6390_s9 + $0x330] sm:$0xff] }
0x1e5e   :  { %3931 = vmatpush.msra.mxu1 %v4422_v9  ;;  %3956 = vmatpush.msrb.mxu2 %v4436_v14 }
0x1e5f   :  { %3846 = vmatpush.msra.mxu3 %v4401_v47 }
0x1e60   :  { %3957 = vmatpush.msrb.mxu2 %v4435_v20 }
0x1e61   :  { %3847 = vmatpush.msra.mxu3 %v4399_v13 }
0x1e63   :  { %3848 = vmatpush.msra.mxu3 %v4397_v17 }
0x1e65   :  { %3849 = vmatpush.msra.mxu3 %v4395_v16  ;;  %v4433_v16 = vld [vmem:[%s6390_s9 + $0x388] sm:$0xff] }
0x1ec6   :  { %v3748_v27 = vpop.xlane.xlu1 %3747 }
0x1ec7   :  { %v6228_v55 = vmul.f32 0.015625, %v3748_v27  ;;  %v4421_v27 = vld [vmem:[%s6390_s9 + $0x328] sm:$0xff] }
0x1ec8   :  { %v3758_v33 = vpop.xlane.xlu2 %3757  ;;  %3932 = vmatpush.msra.mxu1 %v4421_v27 }
0x1ec9   :  { %v3764_v41 = vmul.f32 %v6228_v55, %v6228_v55  ;;  %v3762_v34 = vmul.f32 0.015625, %v3758_v33  ;;  %v3768_v4 = vsub.f32 %v6171_v2, %v6228_v55  ;;  %v4495_v2 = vld [vmem:[%s6388_s12 + $0x3] ss:$0 sm:$0xff] }
0x1eca   :  { %v4420_v55 = vld [vmem:[%s6390_s9 + $0x320] sm:$0xff] }
0x1ecb   :  { %v3766_v35 = vsub.f32 %v3762_v34, %v3764_v41  ;;  %3933 = vmatpush.msra.mxu1 %v4420_v55  ;;  %v4432_v33 = vld [vmem:[%s6390_s9 + $0x380] sm:$0xff]  ;;  %v4418_v41 = vld [vmem:[%s6390_s9 + $0x310] sm:$0xff]  ;;  %v4417_v34 = vld [vmem:[%s6390_s9 + $0x308] sm:$0xff] }
0x1ecd   :  { %v3770_v39 = vadd.f32 1e-05, %v3766_v35  ;;  %3934 = vmatpush.msra.mxu1 %v4419_v29  ;;  %v4416_v35 = vld [vmem:[%s6390_s9 + $0x300] sm:$0xff] }
0x1ece   :  { %v3751_v36 = vpop.xlane.xlu0 %3750 }
0x1ecf   :  { %4651 = vrsqrt.f32 %v3770_v39  ;;  %v6238_v38 = vmul.f32 0.015625, %v3751_v36  ;;  %vm3778_vm2 = vweird.f32 %v3770_v39  ;;  %3935 = vmatpush.msra.mxu1 %v4418_v41 }
0x1ed0   :  { %v3761_v28 = vpop.xlane.xlu2 %3760 }
0x1ed1   :  { %v3765_v44 = vmul.f32 %v6238_v38, %v6238_v38  ;;  %v3763_v31 = vmul.f32 0.015625, %v3761_v28  ;;  %v3769_v22 = vsub.f32 %v6179_v7, %v6238_v38  ;;  %v4434_v7 = vld [vmem:[%s6390_s9 + $0x390] sm:$0xff]  ;;  %3936 = vmatpush.msra.mxu1 %v4417_v34  ;;  %v4498_v34 = vld [vmem:[%s6394_s14 + $0x3] ss:$0 sm:$0xff] }
0x1ed2   :  { %3958 = vmatpush.msrb.mxu2 %v4434_v7 }
0x1ed3   :  { %v3767_v49 = vsub.f32 %v3763_v31, %v3765_v44  ;;  %3937 = vmatpush.msra.mxu1 %v4416_v35 }
0x1ed4   :  { %3959 = vmatpush.msrb.mxu2 %v4433_v16  ;;  %v4497_v16 = vld [vmem:[%s6393_s13 + $0x3] ss:$0 sm:$0xff] }
0x1ed5   :  { %v4652_v32 = vpop.eup %4651  ;;  %v3771_v53 = vadd.f32 1e-05, %v3767_v49 }
0x1ed6   :  { %v3773_v56 = vmul.f32 %v4652_v32, %v3770_v39  ;;  %vm3779_vm1 = vweird.f32 %v4652_v32  ;;  %3960 = vmatpush.msrb.mxu2 %v4432_v33  ;;  %v4411_v39 = vld [vmem:[%s6392_s8 + $0x6] sm:$0x3] }
0x1ed7   :  { %4653 = vrsqrt.f32 %v3771_v53  ;;  %vm3780_vm3 = vmor %vm3778_vm2, %vm3779_vm1  ;;  %vm3788_vm5 = vweird.f32 %v3771_v53  ;;  %v3825_v36 = vperm.slane %v4411_v39, 1  ;;  %v3824_v28 = vperm.slane %v4411_v39, 0 }
0x1ed8   :  { %v3774_v24 = vmul.f32 %v4652_v32, %v3773_v56 }
0x1eda   :  { %v3775_v60 = vmul.f32 0.5, %v3774_v24 }
0x1edc   :  { %v3776_v63 = vsub.f32 1.5, %v3775_v60 }
0x1edd   :  { %v4654_v48 = vpop.eup %4653 }
0x1ede   :  { %v3777_v1 = vmul.f32 %v4652_v32, %v3776_v63  ;;  %v3783_v61 = vmul.f32 %v4654_v48, %v3771_v53  ;;  %vm3789_vm4 = vweird.f32 %v4654_v48  ;;  %v4496_v53 = vld [vmem:[%s6391_s10 + $0x3] ss:$0 sm:$0xff] }
0x1edf   :  { %vm3790_vm12 = vmor %vm3788_vm5, %vm3789_vm4 }
0x1ee0   :  { %v3781_v8 = vsel %vm3780_vm3, %v4652_v32, %v3777_v1  ;;  %v3784_v21 = vmul.f32 %v4654_v48, %v3783_v61  ;;  %v22_v32 = vstv %s6395_s16 }
0x1ee1   :  { %v3792_v10 = vmul.f32 %v3781_v8, %v3768_v4  ;;  %23 = vst [vmem:[#allocation4] sm:$0x1] %v22_v32 }
0x1ee2   :  { %v3785_v15 = vmul.f32 0.5, %v3784_v21 }
0x1ee3   :  { %v3797_v12 = vmul.f32 %v4494_v5, %v3792_v10 }
0x1ee4   :  { %v3786_v18 = vsub.f32 1.5, %v3785_v15 }
0x1ee5   :  { %v3802_v19 = vadd.f32 %v4495_v2, %v3797_v12 }
0x1ee6   :  { %v3787_v47 = vmul.f32 %v4654_v48, %v3786_v18 }
0x1ee7   :  { %4412 = vmatmul.msk.f32.vlgmr.msra.gmra.mxu3 %vm104_vm0, %v3802_v19  ;;  %4414 = vmatmul.msk.f32.vlgmr.msrb.gmra.mxu0 %vm104_vm0, %v3802_v19 }
0x1ee8   :  { %v3791_v13 = vsel %vm3790_vm12, %v4654_v48, %v3787_v47  ;;  %v4033_v3 = vld [vmem:[#allocation4] sm:$0x1] }
0x1ee9   :  { %v3793_v25 = vmul.f32 %v3791_v13, %v3769_v22 }
0x1eeb   :  { %v3798_v17 = vmul.f32 %v4494_v5, %v3793_v25 }
0x1eed   :  { %v3803_v40 = vadd.f32 %v4495_v2, %v3798_v17 }
0x1eef   :  { %4413 = vmatmul.msk.f32.gmra.mxu3 %vm104_vm0, %v3803_v40  ;;  %4415 = vmatmul.msk.f32.gmra.mxu0 %vm104_vm0, %v3803_v40 }
0x1f64   :  { %v3874_v38 = vpop.f32.mrf.mxu0 }
0x1f65   :  { %v3875_v26 = vadd.f32 %v3874_v38, %v3825_v36 }
0x1f67   :  { %v3881_v42 = vmax.f32 %v3875_v26, 0.0 }
0x1f69   :  { %3961 = vmatmul.f32.vlgmr.msrb.gmra.mxu2 %v3881_v42 }
0x1f6a   :  { %v3851_v30 = vpop.f32.mrf.mxu3 }
0x1f6b   :  { %v3852_v43 = vadd.f32 %v3851_v30, %v3824_v28 }
0x1f6c   :  { %v3877_v44 = vpop.f32.mrf.mxu0 }
0x1f6d   :  { %v3880_v31 = vmax.f32 %v3852_v43, 0.0  ;;  %v3878_v46 = vadd.f32 %v3877_v44, %v3825_v36  ;;  %v4032_v44 = vld [vmem:[%s6396_s15] sm:$0x1] }
0x1f6f   :  { %v3883_v23 = vmax.f32 %v3878_v46, 0.0  ;;  %3938 = vmatmul.f32.vlgmr.msra.gmra.mxu1 %v3880_v31 }
0x1f71   :  { %3964 = vmatmul.f32.gmra.mxu2 %v3883_v23 }
0x1f72   :  { %v3854_v49 = vpop.f32.mrf.mxu3 }
0x1f73   :  { %v3855_v50 = vadd.f32 %v3854_v49, %v3824_v28 }
0x1f75   :  { %v3882_v51 = vmax.f32 %v3855_v50, 0.0 }
0x1f77   :  { %3941 = vmatmul.f32.gmra.mxu1 %v3882_v51 }
0x1fec   :  { %v3939_v54 = vpop.f32.mrf.mxu1  ;;  %v3962_v56 = vpop.f32.mrf.mxu2 }
0x1fed   :  { %v3940_v57 = vadd.f32 %v4496_v53, %v3939_v54 }
0x1fef   :  { %v3963_v58 = vadd.f32 %v3962_v56, %v3940_v57 }
0x1ff1   :  { %v3968_v24 = vadd.f32 %v3963_v58, %v3802_v19 }
0x1ff3   :  { %v3974_v37 = vsel %vm104_vm0, %v3968_v24, 0.0  ;;  %v3982_v1 = vmul.f32 %v3968_v24, %v3968_v24 }
0x1ff4   :  { %3975 = vadd.xlane.f32.xlu2 %v3974_v37  ;;  %v3942_v59 = vpop.f32.mrf.mxu1  ;;  %v3965_v52 = vpop.f32.mrf.mxu2 }
0x1ff5   :  { %v3943_v60 = vadd.f32 %v4496_v53, %v3942_v59  ;;  %v3984_v61 = vsel %vm104_vm0, %v3982_v1, 0.0 }
0x1ff7   :  { %v3966_v62 = vadd.f32 %v3965_v52, %v3943_v60 }
0x1ff9   :  { %v3969_v63 = vadd.f32 %v3966_v62, %v3803_v40 }
0x1ffb   :  { %v3977_v45 = vsel %vm104_vm0, %v3969_v63, 0.0  ;;  %v3983_v48 = vmul.f32 %v3969_v63, %v3969_v63 }
0x1ffc   :  { %3978 = vadd.xlane.f32.xlu1 %v3977_v45 }
0x1ffd   :  { %v3987_v0 = vsel %vm104_vm0, %v3983_v48, 0.0 }
0x1ffe   :  { %3988 = vadd.xlane.f32.xlu0 %v3987_v0 }
0x2004   :  { %3985 = vadd.xlane.f32.xlu1 %v3984_v61 }
0x2012   :  { %4036 = vperm.xlu0 %4462, %v4033_v3  }
0x2067   :  { %v3976_v6 = vpop.xlane.xlu2 %3975 }
0x2068   :  { %v3980_v2 = vmul.f32 0.015625, %v3976_v6 }
0x206a   :  { %v3992_v12 = vmul.f32 %v3980_v2, %v3980_v2  ;;  %v3996_v38 = vsub.f32 %v3968_v24, %v3980_v2 }
0x206f   :  { %v3979_v4 = vpop.xlane.xlu1 %3978 }
0x2070   :  { %v3981_v5 = vmul.f32 0.015625, %v3979_v4 }
0x2071   :  { %v3989_v8 = vpop.xlane.xlu0 %3988 }
0x2072   :  { %v3993_v21 = vmul.f32 %v3981_v5, %v3981_v5  ;;  %v3991_v9 = vmul.f32 0.015625, %v3989_v8  ;;  %v3997_v55 = vsub.f32 %v3969_v63, %v3981_v5 }
0x2074   :  { %v3995_v10 = vsub.f32 %v3991_v9, %v3993_v21 }
0x2076   :  { %v3999_v11 = vadd.f32 1e-05, %v3995_v10 }
0x2077   :  { %v3986_v15 = vpop.xlane.xlu1 %3985 }
0x2078   :  { %4655 = vrsqrt.f32 %v3999_v11  ;;  %v3990_v14 = vmul.f32 0.015625, %v3986_v15  ;;  %vm4016_vm14 = vweird.f32 %v3999_v11 }
0x207a   :  { %v3994_v18 = vsub.f32 %v3990_v14, %v3992_v12 }
0x207c   :  { %v3998_v19 = vadd.f32 1e-05, %v3994_v18 }
0x207e   :  { %v4656_v20 = vpop.eup %4655  ;;  %4657 = vrsqrt.f32 %v3998_v19  ;;  %vm4006_vm7 = vweird.f32 %v3998_v19 }
0x207f   :  { %v4011_v47 = vmul.f32 %v4656_v20, %v3999_v11  ;;  %vm4017_vm13 = vweird.f32 %v4656_v20 }
0x2080   :  { %vm4018_vm15 = vmor %vm4016_vm14, %vm4017_vm13 }
0x2081   :  { %v4012_v22 = vmul.f32 %v4656_v20, %v4011_v47 }
0x2083   :  { %v4013_v13 = vmul.f32 0.5, %v4012_v22 }
0x2084   :  { %v4658_v25 = vpop.eup %4657  ;;  %v4037_v31 = vpop.permute.xlu0 %4036 }
0x2085   :  { %v4014_v17 = vsub.f32 1.5, %v4013_v13  ;;  %v4001_v40 = vmul.f32 %v4658_v25, %v3998_v19  ;;  %vm4007_vm6 = vweird.f32 %v4658_v25  ;;  %v4039_v46 = vperm.slane %v4037_v31, 0 }
0x2086   :  { %vm4008_vm8 = vmor %vm4006_vm7, %vm4007_vm6 }
0x2087   :  { %v4015_v27 = vmul.f32 %v4656_v20, %v4014_v17  ;;  %v4002_v7 = vmul.f32 %v4658_v25, %v4001_v40 }
0x2089   :  { %v4019_v29 = vsel %vm4018_vm15, %v4656_v20, %v4015_v27  ;;  %v4003_v33 = vmul.f32 0.5, %v4002_v7 }
0x208a   :  { %v4021_v41 = vmul.f32 %v4019_v29, %v3997_v55 }
0x208b   :  { %v4004_v35 = vsub.f32 1.5, %v4003_v33 }
0x208c   :  { %v4026_v39 = vmul.f32 %v4497_v16, %v4021_v41 }
0x208d   :  { %v4005_v36 = vmul.f32 %v4658_v25, %v4004_v35 }
0x208e   :  { %v4031_v26 = vadd.f32 %v4498_v34, %v4026_v39 }
0x208f   :  { %v4009_v42 = vsel %vm4008_vm8, %v4658_v25, %v4005_v36 }
0x2090   :  { %v4020_v28 = vmul.f32 %v4009_v42, %v3996_v38  ;;  %4451 = vmatpush.xpose.msk.msrb.mxu3 %vm104_vm0, %v4031_v26 }
0x2092   :  { %v4025_v30 = vmul.f32 %v4497_v16, %v4020_v28 }
0x2094   :  { %v4030_v43 = vadd.f32 %v4498_v34, %v4025_v30 }
0x2096   :  { %4452 = vmatpush.xpose.msk.msrb.mxu3 %vm104_vm0, %v4030_v43 }
0x2099   :  { %4453 = vmatmul.msk.f32.vlgmr.msrb.gmra.mxu3 %vm104_vm0, %v4032_v44 }
0x211c   :  { %v4066_v23 = vpop.f32.mrf.mxu3 }
0x211d   :  { %v4067_v49 = vadd.f32 %v4066_v23, %v4039_v46 }
0x211f   :  { %4070 = vst.msk [vmem:[%s6397_s17] sm:$0x1] %vm4069_vm9, %v4067_v49 }

</bundles_post_ra>
